<compile_context>
chip_gen: v7x
topology: tpu7x:2x2x1
jax: 0.10.0
libtpu: 0.0.40
codegen_flags: <defaults>
</compile_context>

<pallas_src>
import functools
import math

import jax
import jax.numpy as jnp
from jax.experimental import pallas as pl
from jax.experimental.pallas import tpu as pltpu

EPS = 1e-5


def _elu(x):
    # torch.nn.ELU(alpha=1): x if x > 0 else exp(x) - 1   (exp runs on the EUP)
    return jnp.where(x > 0, x, jnp.exp(jnp.minimum(x, 0.0)) - 1.0)


def _write_stats(st_ref, y):
    """Per-tile partial channel statistics for train-mode BN (single pass).

    y: (ch, TM) channel-major tile; st_ref block: (1, ch, 2) = [sum, sumsq].
    """
    st_ref[0, :, 0:1] = jnp.sum(y, axis=1, keepdims=True)
    st_ref[0, :, 1:2] = jnp.sum(y * y, axis=1, keepdims=True)


# ----------------------------- Pallas kernels ------------------------------ #

def _t0_kernel(a_ref, w0_ref, b0_ref, y_ref, st_ref):
    """conv_t0 as one MXU matmul (channel-major) + bias + ELU.

    a_ref:  (3K, TM)  points patch tile (lane-dense)
    w0_ref: (KK, 3K)  conv_t0 weight, VMEM-resident
    y_ref:  (KK, TM)  pre-BN0 activations (lane-dense store)
    st_ref: (1, KK, 2) per-tile [sum, sumsq] for BN0
    """
    x = jnp.dot(w0_ref[...], a_ref[...], preferred_element_type=jnp.float32)
    y = _elu(x + b0_ref[...])
    y_ref[...] = y
    _write_stats(st_ref, y)


def _t1_kernel(y0_ref, mu0_ref, rstd0_ref, wbd_ref, b1_ref, y_ref, st_ref):
    """BN0 normalize + conv_t1 (depthwise as block-diagonal MXU matmul) + ELU.

    y0_ref:  (KK, TM)  pre-BN0 activations (lane-dense load)
    wbd_ref: (KK, KK)  block-diagonal depthwise weight, VMEM-resident
    y_ref:   (KK, TM)  pre-BN1 activations
    st_ref:  (1, KK, 2) per-tile [sum, sumsq] for BN1
    """
    x0n = (y0_ref[...] - mu0_ref[...]) * rstd0_ref[...]
    x1 = jnp.dot(wbd_ref[...], x0n, preferred_element_type=jnp.float32)
    y = _elu(x1 + b1_ref[...])
    y_ref[...] = y
    _write_stats(st_ref, y)


def _bmm_sep_kernel(x_ref, f_ref, wp_ref, rs_ref, bs_ref, y_ref, st_ref):
    """X-transform bmm fused with the depthwise separable conv + ELU.

    Channel-major, fully lane-dense (TM on the lane axis everywhere):
      g = Wp @ X :  g[(b,c), r] = sum_a Ws[a,c] * X[r,a,b]           (MXU)
      h = g * F  :  one full 128-lane elementwise multiply            (VPU)
      y = Rs @ h :  y[c, r]    = sum_b h[(b,c), r]                    (MXU)
    so y[c, r] = sum_a Ws[a,c] * sum_b X[r,a,b] * F[r,b,c]  (bmm + depthwise).

    x_ref: (KK, TM)   X matrices, x[a*K+b, r] = X[r, a, b]
    f_ref: (K*C, TM)  features,   f[b*C+c, r] = F[r, b, c]
    wp_ref: (K*C, KK) resident;  rs_ref: (C, K*C) resident
    y_ref: (C, TM)    pre-BN2 activations (channel-major, lane-dense)
    st_ref: (1, C, 2) per-tile [sum, sumsq] for BN2
    """
    g = jnp.dot(wp_ref[...], x_ref[...], preferred_element_type=jnp.float32)
    h = g * f_ref[...]
    y = jnp.dot(rs_ref[...], h, preferred_element_type=jnp.float32)
    y = _elu(y + bs_ref[...])
    y_ref[...] = y
    _write_stats(st_ref, y)


# ------------------------------ host helpers ------------------------------- #

def _default_tile_rows():
    """Generation-aware tile target for the point (lane) axis."""
    try:
        kind = jax.devices()[0].device_kind.lower()
    except Exception:  # pragma: no cover - conservative fallback
        return 512
    # Single-TensorCore chips (v5e / v6e): bigger tiles amortize the fixed
    # per-grid-step overhead and VMEM is plentiful (128 MiB).
    if ("v5 lite" in kind) or ("v5e" in kind) or ("v6" in kind):
        return 2048
    # v7x (2 TCs, 64 MiB VMEM) and anything unknown: keep tiles modest so the
    # grid count stays even and >= 4.
    return 512


def _pick_tile_rows(np_rows, target):
    """Largest multiple-of-128 divisor of np_rows <= target, preferring an even
    number of tiles (so the 'parallel' grid splits cleanly across 2 TCs)."""
    if np_rows % 128 != 0:
        return np_rows                        # single full-width tile (legal)
    divs = [d for d in range(128, np_rows + 1, 128) if np_rows % d == 0]
    cand = [d for d in divs if d <= target] or [divs[0]]
    even = [d for d in cand if (np_rows // d) % 2 == 0]
    return max(even) if even else max(cand)


def _resident(shape):
    # Constant index_map -> block stays VMEM-resident, no re-DMA per grid step.
    n = len(shape)
    return pl.BlockSpec(shape, lambda i, _n=n: (0,) * _n)


def _col_tiled(ch, tm):
    # Channel-major (ch, N*P) arrays tiled along the lane (point) axis.
    return pl.BlockSpec((ch, tm), lambda i: (0, i))


def _stats_spec(ch):
    return pl.BlockSpec((1, ch, 2), lambda i: (i, 0, 0))


def _compiler_params():
    # No cross-step accumulators (partial stats land in per-tile output slots),
    # so the grid axis is parallel -> shards across the 2 TensorCores on v7x.
    return pltpu.CompilerParams(dimension_semantics=("parallel",),
                                vmem_limit_bytes=32 * 1024 * 1024)


def _finalize_stats(st, count):
    """Reduce per-tile partial stats -> (mean, rstd) for train-mode BatchNorm."""
    s = jnp.sum(st, axis=0)                              # (ch, 2)
    mean = s[:, 0] / count
    var = jnp.maximum(s[:, 1] / count - mean * mean, 0.0)   # biased variance
    rstd = jax.lax.rsqrt(var + EPS)
    return mean, rstd                                    # (ch,), (ch,)


def prepare_params(params, K, C):
    """One-time weight preprocessing (hoisted out of the per-call path)."""
    KK = K * K
    f32 = jnp.float32
    W0, b0 = params["W0"], params["b0"]
    W1, b1 = params["W1"], params["b1"]
    Ws, bs = params["Ws"], params["bs"]
    eyeK = jnp.eye(K, dtype=f32)

    # conv_t0 as a dense matmul over the flattened (3,K) patch (channel-major LHS)
    W0m = W0.reshape(KK, 3 * K).astype(f32)                            # (KK, 3K)

    # conv_t1 depthwise (groups=K, depth K) as a block-diagonal matmul:
    # Wbd[g*K+m, g'*K+w] = W1[g*K+m, 0, 0, w] * delta(g, g')
    W1r = W1.reshape(K, K, K).astype(f32)                              # [g, m, w]
    Wbd = (W1r[:, :, None, :] * eyeK[:, None, :, None]).reshape(KK, KK)

    # Stage-B contraction matrix: Wp[(b,c), (a,b')] = Ws[a,c] * delta(b, b')
    Ws_kc = Ws.reshape(C, K).T.astype(f32)                             # [a(tap), c]
    Wp = (Ws_kc.T[None, :, :, None] * eyeK[:, None, None, :]).reshape(K * C, KK)

    # Block-sum matrix: Rs[c', b*C+c] = delta(c, c')
    Rs = jnp.tile(jnp.eye(C, dtype=f32), (1, K))                       # (C, K*C)

    return dict(
        W0m=W0m, b0=b0.reshape(KK, 1).astype(f32),
        Wbd=Wbd, b1=b1.reshape(KK, 1).astype(f32),
        Wp=Wp, Rs=Rs, bs=bs.reshape(C, 1).astype(f32),
    )


def xconv_forward(nn_pts_local, nn_fts_input, prepared, *, tile_rows=None):
    N, C0, P, K = nn_pts_local.shape
    assert C0 == 3
    C = nn_fts_input.shape[1]
    KK = K * K
    KC = K * C
    NP = N * P
    if tile_rows is None:
        tile_rows = _default_tile_rows()
    TM = _pick_tile_rows(NP, tile_rows)
    nt = NP // TM
    cp = _compiler_params()

    # Channel-major (lane-dense) point-patch layout: A_T[c*K+w, n*P+p] = pts[n,c,p,w]
    A_T = jnp.transpose(nn_pts_local, (1, 3, 0, 2)).reshape(3 * K, NP).astype(jnp.float32)

    # ------------- stage A.0: conv_t0 + ELU (+ BN0 partial stats) ------------ #
    y0, st0 = pl.pallas_call(
        _t0_kernel,
        out_shape=(jax.ShapeDtypeStruct((KK, NP), jnp.float32),
                   jax.ShapeDtypeStruct((nt, KK, 2), jnp.float32)),
        grid=(nt,),
        in_specs=[_col_tiled(3 * K, TM),
                  _resident(prepared["W0m"].shape),
                  _resident(prepared["b0"].shape)],
        out_specs=(_col_tiled(KK, TM), _stats_spec(KK)),
        compiler_params=cp,
    )(A_T, prepared["W0m"], prepared["b0"])
    mu0, rstd0 = _finalize_stats(st0, NP)

    # ------- stage A.1: BN0 + conv_t1 (depthwise) + ELU (+ BN1 stats) -------- #
    y1, st1 = pl.pallas_call(
        _t1_kernel,
        out_shape=(jax.ShapeDtypeStruct((KK, NP), jnp.float32),
                   jax.ShapeDtypeStruct((nt, KK, 2), jnp.float32)),
        grid=(nt,),
        in_specs=[_col_tiled(KK, TM),
                  _resident((KK, 1)), _resident((KK, 1)),
                  _resident(prepared["Wbd"].shape),
                  _resident(prepared["b1"].shape)],
        out_specs=(_col_tiled(KK, TM), _stats_spec(KK)),
        compiler_params=cp,
    )(y0, mu0.reshape(KK, 1), rstd0.reshape(KK, 1),
      prepared["Wbd"], prepared["b1"])
    mu1, rstd1 = _finalize_stats(st1, NP)

    # conv_t2 of the reference is dead code w.r.t. the output (X_2 is overwritten
    # by X_1.view(...) before use), so it is intentionally skipped.

    # ---- glue (XLA-fused): BN1 normalize + exact torch view/permute chain ---- #
    x1n_T = (y1 - mu1[:, None]) * rstd1[:, None]                        # (KK, NP)
    V = x1n_T.reshape(K, K, N, P).transpose(2, 0, 3, 1).reshape(N, K, K, P)
    Xf_T = jnp.transpose(V, (1, 2, 0, 3)).reshape(KK, NP)               # X[r,a,b] @ row a*K+b
    # Feature layout: Ff_T[b*C+c, n*P+p] = nn_fts_input[n, c, p, b]
    Ff_T = jnp.transpose(nn_fts_input, (3, 1, 0, 2)).reshape(KC, NP).astype(jnp.float32)

    # -- stage B: bmm(X, F) fused with depthwise sep-conv + ELU (+ BN2 stats) -- #
    y2, st2 = pl.pallas_call(
        _bmm_sep_kernel,
        out_shape=(jax.ShapeDtypeStruct((C, NP), jnp.float32),
                   jax.ShapeDtypeStruct((nt, C, 2), jnp.float32)),
        grid=(nt,),
        in_specs=[_col_tiled(KK, TM), _col_tiled(KC, TM),
                  _resident(prepared["Wp"].shape),
                  _resident(prepared["Rs"].shape),
                  _resident(prepared["bs"].shape)],
        out_specs=(_col_tiled(C, TM), _stats_spec(C)),
        compiler_params=cp,
    )(Xf_T, Ff_T, prepared["Wp"], prepared["Rs"], prepared["bs"])
    mu2, rstd2 = _finalize_stats(st2, NP)

    # Final BN2 normalize + NCHW layout: output is already channel-major, so the
    # epilogue is a cheap elementwise op + an N-major reshape/transpose.
    out_T = (y2 - mu2[:, None]) * rstd2[:, None]                        # (C, NP)
    return out_T.reshape(C, N, P).transpose(1, 0, 2)[:, :, :, None]     # (N, C, P, 1)


# --------------------------- pure-JAX reference ----------------------------- #

def xconv_reference(nn_pts_local, nn_fts_input, params):
    """f32 plain-JAX forward with the same semantics (for self-checking)."""
    N, _, P, K = nn_pts_local.shape
    C = nn_fts_input.shape[1]
    KK = K * K
    W0, b0 = params["W0"], params["b0"]
    W1, b1 = params["W1"], params["b1"]
    Ws, bs = params["Ws"], params["bs"]
    hi = jax.lax.Precision.HIGHEST

    def bn(x):  # train-mode BatchNorm2d, weight=1, bias=0
        mean = jnp.mean(x, axis=(0, 2, 3), keepdims=True)
        var = jnp.mean((x - mean) ** 2, axis=(0, 2, 3), keepdims=True)
        return (x - mean) * jax.lax.rsqrt(var + EPS)

    x0 = jnp.einsum('ncpw,ocw->nop', nn_pts_local, W0[:, :, 0, :],
                    precision=hi) + b0[None, :, None]
    x0 = bn(_elu(x0[..., None]))                                       # (N,KK,P,1)
    X_0 = x0[..., 0].reshape(N, K, K, P).transpose(0, 1, 3, 2)         # (N,K,P,K)

    W1r = W1[:, 0, 0, :].reshape(K, K, K)                              # [g, m, w]
    x1 = jnp.einsum('ngpw,gmw->ngmp', X_0, W1r,
                    precision=hi).reshape(N, KK, P) + b1[None, :, None]
    x1 = bn(_elu(x1[..., None]))                                       # (N,KK,P,1)
    X_1 = x1[..., 0].reshape(N, K, K, P).transpose(0, 1, 3, 2)         # (N,K,P,K)

    X = jnp.transpose(X_1.reshape(N, K, K, P), (0, 3, 1, 2)).reshape(N * P, K, K)
    Fm = jnp.transpose(nn_fts_input, (0, 2, 3, 1)).reshape(N * P, K, C)
    fts_X = jnp.einsum('rab,rbc->rac', X, Fm, precision=hi)            # (NP,K,C)
    fX = fts_X.reshape(N, P, K, C).transpose(0, 3, 1, 2)               # (N,C,P,K)

    dw = jnp.einsum('ncpw,cw->ncp', fX, Ws[:, 0, 0, :],
                    precision=hi) + bs[None, :, None]
    return bn(_elu(dw[..., None]))                                     # (N,C,P,1)


# ------------------------------ parameter init ------------------------------ #

def init_params(key, K, C):
    KK = K * K

    def xavier(k, shape):
        fan_in = shape[1] * shape[2] * shape[3]
        fan_out = shape[0] * shape[2] * shape[3]
        bound = math.sqrt(6.0 / (fan_in + fan_out))
        return jax.random.uniform(k, shape, jnp.float32, -bound, bound)

    k0, k1, k2 = jax.random.split(key, 3)
    return dict(
        W0=xavier(k0, (KK, 3, 1, K)), b0=jnp.zeros((KK,), jnp.float32),
        W1=xavier(k1, (KK, 1, 1, K)), b1=jnp.zeros((KK,), jnp.float32),
        Ws=xavier(k2, (C, 1, 1, K)), bs=jnp.zeros((C,), jnp.float32),
    )


if __name__ == "__main__":
    # K*C = 128 => the stage-B feature tile is exactly lane-width aligned.
    # NP = 2048 => an even, pipelined grid on every generation (nt=4 at TM=512).
    N, P, K, C = 2, 1024, 8, 16
    key = jax.random.PRNGKey(0)
    kp, kf, kw = jax.random.split(key, 3)
    nn_pts_local = jax.random.normal(kp, (N, 3, P, K), jnp.float32)
    nn_fts_input = jax.random.normal(kf, (N, C, P, K), jnp.float32)
    params = init_params(kw, K, C)
    prepared = prepare_params(params, K, C)

    fwd = jax.jit(functools.partial(xconv_forward, prepared=prepared))
    out = fwd(nn_pts_local, nn_fts_input)
    jax.block_until_ready(out)
    assert out.shape == (N, C, P, 1), out.shape
    assert bool(jnp.all(jnp.isfinite(out)))

    # Self-check against the pure-JAX HIGHEST-precision reference.  The Pallas
    # path keeps f32 MXU operands, so the tolerance is 4x tighter than the
    # previous bf16 version while still leaving margin for MXU pass rounding
    # and the single-pass BN variance reduction.
    ref = xconv_reference(nn_pts_local, nn_fts_input, params)
    max_err = float(jnp.max(jnp.abs(out - ref)))
    assert max_err < 0.05, max_err

    print("KERNEL_OK")
</pallas_src>

<mosaic_0001>
module attributes {stable_mosaic.version = 11 : i64} {
  func.func @_t0_kernel(%arg0: i32, %arg1: memref<24x512xf32, #tpu.memory_space<vmem>>, %arg2: memref<64x24xf32, #tpu.memory_space<vmem>>, %arg3: memref<64x1xf32, #tpu.memory_space<vmem>>, %arg4: memref<64x512xf32, #tpu.memory_space<vmem>>, %arg5: memref<1x64x2xf32, #tpu.memory_space<vmem>>) attributes {dimension_semantics = [#tpu.dimension_semantics<parallel>], iteration_bounds = array<i64: 4>, scalar_prefetch = 0 : i64, scratch_operands = 0 : i64, tpu.core_type = #tpu.core_type<tc>, window_params = [{transform_indices = @transform_0, window_bounds = array<i64: 24, 512>}, {pipeline_mode = #tpu.pipeline_mode<synchronous>, transform_indices = @transform_1, window_bounds = array<i64: 64, 24>}, {pipeline_mode = #tpu.pipeline_mode<synchronous>, transform_indices = @transform_2, window_bounds = array<i64: 64, 1>}, {transform_indices = @transform_3, window_bounds = array<i64: 64, 512>}, {transform_indices = @transform_4, window_bounds = array<i64: 1, 64, 2>}]} {
    %c0 = arith.constant 0 : index
    %c0_0 = arith.constant 0 : index
    %0 = vector.load %arg2[%c0, %c0_0] : memref<64x24xf32, #tpu.memory_space<vmem>>, vector<64x24xf32>
    %c0_1 = arith.constant 0 : index
    %c0_2 = arith.constant 0 : index
    %1 = vector.load %arg1[%c0_1, %c0_2] : memref<24x512xf32, #tpu.memory_space<vmem>>, vector<24x512xf32>
    %cst = arith.constant dense<0.000000e+00> : vector<64x512xf32>
    %2 = tpu.matmul %0, %1, %cst {dimension_numbers = #tpu.dot_dimension_numbers<[1], [0], [0], [1], [0, 0, 1, 1], [], []>} : vector<64x24xf32>, vector<24x512xf32>, vector<64x512xf32> -> vector<64x512xf32>
    %c0_3 = arith.constant 0 : index
    %c0_4 = arith.constant 0 : index
    %3 = vector.load %arg3[%c0_3, %c0_4] : memref<64x1xf32, #tpu.memory_space<vmem>>, vector<64x1xf32>
    %4 = vector.broadcast %3 : vector<64x1xf32> to vector<64x512xf32>
    %5 = arith.addf %2, %4 : vector<64x512xf32>
    %cst_5 = arith.constant 0.000000e+00 : f32
    %6 = vector.broadcast %cst_5 : f32 to vector<64x512xf32>
    %7 = arith.cmpf ogt, %5, %6 : vector<64x512xf32>
    %cst_6 = arith.constant 0.000000e+00 : f32
    %8 = vector.broadcast %cst_6 : f32 to vector<64x512xf32>
    %9 = arith.minimumf %5, %8 : vector<64x512xf32>
    %10 = math.exp %9 : vector<64x512xf32>
    %cst_7 = arith.constant 1.000000e+00 : f32
    %11 = vector.broadcast %cst_7 : f32 to vector<64x512xf32>
    %12 = arith.subf %10, %11 : vector<64x512xf32>
    %13 = arith.select %7, %5, %12 : vector<64x512xi1>, vector<64x512xf32>
    %c0_8 = arith.constant 0 : index
    %c0_9 = arith.constant 0 : index
    %14 = vector.load %arg4[%c0_8, %c0_9] : memref<64x512xf32, #tpu.memory_space<vmem>>, vector<64x512xf32>
    tpu.vector_store %arg4[%c0_8, %c0_9], %13 {strides = array<i32>} : memref<64x512xf32, #tpu.memory_space<vmem>>, vector<64x512xf32>,
    %cst_10 = arith.constant dense<0.000000e+00> : vector<64xf32>
    %15 = vector.multi_reduction <add>, %13, %cst_10 [1] : vector<64x512xf32> to vector<64xf32>
    %16 = vector.shape_cast %15 : vector<64xf32> to vector<64x1xf32>
    %c0_11 = arith.constant 0 : index
    %c0_12 = arith.constant 0 : index
    %c0_13 = arith.constant 0 : index
    %17 = vector.load %arg5[%c0_11, %c0_12, %c0_13] : memref<1x64x2xf32, #tpu.memory_space<vmem>>, vector<1x64x1xf32>
    %18 = vector.shape_cast %17 : vector<1x64x1xf32> to vector<64x1xf32>
    %19 = vector.shape_cast %16 : vector<64x1xf32> to vector<1x64x1xf32>
    tpu.vector_store %arg5[%c0_11, %c0_12, %c0_13], %19 {strides = array<i32>} : memref<1x64x2xf32, #tpu.memory_space<vmem>>, vector<1x64x1xf32>,
    %20 = arith.mulf %13, %13 : vector<64x512xf32>
    %cst_14 = arith.constant dense<0.000000e+00> : vector<64xf32>
    %21 = vector.multi_reduction <add>, %20, %cst_14 [1] : vector<64x512xf32> to vector<64xf32>
    %22 = vector.shape_cast %21 : vector<64xf32> to vector<64x1xf32>
    %c0_15 = arith.constant 0 : index
    %c0_16 = arith.constant 0 : index
    %c1 = arith.constant 1 : index
    %23 = vector.load %arg5[%c0_15, %c0_16, %c1] : memref<1x64x2xf32, #tpu.memory_space<vmem>>, vector<1x64x1xf32>
    %24 = vector.shape_cast %23 : vector<1x64x1xf32> to vector<64x1xf32>
    %25 = vector.shape_cast %22 : vector<64x1xf32> to vector<1x64x1xf32>
    tpu.vector_store %arg5[%c0_15, %c0_16, %c1], %25 {strides = array<i32>} : memref<1x64x2xf32, #tpu.memory_space<vmem>>, vector<1x64x1xf32>,
    return
  }
  func.func @transform_0(%arg0: i32) -> (i32, i32) {
    %c0_i32 = arith.constant 0 : i32
    %c0_i32_0 = arith.constant 0 : i32
    return %c0_i32, %arg0 : i32, i32
  }
  func.func @transform_1(%arg0: i32) -> (i32, i32) {
    %c0_i32 = arith.constant 0 : i32
    %c0_i32_0 = arith.constant 0 : i32
    %c0_i32_1 = arith.constant 0 : i32
    return %c0_i32, %c0_i32_0 : i32, i32
  }
  func.func @transform_2(%arg0: i32) -> (i32, i32) {
    %c0_i32 = arith.constant 0 : i32
    %c0_i32_0 = arith.constant 0 : i32
    %c0_i32_1 = arith.constant 0 : i32
    return %c0_i32, %c0_i32_0 : i32, i32
  }
  func.func @transform_3(%arg0: i32) -> (i32, i32) {
    %c0_i32 = arith.constant 0 : i32
    %c0_i32_0 = arith.constant 0 : i32
    return %c0_i32, %arg0 : i32, i32
  }
  func.func @transform_4(%arg0: i32) -> (i32, i32, i32) {
    %c0_i32 = arith.constant 0 : i32
    %c0_i32_0 = arith.constant 0 : i32
    %c0_i32_1 = arith.constant 0 : i32
    return %arg0, %c0_i32, %c0_i32_0 : i32, i32, i32
  }
}

module attributes {stable_mosaic.version = 11 : i64} {
  func.func @_t1_kernel(%arg0: i32, %arg1: memref<64x512xf32, #tpu.memory_space<vmem>>, %arg2: memref<64x1xf32, #tpu.memory_space<vmem>>, %arg3: memref<64x1xf32, #tpu.memory_space<vmem>>, %arg4: memref<64x64xf32, #tpu.memory_space<vmem>>, %arg5: memref<64x1xf32, #tpu.memory_space<vmem>>, %arg6: memref<64x512xf32, #tpu.memory_space<vmem>>, %arg7: memref<1x64x2xf32, #tpu.memory_space<vmem>>) attributes {dimension_semantics = [#tpu.dimension_semantics<parallel>], iteration_bounds = array<i64: 4>, scalar_prefetch = 0 : i64, scratch_operands = 0 : i64, tpu.core_type = #tpu.core_type<tc>, window_params = [{transform_indices = @transform_0, window_bounds = array<i64: 64, 512>}, {pipeline_mode = #tpu.pipeline_mode<synchronous>, transform_indices = @transform_1, window_bounds = array<i64: 64, 1>}, {pipeline_mode = #tpu.pipeline_mode<synchronous>, transform_indices = @transform_2, window_bounds = array<i64: 64, 1>}, {pipeline_mode = #tpu.pipeline_mode<synchronous>, transform_indices = @transform_3, window_bounds = array<i64: 64, 64>}, {pipeline_mode = #tpu.pipeline_mode<synchronous>, transform_indices = @transform_4, window_bounds = array<i64: 64, 1>}, {transform_indices = @transform_5, window_bounds = array<i64: 64, 512>}, {transform_indices = @transform_6, window_bounds = array<i64: 1, 64, 2>}]} {
    %c0 = arith.constant 0 : index
    %c0_0 = arith.constant 0 : index
    %0 = vector.load %arg1[%c0, %c0_0] : memref<64x512xf32, #tpu.memory_space<vmem>>, vector<64x512xf32>
    %c0_1 = arith.constant 0 : index
    %c0_2 = arith.constant 0 : index
    %1 = vector.load %arg2[%c0_1, %c0_2] : memref<64x1xf32, #tpu.memory_space<vmem>>, vector<64x1xf32>
    %2 = vector.broadcast %1 : vector<64x1xf32> to vector<64x512xf32>
    %3 = arith.subf %0, %2 : vector<64x512xf32>
    %c0_3 = arith.constant 0 : index
    %c0_4 = arith.constant 0 : index
    %4 = vector.load %arg3[%c0_3, %c0_4] : memref<64x1xf32, #tpu.memory_space<vmem>>, vector<64x1xf32>
    %5 = vector.broadcast %4 : vector<64x1xf32> to vector<64x512xf32>
    %6 = arith.mulf %3, %5 : vector<64x512xf32>
    %c0_5 = arith.constant 0 : index
    %c0_6 = arith.constant 0 : index
    %7 = vector.load %arg4[%c0_5, %c0_6] : memref<64x64xf32, #tpu.memory_space<vmem>>, vector<64x64xf32>
    %cst = arith.constant dense<0.000000e+00> : vector<64x512xf32>
    %8 = tpu.matmul %7, %6, %cst {dimension_numbers = #tpu.dot_dimension_numbers<[1], [0], [0], [1], [0, 0, 1, 1], [], []>} : vector<64x64xf32>, vector<64x512xf32>, vector<64x512xf32> -> vector<64x512xf32>
    %c0_7 = arith.constant 0 : index
    %c0_8 = arith.constant 0 : index
    %9 = vector.load %arg5[%c0_7, %c0_8] : memref<64x1xf32, #tpu.memory_space<vmem>>, vector<64x1xf32>
    %10 = vector.broadcast %9 : vector<64x1xf32> to vector<64x512xf32>
    %11 = arith.addf %8, %10 : vector<64x512xf32>
    %cst_9 = arith.constant 0.000000e+00 : f32
    %12 = vector.broadcast %cst_9 : f32 to vector<64x512xf32>
    %13 = arith.cmpf ogt, %11, %12 : vector<64x512xf32>
    %cst_10 = arith.constant 0.000000e+00 : f32
    %14 = vector.broadcast %cst_10 : f32 to vector<64x512xf32>
    %15 = arith.minimumf %11, %14 : vector<64x512xf32>
    %16 = math.exp %15 : vector<64x512xf32>
    %cst_11 = arith.constant 1.000000e+00 : f32
    %17 = vector.broadcast %cst_11 : f32 to vector<64x512xf32>
    %18 = arith.subf %16, %17 : vector<64x512xf32>
    %19 = arith.select %13, %11, %18 : vector<64x512xi1>, vector<64x512xf32>
    %c0_12 = arith.constant 0 : index
    %c0_13 = arith.constant 0 : index
    %20 = vector.load %arg6[%c0_12, %c0_13] : memref<64x512xf32, #tpu.memory_space<vmem>>, vector<64x512xf32>
    tpu.vector_store %arg6[%c0_12, %c0_13], %19 {strides = array<i32>} : memref<64x512xf32, #tpu.memory_space<vmem>>, vector<64x512xf32>,
    %cst_14 = arith.constant dense<0.000000e+00> : vector<64xf32>
    %21 = vector.multi_reduction <add>, %19, %cst_14 [1] : vector<64x512xf32> to vector<64xf32>
    %22 = vector.shape_cast %21 : vector<64xf32> to vector<64x1xf32>
    %c0_15 = arith.constant 0 : index
    %c0_16 = arith.constant 0 : index
    %c0_17 = arith.constant 0 : index
    %23 = vector.load %arg7[%c0_15, %c0_16, %c0_17] : memref<1x64x2xf32, #tpu.memory_space<vmem>>, vector<1x64x1xf32>
    %24 = vector.shape_cast %23 : vector<1x64x1xf32> to vector<64x1xf32>
    %25 = vector.shape_cast %22 : vector<64x1xf32> to vector<1x64x1xf32>
    tpu.vector_store %arg7[%c0_15, %c0_16, %c0_17], %25 {strides = array<i32>} : memref<1x64x2xf32, #tpu.memory_space<vmem>>, vector<1x64x1xf32>,
    %26 = arith.mulf %19, %19 : vector<64x512xf32>
    %cst_18 = arith.constant dense<0.000000e+00> : vector<64xf32>
    %27 = vector.multi_reduction <add>, %26, %cst_18 [1] : vector<64x512xf32> to vector<64xf32>
    %28 = vector.shape_cast %27 : vector<64xf32> to vector<64x1xf32>
    %c0_19 = arith.constant 0 : index
    %c0_20 = arith.constant 0 : index
    %c1 = arith.constant 1 : index
    %29 = vector.load %arg7[%c0_19, %c0_20, %c1] : memref<1x64x2xf32, #tpu.memory_space<vmem>>, vector<1x64x1xf32>
    %30 = vector.shape_cast %29 : vector<1x64x1xf32> to vector<64x1xf32>
    %31 = vector.shape_cast %28 : vector<64x1xf32> to vector<1x64x1xf32>
    tpu.vector_store %arg7[%c0_19, %c0_20, %c1], %31 {strides = array<i32>} : memref<1x64x2xf32, #tpu.memory_space<vmem>>, vector<1x64x1xf32>,
    return
  }
  func.func @transform_0(%arg0: i32) -> (i32, i32) {
    %c0_i32 = arith.constant 0 : i32
    %c0_i32_0 = arith.constant 0 : i32
    return %c0_i32, %arg0 : i32, i32
  }
  func.func @transform_1(%arg0: i32) -> (i32, i32) {
    %c0_i32 = arith.constant 0 : i32
    %c0_i32_0 = arith.constant 0 : i32
    %c0_i32_1 = arith.constant 0 : i32
    return %c0_i32, %c0_i32_0 : i32, i32
  }
  func.func @transform_2(%arg0: i32) -> (i32, i32) {
    %c0_i32 = arith.constant 0 : i32
    %c0_i32_0 = arith.constant 0 : i32
    %c0_i32_1 = arith.constant 0 : i32
    return %c0_i32, %c0_i32_0 : i32, i32
  }
  func.func @transform_3(%arg0: i32) -> (i32, i32) {
    %c0_i32 = arith.constant 0 : i32
    %c0_i32_0 = arith.constant 0 : i32
    %c0_i32_1 = arith.constant 0 : i32
    return %c0_i32, %c0_i32_0 : i32, i32
  }
  func.func @transform_4(%arg0: i32) -> (i32, i32) {
    %c0_i32 = arith.constant 0 : i32
    %c0_i32_0 = arith.constant 0 : i32
    %c0_i32_1 = arith.constant 0 : i32
    return %c0_i32, %c0_i32_0 : i32, i32
  }
  func.func @transform_5(%arg0: i32) -> (i32, i32) {
    %c0_i32 = arith.constant 0 : i32
    %c0_i32_0 = arith.constant 0 : i32
    return %c0_i32, %arg0 : i32, i32
  }
  func.func @transform_6(%arg0: i32) -> (i32, i32, i32) {
    %c0_i32 = arith.constant 0 : i32
    %c0_i32_0 = arith.constant 0 : i32
    %c0_i32_1 = arith.constant 0 : i32
    return %arg0, %c0_i32, %c0_i32_0 : i32, i32, i32
  }
}

module attributes {stable_mosaic.version = 11 : i64} {
  func.func @_bmm_sep_kernel(%arg0: i32, %arg1: memref<64x512xf32, #tpu.memory_space<vmem>>, %arg2: memref<128x512xf32, #tpu.memory_space<vmem>>, %arg3: memref<128x64xf32, #tpu.memory_space<vmem>>, %arg4: memref<16x128xf32, #tpu.memory_space<vmem>>, %arg5: memref<16x1xf32, #tpu.memory_space<vmem>>, %arg6: memref<16x512xf32, #tpu.memory_space<vmem>>, %arg7: memref<1x16x2xf32, #tpu.memory_space<vmem>>) attributes {dimension_semantics = [#tpu.dimension_semantics<parallel>], iteration_bounds = array<i64: 4>, scalar_prefetch = 0 : i64, scratch_operands = 0 : i64, tpu.core_type = #tpu.core_type<tc>, window_params = [{transform_indices = @transform_0, window_bounds = array<i64: 64, 512>}, {transform_indices = @transform_1, window_bounds = array<i64: 128, 512>}, {pipeline_mode = #tpu.pipeline_mode<synchronous>, transform_indices = @transform_2, window_bounds = array<i64: 128, 64>}, {pipeline_mode = #tpu.pipeline_mode<synchronous>, transform_indices = @transform_3, window_bounds = array<i64: 16, 128>}, {pipeline_mode = #tpu.pipeline_mode<synchronous>, transform_indices = @transform_4, window_bounds = array<i64: 16, 1>}, {transform_indices = @transform_5, window_bounds = array<i64: 16, 512>}, {transform_indices = @transform_6, window_bounds = array<i64: 1, 16, 2>}]} {
    %c0 = arith.constant 0 : index
    %c0_0 = arith.constant 0 : index
    %0 = vector.load %arg3[%c0, %c0_0] : memref<128x64xf32, #tpu.memory_space<vmem>>, vector<128x64xf32>
    %c0_1 = arith.constant 0 : index
    %c0_2 = arith.constant 0 : index
    %1 = vector.load %arg1[%c0_1, %c0_2] : memref<64x512xf32, #tpu.memory_space<vmem>>, vector<64x512xf32>
    %cst = arith.constant dense<0.000000e+00> : vector<128x512xf32>
    %2 = tpu.matmul %0, %1, %cst {dimension_numbers = #tpu.dot_dimension_numbers<[1], [0], [0], [1], [0, 0, 1, 1], [], []>} : vector<128x64xf32>, vector<64x512xf32>, vector<128x512xf32> -> vector<128x512xf32>
    %c0_3 = arith.constant 0 : index
    %c0_4 = arith.constant 0 : index
    %3 = vector.load %arg2[%c0_3, %c0_4] : memref<128x512xf32, #tpu.memory_space<vmem>>, vector<128x512xf32>
    %4 = arith.mulf %2, %3 : vector<128x512xf32>
    %c0_5 = arith.constant 0 : index
    %c0_6 = arith.constant 0 : index
    %5 = vector.load %arg4[%c0_5, %c0_6] : memref<16x128xf32, #tpu.memory_space<vmem>>, vector<16x128xf32>
    %cst_7 = arith.constant dense<0.000000e+00> : vector<16x512xf32>
    %6 = tpu.matmul %5, %4, %cst_7 {dimension_numbers = #tpu.dot_dimension_numbers<[1], [0], [0], [1], [0, 0, 1, 1], [], []>} : vector<16x128xf32>, vector<128x512xf32>, vector<16x512xf32> -> vector<16x512xf32>
    %c0_8 = arith.constant 0 : index
    %c0_9 = arith.constant 0 : index
    %7 = vector.load %arg5[%c0_8, %c0_9] : memref<16x1xf32, #tpu.memory_space<vmem>>, vector<16x1xf32>
    %8 = vector.broadcast %7 : vector<16x1xf32> to vector<16x512xf32>
    %9 = arith.addf %6, %8 : vector<16x512xf32>
    %cst_10 = arith.constant 0.000000e+00 : f32
    %10 = vector.broadcast %cst_10 : f32 to vector<16x512xf32>
    %11 = arith.cmpf ogt, %9, %10 : vector<16x512xf32>
    %cst_11 = arith.constant 0.000000e+00 : f32
    %12 = vector.broadcast %cst_11 : f32 to vector<16x512xf32>
    %13 = arith.minimumf %9, %12 : vector<16x512xf32>
    %14 = math.exp %13 : vector<16x512xf32>
    %cst_12 = arith.constant 1.000000e+00 : f32
    %15 = vector.broadcast %cst_12 : f32 to vector<16x512xf32>
    %16 = arith.subf %14, %15 : vector<16x512xf32>
    %17 = arith.select %11, %9, %16 : vector<16x512xi1>, vector<16x512xf32>
    %c0_13 = arith.constant 0 : index
    %c0_14 = arith.constant 0 : index
    %18 = vector.load %arg6[%c0_13, %c0_14] : memref<16x512xf32, #tpu.memory_space<vmem>>, vector<16x512xf32>
    tpu.vector_store %arg6[%c0_13, %c0_14], %17 {strides = array<i32>} : memref<16x512xf32, #tpu.memory_space<vmem>>, vector<16x512xf32>,
    %cst_15 = arith.constant dense<0.000000e+00> : vector<16xf32>
    %19 = vector.multi_reduction <add>, %17, %cst_15 [1] : vector<16x512xf32> to vector<16xf32>
    %20 = vector.shape_cast %19 : vector<16xf32> to vector<16x1xf32>
    %c0_16 = arith.constant 0 : index
    %c0_17 = arith.constant 0 : index
    %c0_18 = arith.constant 0 : index
    %21 = vector.load %arg7[%c0_16, %c0_17, %c0_18] : memref<1x16x2xf32, #tpu.memory_space<vmem>>, vector<1x16x1xf32>
    %22 = vector.shape_cast %21 : vector<1x16x1xf32> to vector<16x1xf32>
    %23 = vector.shape_cast %20 : vector<16x1xf32> to vector<1x16x1xf32>
    tpu.vector_store %arg7[%c0_16, %c0_17, %c0_18], %23 {strides = array<i32>} : memref<1x16x2xf32, #tpu.memory_space<vmem>>, vector<1x16x1xf32>,
    %24 = arith.mulf %17, %17 : vector<16x512xf32>
    %cst_19 = arith.constant dense<0.000000e+00> : vector<16xf32>
    %25 = vector.multi_reduction <add>, %24, %cst_19 [1] : vector<16x512xf32> to vector<16xf32>
    %26 = vector.shape_cast %25 : vector<16xf32> to vector<16x1xf32>
    %c0_20 = arith.constant 0 : index
    %c0_21 = arith.constant 0 : index
    %c1 = arith.constant 1 : index
    %27 = vector.load %arg7[%c0_20, %c0_21, %c1] : memref<1x16x2xf32, #tpu.memory_space<vmem>>, vector<1x16x1xf32>
    %28 = vector.shape_cast %27 : vector<1x16x1xf32> to vector<16x1xf32>
    %29 = vector.shape_cast %26 : vector<16x1xf32> to vector<1x16x1xf32>
    tpu.vector_store %arg7[%c0_20, %c0_21, %c1], %29 {strides = array<i32>} : memref<1x16x2xf32, #tpu.memory_space<vmem>>, vector<1x16x1xf32>,
    return
  }
  func.func @transform_0(%arg0: i32) -> (i32, i32) {
    %c0_i32 = arith.constant 0 : i32
    %c0_i32_0 = arith.constant 0 : i32
    return %c0_i32, %arg0 : i32, i32
  }
  func.func @transform_1(%arg0: i32) -> (i32, i32) {
    %c0_i32 = arith.constant 0 : i32
    %c0_i32_0 = arith.constant 0 : i32
    return %c0_i32, %arg0 : i32, i32
  }
  func.func @transform_2(%arg0: i32) -> (i32, i32) {
    %c0_i32 = arith.constant 0 : i32
    %c0_i32_0 = arith.constant 0 : i32
    %c0_i32_1 = arith.constant 0 : i32
    return %c0_i32, %c0_i32_0 : i32, i32
  }
  func.func @transform_3(%arg0: i32) -> (i32, i32) {
    %c0_i32 = arith.constant 0 : i32
    %c0_i32_0 = arith.constant 0 : i32
    %c0_i32_1 = arith.constant 0 : i32
    return %c0_i32, %c0_i32_0 : i32, i32
  }
  func.func @transform_4(%arg0: i32) -> (i32, i32) {
    %c0_i32 = arith.constant 0 : i32
    %c0_i32_0 = arith.constant 0 : i32
    %c0_i32_1 = arith.constant 0 : i32
    return %c0_i32, %c0_i32_0 : i32, i32
  }
  func.func @transform_5(%arg0: i32) -> (i32, i32) {
    %c0_i32 = arith.constant 0 : i32
    %c0_i32_0 = arith.constant 0 : i32
    return %c0_i32, %arg0 : i32, i32
  }
  func.func @transform_6(%arg0: i32) -> (i32, i32, i32) {
    %c0_i32 = arith.constant 0 : i32
    %c0_i32_0 = arith.constant 0 : i32
    %c0_i32_1 = arith.constant 0 : i32
    return %arg0, %c0_i32, %c0_i32_0 : i32, i32, i32
  }
}

</mosaic_0001>

<bundles_post_ra>
// kernel: xconv_forward.3
= control target key start
LH: loop header
LB: loop body
LE: loop exit
PB: predicated region body
PF: predicated region fallthrough
CT: control target
= control target key end

     0   :  { %10 = vsyncpa [#allocation4], 0  ;;  %s1396_s15 = smov 0   ;;  %s1398_s16 = smov 0   ;;  %s2169_s0 = inlined_call_operand.vmem [shape: f32[24,2048], index: 0, kind: input, shape index: {}]   ;;  %s2170_s1 = inlined_call_operand.hbm [shape: f32[64,24], index: 1, kind: input, shape index: {}]   ;;  %s2171_s2 = inlined_call_operand.vmem [shape: f32[64,1], index: 2, kind: input, shape index: {}]   ;;  %s2172_s3 = inlined_call_operand.vmem [shape: f32[64,2048], index: 3, kind: output, shape index: {0}]   ;;  %s2173_s4 = inlined_call_operand.vmem [shape: f32[4,64,2], index: 4, kind: output, shape index: {1}]  }
   0x1   :  { %s1400_s17 = smov 0  }
   0x2 LB: > { %s1412_s18 = sadd.s32 4294967295, %s1364_s17   ;;  %s1415_s19 = sadd.s32 1, %s1364_s17   ;;  %s1364_s17 = sphi %s1400_s17, %s2187_s17   ;;  %s1360_s16 = sphi %s1398_s16, %s2186_s16   ;;  %s1356_s15 = sphi %s1396_s15, %s2185_s15  }
   0x3   : > { %s20_s20 = ssub.s32 %s1364_s17, %s1415_s19  ;;  %s23_s21 = sadd.s32 1, %s1360_s16 }
   0x4   : > { %p21_p0 = scmp.eq.s32.totalorder %s20_s20, 0  ;;  %p30_p1 = scmp.ne.s32.totalorder %s1360_s16, %s1356_s15 }
   0x5   : > { %p31_p2 = scmp.eq.s32.totalorder %s1364_s17, 0  ;;  %p102_p3 = scmp.eq.s32.totalorder %s1412_s18, 3 }
   0x6   : > { %s1425_s22 = scalar_select %p21_p0, %s1360_s16, %s23_s21  }
   0x7   : > { %p1427_p4 = por %p31_p2, %p30_p1  ;;  %p1431_p5 = por %p102_p3, %p30_p1 }
   0x8   : > { %p1129_p6 = scmp.ge.s32.totalorder %s1364_s17, 1  ;;  %p141_p7 = scmp.lt.s32.totalorder %s1364_s17, 5 }
   0x9   : > { %s2176_s23 = scalar_select %p1427_p4, 1, 0 }
   0xa   : > { %s2177_s24 = scalar_select %p1431_p5, 1, 0 }
   0xb   : > { %p2174_p8 = scmp.eq.s32.totalorder %s1412_s18, 0  ;;  %p1438_p9 = pnand %p1129_p6, %p141_p7 }
   0xc   : > { %s1366_s26 = smov [#allocation3]   ;;  %s1310_s5 = scalar_lea.hbm %s2170_s1, 1024 }
   0xd   : > { %s2178_s25 = scalar_select %p1438_p9, 1, 0 }
   0xe   : > { %s153_s27 = sshll.u32 %s1366_s26, 4  ;;  %p1209_p10 = pneg %p1438_p9  ;;  %s154_s27 = int_to_ptr.vmem [resolvable:$true] %s153_s27 }
   0xf   : > { %p1311_p12 = scmp.ne.s32.totalorder %s2170_s1, %s1310_s5  ;;  %p1317_p2 = scmp.lt.u32.totalorder %s1310_s5, %s2170_s1 }
  0x10   : > { %p1446_p11 = pnand %p2174_p8, %p1209_p10 }
  0x12   : > { %p1312_p13 = pneg %p1446_p11 }
  0x14   : > { %p1313_p0 = pnand %p1312_p13, %p1311_p12 }
  0x16   : > { %p1314_p1 = pneg %p1313_p0 }
  0x18   : > { %p1319_p3 = pnand %p1317_p2, %p1314_p1 }
  0x1a   : > { %1322 = shalt.err (!%p1319_p3)
}
  0x1b   : > { %s1323_s10 = scalar_lea.vmem %s154_s27, 1024  ;;  %p1331_p8 = scmp.lt.s32.totalorder %s154_s27, %s154_s27 }
  0x1c   : > { %p1324_p6 = scmp.ne.s32.totalorder %s154_s27, %s1323_s10  ;;  %p1332_p5 = scmp.lt.s32.totalorder %s1323_s10, %s1323_s10 }
  0x1e   : > { %p1326_p7 = pnand %p1324_p6, %p1312_p13  ;;  %p1333_p9 = por %p1332_p5, %p1331_p8 }
  0x20   : > { %p1327_p10 = pneg %p1326_p7 }
  0x22   : > { %p1334_p4 = pnand %p1333_p9, %p1327_p10 }
  0x24   : > { %1337 = shalt.err (!%p1334_p4)
}
  0x25   : > { %s1367_s11 = smov 128   ;;  %s1368_s12 = smov 8  }
  0x26   : > { %1212 = dma.hbm_to_vmem [thread:$0]  (!%p1446_p11), %s2170_s1, 1024, %s154_s27, [#allocation4], %s1367_s11, %s1367_s11, %s1368_s12  }
  0x27   : > { %p1131_p12 = scmp.ge.s32.totalorder %s1364_s17, 4 }
  0x28   : > { %p2180_p0 = scmp.ne.s32.totalorder (!%p1131_p12), %s2176_s23, 0 }
  0x29   : > { %166 = sbr.rel (%p1131_p12) target bundleno = 59 (0x3b), region = 24 }
  0x30   : > { %169 = sbr.rel (!%p2180_p0) target bundleno = 59 (0x3b), region = 28  ;;  %s171_s20 = sand.u32 (%p2180_p0), 1, %s1360_s16  }
  0x31   : > { %s1192_s21 = sshll.u32 (%p2180_p0), %s1364_s17, 5  ;;  %s1203_s26 = smul.u32 (%p2180_p0), 96, %s171_s20 }
  0x32   : > { %s176_s5 = scalar_lea.vmem (%p2180_p0), %s2169_s0, %s1192_s21 }
  0x33   : > { %v189_v0 = vld [vmem:[%s176_s5] sm:$0xff] (%p2180_p0)  ;;  %v191_v1 = vld [vmem:[%s176_s5 + $0x8] sm:$0xff] (%p2180_p0)  ;;  %v193_v2 = vld [vmem:[%s176_s5 + $0x10] sm:$0xff] (%p2180_p0)  ;;  %s173_s27 = scalar_lea.vmem (%p2180_p0), [#allocation2], %s1203_s26 }
  0x34   : > { %v195_v3 = vld [vmem:[%s176_s5 + $0x18] sm:$0xff] (%p2180_p0)  ;;  %v197_v4 = vld [vmem:[%s176_s5 + $0x80] sm:$0xff] (%p2180_p0)  ;;  %v199_v5 = vld [vmem:[%s176_s5 + $0x88] sm:$0xff] (%p2180_p0)  ;;  %190 = vst [vmem:[%s173_s27] sm:$0xff] (%p2180_p0), %v189_v0 }
  0x35   : > { %192 = vst [vmem:[%s173_s27 + $0x8] sm:$0xff] (%p2180_p0), %v191_v1  ;;  %194 = vst [vmem:[%s173_s27 + $0x10] sm:$0xff] (%p2180_p0), %v193_v2  ;;  %v201_v6 = vld [vmem:[%s176_s5 + $0x90] sm:$0xff] (%p2180_p0)  ;;  %v203_v7 = vld [vmem:[%s176_s5 + $0x98] sm:$0xff] (%p2180_p0) }
  0x36   : > { %196 = vst [vmem:[%s173_s27 + $0x18] sm:$0xff] (%p2180_p0), %v195_v3  ;;  %198 = vst [vmem:[%s173_s27 + $0x20] sm:$0xff] (%p2180_p0), %v197_v4  ;;  %v205_v8 = vld [vmem:[%s176_s5 + $0x100] sm:$0xff] (%p2180_p0)  ;;  %v207_v9 = vld [vmem:[%s176_s5 + $0x108] sm:$0xff] (%p2180_p0) }
  0x37   : > { %200 = vst [vmem:[%s173_s27 + $0x28] sm:$0xff] %v199_v5  ;;  %202 = vst [vmem:[%s173_s27 + $0x30] sm:$0xff] %v201_v6  ;;  %v209_v10 = vld [vmem:[%s176_s5 + $0x110] sm:$0xff]  ;;  %v211_v11 = vld [vmem:[%s176_s5 + $0x118] sm:$0xff] }
  0x38   : > { %204 = vst [vmem:[%s173_s27 + $0x38] sm:$0xff] %v203_v7  ;;  %206 = vst [vmem:[%s173_s27 + $0x40] sm:$0xff] %v205_v8 }
  0x39   : > { %208 = vst [vmem:[%s173_s27 + $0x48] sm:$0xff] %v207_v9  ;;  %210 = vst [vmem:[%s173_s27 + $0x50] sm:$0xff] %v209_v10 }
  0x3a   : > { %212 = vst [vmem:[%s173_s27 + $0x58] sm:$0xff] %v211_v11 }
  0x3b PF: > { %p2181_p4 = scmp.ne.s32.totalorder %s2178_s25, 0 }
  0x3c   : > { %s224_s17 = sand.u32 (!%p2181_p4), 1, %s1356_s15   ;;  %p2182_p5 = scmp.eq.s32.totalorder (!%p2181_p4), %s1412_s18, 0 }
  0x3d   : > { %221 = sbr.rel (%p2181_p4) target bundleno = 526 (0x20e), region = 51 }
  0x3e   : > { %s1204_s23 = smul.u32 (!%p2181_p4), 96, %s224_s17 }
  0x40   : > { %s226_s28 = scalar_lea.vmem (!%p2181_p4), [#allocation2], %s1204_s23 }
  0x44   : > { %1351 = dma.done.wait (%p2182_p5), [#allocation4], 1024   ;;  %p2183_p8 = pmov %p2182_p5 }
  0x45   : > { %v1369_v12 = vmov 0.0   ;;  %v1370_v13 = vmov 0   ;;  %v273_v14 = vld [vmem:[%s226_s28 + $0x8] sm:$0xff]  ;;  %v275_v16 = vld [vmem:[%s226_s28 + $0x18] sm:$0xff]  ;;  %v272_v19 = vld [vmem:[%s226_s28] sm:$0xff]  ;;  %vm332_vm0 = vcmask 195584  }
  0x46   : > { %1353 = vsyncadd (%p2183_p8), [#allocation4], 4294966272  ;;  %421 = vmatprep.mubr.f32.mxu0 %v1369_v12  ;;  %534 = vmatprep.mubr.f32.mxu1 %v1369_v12  ;;  %v277_v15 = vld [vmem:[%s226_s28 + $0x28] sm:$0xff]  ;;  %v279_v18 = vld [vmem:[%s226_s28 + $0x38] sm:$0xff]  ;;  %s1582_s27 = sshll.u32 %s224_s17, 8  ;;  %p259_p9 = scmp.lt.s32.totalorder %s1412_s18, 3 }
  0x47   : > { %1244 = vset.pattern.permute.xlu0 %v1370_v13  ;;  %1245 = vset.pattern.permute.xlu1 %v1370_v13  ;;  %v1195_v17 = vpack.c.bf16 %v277_v15, %v273_v14  ;;  %v276_v20 = vld [vmem:[%s226_s28 + $0x20] sm:$0xff]  ;;  %v1199_v21 = vpack.c.bf16 %v279_v18, %v275_v16  ;;  %v274_v23 = vld [vmem:[%s226_s28 + $0x10] sm:$0xff]  ;;  %v281_v25 = vld [vmem:[%s226_s28 + $0x48] sm:$0xff]  ;;  %s1609_s15 = scalar_lea.vmem [#allocation5], %s1582_s27  ;;  %p2184_p11 = scmp.ne.s32.totalorder %s2177_s24, 0 }
  0x48   : > { %v1197_v22 = vpack.c.bf16 %v276_v20, %v272_v19  ;;  %v278_v24 = vld [vmem:[%s226_s28 + $0x30] sm:$0xff]  ;;  %v283_v27 = vld [vmem:[%s226_s28 + $0x58] sm:$0xff]  ;;  %v280_v28 = vld [vmem:[%s226_s28 + $0x40] sm:$0xff]  ;;  %s260_s17 = scalar_select %p259_p9, %s1412_s18, 3 }
  0x49   : > { %1196 = vmatprep.subr.bf16.mxu0 %v1195_v17  ;;  %v1201_v26 = vpack.c.bf16 %v278_v24, %v274_v23  ;;  %1200 = vmatprep.subr.bf16.mxu1 %v1199_v21  ;;  %v282_v29 = vld [vmem:[%s226_s28 + $0x50] sm:$0xff]  ;;  %v264_v30 = vld [vmem:[#allocation3] sm:$0xff]  ;;  %v285_v33 = vld [vmem:[%s2171_s2 + $0x8] sm:$0xff]  ;;  %s1194_s7 = sshll.u32 (%p2184_p11), %s1412_s18, 5 }
  0x4a   : > { %1198 = vmatpush1.bf16.msra.mxu0 %v1197_v22  ;;  %v284_v31 = vld [vmem:[%s2171_s2] sm:$0xff]  ;;  %v286_v32 = vld [vmem:[%s2171_s2 + $0x10] sm:$0xff]  ;;  %v287_v34 = vld [vmem:[%s2171_s2 + $0x18] sm:$0xff]  ;;  %s1193_s23 = sshll.u32 %s260_s17, 6  ;;  %s2096_s10 = scalar_lea.vmem (%p2184_p11), %s2172_s3, %s1194_s7 }
  0x4b   : > { %1202 = vmatpush1.bf16.msra.mxu1 %v1201_v26  ;;  %361 = vmatprep.subr.mxu0 %v281_v25  ;;  %v265_v35 = vld [vmem:[#allocation3 + $0x8] sm:$0xff]  ;;  %v288_v36 = vld [vmem:[%s2171_s2 + $0x20] sm:$0xff]  ;;  %v266_v38 = vld [vmem:[#allocation3 + $0x10] sm:$0xff]  ;;  %s2053_s6 = scalar_lea.vmem %s2173_s4, %s1193_s23 }
  0x4c   : > { %474 = vmatprep.subr.mxu1 %v283_v27  ;;  %294 = vperm.xlu0 %1244, %v284_v31   ;;  %v289_v37 = vld [vmem:[%s2171_s2 + $0x28] sm:$0xff]  ;;  %v290_v39 = vld [vmem:[%s2171_s2 + $0x30] sm:$0xff]  ;;  %v291_v40 = vld [vmem:[%s2171_s2 + $0x38] sm:$0xff] }
  0x4d   : > { %304 = vperm.xlu1 %1245, %v286_v32   ;;  %v267_v41 = vld [vmem:[#allocation3 + $0x18] sm:$0xff]  ;;  %v268_v42 = vld [vmem:[#allocation3 + $0x20] sm:$0xff]  ;;  %v269_v43 = vld [vmem:[#allocation3 + $0x28] sm:$0xff] }
  0x4e   : > { %362 = vmatpush1.msra.mxu0 %v280_v28  ;;  %v270_v44 = vld [vmem:[#allocation3 + $0x30] sm:$0xff]  ;;  %v271_v45 = vld [vmem:[#allocation3 + $0x38] sm:$0xff] }
  0x4f   : > { %475 = vmatpush1.msra.mxu1 %v282_v29  ;;  %1139 = vmatmul.mubr.msk.f32.vlgmr.msra.gmra.mrb[0].mxu0 %vm332_vm0, %v264_v30 }
  0x50   : > { %1147 = vmatmul.mubr.msk.f32.vlgmr.msra.gmra.mrb[0].mxu1 %vm332_vm0, %v264_v30  ;;  %427 = vmatprep.mubr.f32.mxu0 %v1369_v12 }
  0x51   : > { %540 = vmatprep.mubr.f32.mxu1 %v1369_v12  ;;  %299 = vperm.xlu0 %1244, %v285_v33  }
  0x52   : > { %309 = vperm.xlu1 %1245, %v287_v34  }
  0x53   : > { %1140 = vmatmul.mubr.msk.f32.gmra.mrb[2].mxu0 %vm332_vm0, %v265_v35 }
  0x54   : > { %1148 = vmatmul.mubr.msk.f32.gmra.mrb[2].mxu1 %vm332_vm0, %v265_v35  ;;  %433 = vmatprep.mubr.f32.mxu0 %v1369_v12 }
  0x55   : > { %546 = vmatprep.mubr.f32.mxu1 %v1369_v12  ;;  %314 = vperm.xlu0 %1244, %v288_v36  }
  0x56   : > { %319 = vperm.xlu1 %1245, %v289_v37  }
  0x57   : > { %1141 = vmatmul.mubr.msk.f32.gmra.mrb[4].mxu0 %vm332_vm0, %v266_v38 }
  0x58   : > { %1149 = vmatmul.mubr.msk.f32.gmra.mrb[4].mxu1 %vm332_vm0, %v266_v38  ;;  %439 = vmatprep.mubr.f32.mxu0 %v1369_v12 }
  0x59   : > { %552 = vmatprep.mubr.f32.mxu1 %v1369_v12  ;;  %324 = vperm.xlu0 %1244, %v290_v39  }
  0x5a   : > { %329 = vperm.xlu1 %1245, %v291_v40  }
  0x5b   : > { %1142 = vmatmul.mubr.msk.f32.gmra.mrb[6].mxu0 %vm332_vm0, %v267_v41 }
  0x5c   : > { %1150 = vmatmul.mubr.msk.f32.gmra.mrb[6].mxu1 %vm332_vm0, %v267_v41  ;;  %445 = vmatprep.mubr.f32.mxu0 %v1369_v12 }
  0x5d   : > { %558 = vmatprep.mubr.f32.mxu1 %v1369_v12 }
  0x5f   : > { %1143 = vmatmul.mubr.msk.f32.gmra.mrb[8].mxu0 %vm332_vm0, %v268_v42 }
  0x60   : > { %1151 = vmatmul.mubr.msk.f32.gmra.mrb[8].mxu1 %vm332_vm0, %v268_v42  ;;  %451 = vmatprep.mubr.f32.mxu0 %v1369_v12 }
  0x61   : > { %564 = vmatprep.mubr.f32.mxu1 %v1369_v12 }
  0x63   : > { %1144 = vmatmul.mubr.msk.f32.gmra.mrb[10].mxu0 %vm332_vm0, %v269_v43 }
  0x64   : > { %1152 = vmatmul.mubr.msk.f32.gmra.mrb[10].mxu1 %vm332_vm0, %v269_v43  ;;  %457 = vmatprep.mubr.f32.mxu0 %v1369_v12 }
  0x65   : > { %570 = vmatprep.mubr.f32.mxu1 %v1369_v12 }
  0x67   : > { %1145 = vmatmul.mubr.msk.f32.gmra.mrb[12].mxu0 %vm332_vm0, %v270_v44 }
  0x68   : > { %1153 = vmatmul.mubr.msk.f32.gmra.mrb[12].mxu1 %vm332_vm0, %v270_v44  ;;  %463 = vmatprep.mubr.f32.mxu0 %v1369_v12 }
  0x69   : > { %576 = vmatprep.mubr.f32.mxu1 %v1369_v12 }
  0x6b   : > { %1146 = vmatmul.mubr.msk.f32.gmra.mrb[14].mxu0 %vm332_vm0, %v271_v45 }
  0x6c   : > { %1154 = vmatmul.mubr.msk.f32.gmra.mrb[14].mxu1 %vm332_vm0, %v271_v45 }
  0xcb   : > { %v295_v46 = vpop.permute.xlu0 %294 }
  0xcc   : > { %v305_v63 = vpop.permute.xlu1 %304 }
  0xd0   : > { %v300_v55 = vpop.permute.xlu0 %299 }
  0xd1   : > { %v1564_v19 = vpop.permute.xlu1 %309 }
 0x122   : > { %v423_v47 = vpop.f32.mrb[0].mxu0 }
 0x123   : > { %v1539_v48 = vadd.f32 %v423_v47, %v295_v46  ;;  %v536_v49 = vpop.f32.mrb[0].mxu1  ;;  %v425_v50 = vpop.f32.mrb[1].mxu0 }
 0x124   : > { %v1541_v51 = vadd.f32 %v536_v49, %v295_v46  ;;  %v1543_v52 = vadd.f32 %v425_v50, %v295_v46  ;;  %v538_v53 = vpop.f32.mrb[1].mxu1 }
 0x125   : > { %v615_v54 = vmin.f32 %v1539_v48, 0.0  ;;  %v1555_v6 = vadd.f32 %v538_v53, %v295_v46  ;;  %vm583_vm1 = vcmp.gt.f32.partialorder %v1539_v48, 0.0 }
 0x126   : > { %v617_v56 = vmin.f32 %v1541_v51, 0.0  ;;  %v616_v57 = vmin.f32 %v1543_v52, 0.0  ;;  %v429_v58 = vpop.f32.mrb[2].mxu0  ;;  %vm585_vm2 = vcmp.gt.f32.partialorder %v1541_v51, 0.0  ;;  %vm584_vm3 = vcmp.gt.f32.partialorder %v1543_v52, 0.0 }
 0x127   : > { %v647_v59 = vmul.f32 1.442695, %v615_v54  ;;  %v1548_v60 = vadd.f32 %v429_v58, %v300_v55  ;;  %v542_v61 = vpop.f32.mrb[2].mxu1  ;;  %v431_v62 = vpop.f32.mrb[3].mxu0  ;;  %v618_v18 = vmin.f32 %v1555_v6, 0.0 }
 0x128   : > { %v651_v0 = vmul.f32 1.442695, %v617_v56  ;;  %v649_v1 = vmul.f32 1.442695, %v616_v57  ;;  %v1550_v2 = vadd.f32 %v542_v61, %v300_v55  ;;  %v1552_v3 = vadd.f32 %v431_v62, %v300_v55  ;;  %v544_v4 = vpop.f32.mrb[3].mxu1 }
 0x129   : > { %1246 = vpow2.f32 %v647_v59  ;;  %v619_v5 = vmin.f32 %v1548_v60, 0.0  ;;  %v1585_v31 = vadd.f32 %v544_v4, %v300_v55  ;;  %v653_v34 = vmul.f32 1.442695, %v618_v18 }
 0x12a   : > { %1248 = vpow2.f32 %v651_v0  ;;  %v621_v7 = vmin.f32 %v1550_v2, 0.0  ;;  %v435_v8 = vpop.f32.mrb[4].mxu0  ;;  %v620_v10 = vmin.f32 %v1552_v3, 0.0  ;;  %vm587_vm4 = vcmp.gt.f32.partialorder %v1548_v60, 0.0 }
 0x12b   : > { %1250 = vpow2.f32 %v649_v1  ;;  %v655_v9 = vmul.f32 1.442695, %v619_v5  ;;  %v548_v11 = vpop.f32.mrb[4].mxu1  ;;  %v437_v12 = vpop.f32.mrb[5].mxu0  ;;  %v1559_v14 = vadd.f32 %v435_v8, %v305_v63  ;;  %v622_v53 = vmin.f32 %v1585_v31, 0.0 }
 0x12c   : > { %v659_v13 = vmul.f32 1.442695, %v621_v7  ;;  %v1561_v15 = vadd.f32 %v548_v11, %v305_v63  ;;  %v550_v16 = vpop.f32.mrb[5].mxu1  ;;  %v657_v17 = vmul.f32 1.442695, %v620_v10  ;;  %v1568_v23 = vadd.f32 %v437_v12, %v305_v63  ;;  %v315_v7 = vpop.permute.xlu0 %314 }
 0x12d   : > { %1252 = vpow2.f32 %v655_v9  ;;  %v623_v20 = vmin.f32 %v1559_v14, 0.0  ;;  %v1570_v27 = vadd.f32 %v550_v16, %v305_v63  ;;  %vm589_vm5 = vcmp.gt.f32.partialorder %v1550_v2, 0.0 }
 0x12e   : > { %1254 = vpow2.f32 %v659_v13  ;;  %v441_v21 = vpop.f32.mrb[6].mxu0  ;;  %v625_v22 = vmin.f32 %v1561_v15, 0.0  ;;  %v624_v33 = vmin.f32 %v1568_v23, 0.0  ;;  %vm588_vm6 = vcmp.gt.f32.partialorder %v1552_v3, 0.0 }
 0x12f   : > { %1256 = vpow2.f32 %v657_v17  ;;  %v554_v24 = vpop.f32.mrb[6].mxu1  ;;  %v443_v25 = vpop.f32.mrb[7].mxu0  ;;  %v663_v26 = vmul.f32 1.442695, %v623_v20  ;;  %v1573_v28 = vadd.f32 %v441_v21, %v1564_v19  ;;  %v626_v35 = vmin.f32 %v1570_v27, 0.0 }
 0x130   : > { %v1576_v29 = vadd.f32 %v554_v24, %v1564_v19  ;;  %v1578_v30 = vpop.f32.mrb[7].mxu1  ;;  %v667_v32 = vmul.f32 1.442695, %v625_v22  ;;  %v665_v38 = vmul.f32 1.442695, %v624_v33  ;;  %v1596_v46 = vadd.f32 %v443_v25, %v1564_v19 }
 0x131   : > { %1258 = vpow2.f32 %v663_v26  ;;  %v627_v39 = vmin.f32 %v1573_v28, 0.0  ;;  %v669_v44 = vmul.f32 1.442695, %v626_v35  ;;  %v661_v9 = vmul.f32 1.442695, %v622_v53 }
 0x132   : > { %v447_v36 = vpop.f32.mrb[8].mxu0  ;;  %1260 = vpow2.f32 %v667_v32  ;;  %v629_v45 = vmin.f32 %v1576_v29, 0.0  ;;  %vm591_vm7 = vcmp.gt.f32.partialorder %v1559_v14, 0.0  ;;  %vm593_vm8 = vcmp.gt.f32.partialorder %v1561_v15, 0.0 }
 0x133   : > { %v1247_v37 = vpop.eup %1246  ;;  %v560_v40 = vpop.f32.mrb[8].mxu1  ;;  %1262 = vpow2.f32 %v665_v38  ;;  %v671_v54 = vmul.f32 1.442695, %v627_v39  ;;  %v1642_v12 = vadd.f32 %v447_v36, %v315_v7  ;;  %vm592_vm9 = vcmp.gt.f32.partialorder %v1568_v23, 0.0 }
 0x134   : > { %v1592_v41 = vpop.f32.mrb[9].mxu0  ;;  %v1249_v42 = vpop.eup %1248  ;;  %v1155_v43 = vadd.f32 -1.0, %v1247_v37  ;;  %1264 = vpow2.f32 %v669_v44  ;;  %v675_v57 = vmul.f32 1.442695, %v629_v45  ;;  %vm594_vm10 = vcmp.gt.f32.partialorder %v1570_v27, 0.0 }
 0x135   : > { %v1598_v47 = vpop.f32.mrb[9].mxu1  ;;  %v1251_v49 = vpop.eup %1250  ;;  %v1157_v50 = vadd.f32 -1.0, %v1249_v42  ;;  %1266 = vpow2.f32 %v671_v54  ;;  %v631_v22 = vmin.f32 %v1642_v12, 0.0  ;;  %vm595_vm11 = vcmp.gt.f32.partialorder %v1573_v28, 0.0 }
 0x136   : > { %v1604_v55 = vsel %vm583_vm1, %v1539_v48, %v1155_v43  ;;  %v1156_v56 = vadd.f32 -1.0, %v1251_v49  ;;  %v1606_v58 = vpop.f32.mrb[10].mxu0  ;;  %1268 = vpow2.f32 %v675_v57  ;;  %vm597_vm12 = vcmp.gt.f32.partialorder %v1576_v29, 0.0 }
 0x137   : > { %v1253_v59 = vpop.eup %1252  ;;  %775 = vst [vmem:[%s1609_s15] sm:$0xff] %v1604_v55  ;;  %v1616_v61 = vsel %vm585_vm2, %v1541_v51, %v1157_v50  ;;  %v1620_v48 = vpop.f32.mrb[10].mxu1  ;;  %v628_v51 = vmin.f32 %v1596_v46, 0.0  ;;  %1270 = vpow2.f32 %v653_v34  ;;  %v679_v32 = vmul.f32 1.442695, %v631_v22 }
 0x138   : > { %v1622_v62 = vpop.f32.mrb[11].mxu0  ;;  %v1255_v63 = vpop.eup %1254  ;;  %777 = vst [vmem:[%s1609_s15 + $0x10] sm:$0xff] %v1616_v61  ;;  %v1629_v0 = vsel %vm584_vm3, %v1543_v52, %v1156_v56  ;;  %v1159_v1 = vadd.f32 -1.0, %v1253_v59  ;;  %v1687_v35 = vmul.f32 %v1604_v55, %v1604_v55  ;;  %v1722_v57 = vadd.f32 %v1598_v47, %v315_v7 }
 0x139   : > { %v1632_v4 = vpop.f32.mrb[11].mxu1  ;;  %v1257_v5 = vpop.eup %1256  ;;  %776 = vst [vmem:[%s1609_s15 + $0x8] sm:$0xff] %v1629_v0  ;;  %v1161_v8 = vadd.f32 -1.0, %v1255_v63  ;;  %v673_v11 = vmul.f32 1.442695, %v628_v51  ;;  %vm596_vm13 = vcmp.gt.f32.partialorder %v1596_v46, 0.0  ;;  %v1739_v47 = vmul.f32 %v1629_v0, %v1629_v0 }
 0x13a   : > { %v1640_v52 = vsel %vm587_vm4, %v1548_v60, %v1159_v1  ;;  %v1160_v10 = vadd.f32 -1.0, %v1257_v5  ;;  %v1644_v13 = vpop.f32.mrb[12].mxu0  ;;  %v1655_v60 = vadd.f32 %v560_v40, %v315_v7  ;;  %v320_v40 = vpop.permute.xlu1 %319  ;;  %vm599_vm14 = vcmp.gt.f32.partialorder %v1642_v12, 0.0 }
 0x13b   : > { %779 = vst [vmem:[%s1609_s15 + $0x20] sm:$0xff] %v1640_v52  ;;  %v1651_v16 = vsel %vm589_vm5, %v1550_v2, %v1161_v8  ;;  %v1657_v17 = vpop.f32.mrb[12].mxu1  ;;  %v1659_v18 = vpop.f32.mrb[13].mxu0  ;;  %1272 = vpow2.f32 %v673_v11  ;;  %v1670_v2 = vadd.f32 %v1578_v30, %v1564_v19  ;;  %v1681_v19 = vadd.f32 %v1592_v41, %v315_v7 }
 0x13c   : > { %v1259_v20 = vpop.eup %1258  ;;  %781 = vst [vmem:[%s1609_s15 + $0x30] sm:$0xff] %v1651_v16  ;;  %v1666_v21 = vsel %vm588_vm6, %v1552_v3, %v1160_v10  ;;  %v1673_v24 = vpop.f32.mrb[13].mxu1  ;;  %1274 = vpow2.f32 %v661_v9  ;;  %v633_v33 = vmin.f32 %v1655_v60, 0.0  ;;  %v1714_v53 = vadd.f32 %v1606_v58, %v320_v40 }
 0x13d   : > { %v1261_v25 = vpop.eup %1260  ;;  %780 = vst [vmem:[%s1609_s15 + $0x28] sm:$0xff] %v1666_v21  ;;  %v1163_v26 = vadd.f32 -1.0, %v1259_v20  ;;  %1276 = vpow2.f32 %v679_v32  ;;  %v632_v50 = vmin.f32 %v1681_v19, 0.0  ;;  %v1725_v59 = vadd.f32 %v1620_v48, %v320_v40 }
 0x13e   : > { %v1165_v3 = vadd.f32 -1.0, %v1261_v25  ;;  %v1683_v30 = vpop.f32.mrb[14].mxu0  ;;  %v1263_v34 = vpop.eup %1262  ;;  %v683_v49 = vmul.f32 1.442695, %v633_v33  ;;  %v635_v7 = vmin.f32 %v1714_v53, 0.0  ;;  %v634_v9 = vmin.f32 %v1722_v57, 0.0 }
 0x13f   : > { %v1692_v36 = vsel %vm591_vm7, %v1559_v14, %v1163_v26  ;;  %v1696_v37 = vpop.f32.mrb[14].mxu1  ;;  %v1698_v38 = vpop.f32.mrb[15].mxu0  ;;  %v1164_v42 = vadd.f32 -1.0, %v1263_v34  ;;  %v630_v14 = vmin.f32 %v1670_v2, 0.0  ;;  %v681_v51 = vmul.f32 1.442695, %v632_v50 }
 0x140   : > { %v1265_v39 = vpop.eup %1264  ;;  %783 = vst [vmem:[%s1609_s15 + $0x40] sm:$0xff] %v1692_v36  ;;  %v1705_v41 = vsel %vm593_vm8, %v1561_v15, %v1165_v3  ;;  %v1708_v43 = vpop.f32.mrb[15].mxu1  ;;  %1278 = vpow2.f32 %v683_v49  ;;  %v637_v10 = vmin.f32 %v1725_v59, 0.0  ;;  %v1766_v11 = vadd.f32 %v1622_v62, %v320_v40 }
 0x141   : > { %v1267_v44 = vpop.eup %1266  ;;  %785 = vst [vmem:[%s1609_s15 + $0x50] sm:$0xff] %v1705_v41  ;;  %v1166_v45 = vadd.f32 -1.0, %v1265_v39  ;;  %v1719_v54 = vsel %vm592_vm9, %v1568_v23, %v1164_v42  ;;  %v677_v1 = vmul.f32 1.442695, %v630_v14  ;;  %1280 = vpow2.f32 %v681_v51  ;;  %v1795_v42 = vpop.permute.xlu1 %329 }
 0x142   : > { %v1269_v15 = vpop.eup %1268  ;;  %v1167_v56 = vadd.f32 -1.0, %v1267_v44  ;;  %784 = vst [vmem:[%s1609_s15 + $0x48] sm:$0xff] %v1719_v54  ;;  %v687_v22 = vmul.f32 1.442695, %v635_v7  ;;  %v1771_v25 = vadd.f32 %v1632_v4, %v320_v40  ;;  %v1778_v3 = vmul.f32 %v1666_v21, %v1666_v21 }
 0x143   : > { %v1727_v63 = vpop.eup %1270  ;;  %v1734_v58 = vsel %vm594_vm10, %v1570_v27, %v1166_v45  ;;  %v1169_v23 = vadd.f32 -1.0, %v1269_v15  ;;  %v1750_v27 = vmul.f32 %v1640_v52, %v1640_v52  ;;  %1282 = vpow2.f32 %v677_v1 }
 0x144   : > { %786 = vst [vmem:[%s1609_s15 + $0x58] sm:$0xff] %v1734_v58  ;;  %v1746_v48 = vsel %vm595_vm11, %v1573_v28, %v1167_v56  ;;  %v325_v28 = vpop.permute.xlu0 %324  ;;  %v691_v32 = vmul.f32 1.442695, %v637_v10  ;;  %v636_v33 = vmin.f32 %v1766_v11, 0.0  ;;  %v1783_v62 = vmul.f32 %v1692_v36, %v1692_v36 }
 0x145   : > { %787 = vst [vmem:[%s1609_s15 + $0x60] sm:$0xff] %v1746_v48  ;;  %v1757_v5 = vsel %vm597_vm12, %v1576_v29, %v1169_v23  ;;  %v1273_v8 = vpop.eup %1272  ;;  %v1774_v26 = vadd.f32 %v1644_v13, %v325_v28  ;;  %vm601_vm15 = vcmp.gt.f32.partialorder %v1655_v60, 0.0  ;;  %1284 = vpow2.f32 %v687_v22 }
 0x146   : > { %789 = vst [vmem:[%s1609_s15 + $0x70] sm:$0xff] %v1757_v5  ;;  %v1768_v20 = vpop.eup %1274  ;;  %v1168_v29 = vadd.f32 -1.0, %v1273_v8  ;;  %vm600_vm0 = vcmp.gt.f32.partialorder %v1681_v19, 0.0  ;;  %v685_v34 = vmul.f32 1.442695, %v634_v9  ;;  %1286 = vpow2.f32 %v691_v32 }
 0x147   : > { %v1277_v13 = vpop.eup %1276  ;;  %v689_v39 = vmul.f32 1.442695, %v636_v33  ;;  %v639_v40 = vmin.f32 %v1774_v26, 0.0  ;;  %v1799_v44 = vadd.f32 %v1657_v17, %v325_v28  ;;  %v1802_v45 = vadd.f32 %v1659_v18, %v325_v28 }
 0x148   : > { %v1788_v4 = vsel %vm596_vm13, %v1596_v46, %v1168_v29  ;;  %v1171_v14 = vadd.f32 -1.0, %v1277_v13  ;;  %v638_v46 = vmin.f32 %v1771_v25, 0.0  ;;  %vm586_vm1 = vcmp.gt.f32.partialorder %v1555_v6, 0.0 }
 0x149   : > { %788 = vst [vmem:[%s1609_s15 + $0x68] sm:$0xff] %v1788_v4  ;;  %1288 = vpow2.f32 %v689_v39  ;;  %v695_v49 = vmul.f32 1.442695, %v639_v40  ;;  %v1806_v50 = vadd.f32 %v1673_v24, %v325_v28  ;;  %v1810_v15 = vadd.f32 %v1683_v30, %v1795_v42 }
 0x14a   : > { %v1279_v56 = vpop.eup %1278  ;;  %v1814_v23 = vmul.f32 %v1719_v54, %v1719_v54  ;;  %v1819_v17 = vsel %vm599_vm14, %v1642_v12, %v1171_v14  ;;  %vm603_vm2 = vcmp.gt.f32.partialorder %v1714_v53, 0.0  ;;  %v641_v18 = vmin.f32 %v1799_v44, 0.0 }
 0x14b   : > { %v1825_v24 = vmul.f32 %v1746_v48, %v1746_v48  ;;  %791 = vst [vmem:[%s1609_s15 + $0x80] sm:$0xff] %v1819_v17  ;;  %v1173_v30 = vadd.f32 -1.0, %v1279_v56  ;;  %vm605_vm3 = vcmp.gt.f32.partialorder %v1725_v59, 0.0  ;;  %1290 = vpow2.f32 %v695_v49  ;;  %v1281_v7 = vpop.eup %1280 }
 0x14c   : > { %1292 = vpow2.f32 %v685_v34  ;;  %v693_v1 = vmul.f32 1.442695, %v638_v46  ;;  %v699_v51 = vmul.f32 1.442695, %v641_v18  ;;  %v640_v12 = vmin.f32 %v1802_v45, 0.0 }
 0x14d   : > { %v1834_v8 = vsel %vm601_vm15, %v1655_v60, %v1173_v30  ;;  %v642_v28 = vmin.f32 %v1806_v50, 0.0  ;;  %v643_v9 = vmin.f32 %v1810_v15, 0.0  ;;  %v1840_v10 = vadd.f32 %v1696_v37, %v1795_v42  ;;  %v1845_v32 = vpop.eup %1282 }
 0x14e   : > { %793 = vst [vmem:[%s1609_s15 + $0x90] sm:$0xff] %v1834_v8  ;;  %v1172_v29 = vadd.f32 -1.0, %v1281_v7  ;;  %vm604_vm4 = vcmp.gt.f32.partialorder %v1766_v11, 0.0  ;;  %1294 = vpow2.f32 %v699_v51  ;;  %v697_v22 = vmul.f32 1.442695, %v640_v12 }
 0x14f   : > { %vm590_vm5 = vcmp.gt.f32.partialorder %v1585_v31, 0.0  ;;  %v1850_v60 = vmul.f32 %v1788_v4, %v1788_v4  ;;  %vm607_vm6 = vcmp.gt.f32.partialorder %v1774_v26, 0.0  ;;  %v703_v37 = vmul.f32 1.442695, %v643_v9  ;;  %v1285_v34 = vpop.eup %1284 }
 0x150   : > { %v645_v33 = vmin.f32 %v1840_v10, 0.0  ;;  %v1158_v13 = vadd.f32 -1.0, %v1727_v63  ;;  %v1858_v39 = vsel %vm600_vm0, %v1681_v19, %v1172_v29  ;;  %1296 = vpow2.f32 %v697_v22  ;;  %v1287_v46 = vpop.eup %1286 }
 0x151   : > { %v807_v40 = vadd.f32 %v1629_v0, %v1604_v55  ;;  %v1864_v14 = vadd.f32 %v1698_v38, %v1795_v42  ;;  %792 = vst [vmem:[%s1609_s15 + $0x88] sm:$0xff] %v1858_v39  ;;  %v1175_v49 = vadd.f32 -1.0, %v1285_v34  ;;  %1298 = vpow2.f32 %v693_v1 }
 0x152   : > { %v701_v63 = vmul.f32 1.442695, %v642_v28  ;;  %v707_v56 = vmul.f32 1.442695, %v645_v33  ;;  %v1177_v18 = vadd.f32 -1.0, %v1287_v46  ;;  %vm609_vm7 = vcmp.gt.f32.partialorder %v1799_v44, 0.0 }
 0x153   : > { %1300 = vpow2.f32 %v703_v37  ;;  %v746_v55 = vsel %vm586_vm1, %v1555_v6, %v1158_v13  ;;  %v808_v0 = vadd.f32 %v807_v40, %v1616_v61  ;;  %v1289_v19 = vpop.eup %1288  ;;  %v1875_v38 = vmul.f32 %v1819_v17, %v1819_v17 }
 0x154   : > { %v1880_v30 = vsel %vm603_vm2, %v1714_v53, %v1175_v49  ;;  %1302 = vpow2.f32 %v707_v56  ;;  %778 = vst [vmem:[%s1609_s15 + $0x18] sm:$0xff] %v746_v55  ;;  %v644_v1 = vmin.f32 %v1864_v14, 0.0  ;;  %v1886_v51 = vmul.f32 %v1858_v39, %v1858_v39 }
 0x155   : > { %795 = vst [vmem:[%s1609_s15 + $0xa0] sm:$0xff] %v1880_v30  ;;  %v1893_v6 = vsel %vm605_vm3, %v1725_v59, %v1177_v18  ;;  %v1176_v12 = vadd.f32 -1.0, %v1289_v19  ;;  %vm608_vm8 = vcmp.gt.f32.partialorder %v1802_v45, 0.0  ;;  %v809_v53 = vadd.f32 %v808_v0, %v746_v55  ;;  %v1291_v7 = vpop.eup %1290 }
 0x156   : > { %797 = vst [vmem:[%s1609_s15 + $0xb0] sm:$0xff] %v1893_v6  ;;  %1304 = vpow2.f32 %v701_v63  ;;  %v705_v28 = vmul.f32 1.442695, %v644_v1  ;;  %v1900_v9 = vadd.f32 %v1708_v43, %v1795_v42  ;;  %v858_v29 = vmul.f32 %v1616_v61, %v1616_v61  ;;  %v1904_v22 = vpop.eup %1292 }
 0x157   : > { %vm598_vm9 = vcmp.gt.f32.partialorder %v1670_v2, 0.0  ;;  %v1910_v59 = vsel %vm604_vm4, %v1766_v11, %v1176_v12  ;;  %v1179_v37 = vadd.f32 -1.0, %v1291_v7  ;;  %vm611_vm10 = vcmp.gt.f32.partialorder %v1810_v15, 0.0  ;;  %810 = vadd.xlane.f32.xlu0 %v809_v53 }
 0x158   : > { %v888_v43 = vadd.f32 %v1739_v47, %v1687_v35  ;;  %v1162_v42 = vadd.f32 -1.0, %v1768_v20  ;;  %v1918_v61 = vmul.f32 %v1880_v30, %v1880_v30  ;;  %796 = vst [vmem:[%s1609_s15 + $0xa8] sm:$0xff] %v1910_v59  ;;  %vm613_vm11 = vcmp.gt.f32.partialorder %v1840_v10, 0.0  ;;  %v1295_v13 = vpop.eup %1294 }
 0x159   : > { %1306 = vpow2.f32 %v705_v28  ;;  %v646_v11 = vmin.f32 %v1900_v9, 0.0  ;;  %v859_v33 = vmul.f32 %v746_v55, %v746_v55  ;;  %v1927_v35 = vsel %vm607_vm6, %v1774_v26, %v1179_v37 }
 0x15a   : > { %v889_v47 = vadd.f32 %v888_v43, %v858_v29  ;;  %v750_v20 = vsel %vm590_vm5, %v1585_v31, %v1162_v42  ;;  %v812_v34 = vadd.f32 %v1666_v21, %v1640_v52  ;;  %vm602_vm12 = vcmp.gt.f32.partialorder %v1722_v57, 0.0  ;;  %799 = vst [vmem:[%s1609_s15 + $0xc0] sm:$0xff] %v1927_v35  ;;  %v1297_v31 = vpop.eup %1296 }
 0x15b   : > { %v1937_v40 = vmul.f32 %v1910_v59, %v1910_v59  ;;  %v1943_v26 = vmul.f32 %v1927_v35, %v1927_v35  ;;  %v1181_v46 = vadd.f32 -1.0, %v1295_v13  ;;  %v709_v49 = vmul.f32 1.442695, %v646_v11  ;;  %782 = vst [vmem:[%s1609_s15 + $0x38] sm:$0xff] %v750_v20  ;;  %v1299_v18 = vpop.eup %1298 }
 0x15c   : > { %v890_v63 = vadd.f32 %v889_v47, %v859_v33  ;;  %v813_v52 = vadd.f32 %v812_v34, %v1651_v16  ;;  %v862_v21 = vmul.f32 %v1651_v16, %v1651_v16  ;;  %v893_v56 = vadd.f32 %v1778_v3, %v1750_v27 }
 0x15d   : > { %v1954_v55 = vsel %vm609_vm7, %v1799_v44, %v1181_v46  ;;  %v1180_v0 = vadd.f32 -1.0, %v1297_v31  ;;  %vm612_vm13 = vcmp.gt.f32.partialorder %v1864_v14, 0.0  ;;  %1308 = vpow2.f32 %v709_v49  ;;  %v1301_v1 = vpop.eup %1300 }
 0x15e   : > { %v863_v19 = vmul.f32 %v750_v20, %v750_v20  ;;  %801 = vst [vmem:[%s1609_s15 + $0xd0] sm:$0xff] %v1954_v55  ;;  %891 = vadd.xlane.f32.xlu1 %v890_v63  ;;  %v814_v16 = vadd.f32 %v813_v52, %v750_v20  ;;  %v894_v12 = vadd.f32 %v893_v56, %v862_v21  ;;  %v1303_v44 = vpop.eup %1302  ;;  %vm606_vm14 = vcmp.gt.f32.partialorder %v1771_v25, 0.0 }
 0x15f   : > { %v866_v27 = vmul.f32 %v1705_v41, %v1705_v41  ;;  %v898_v3 = vadd.f32 %v1814_v23, %v1783_v62  ;;  %v768_v53 = vsel %vm608_vm8, %v1802_v45, %v1180_v0  ;;  %v1183_v7 = vadd.f32 -1.0, %v1301_v1 }
 0x160   : > { %v817_v28 = vadd.f32 %v1719_v54, %v1692_v36  ;;  %v1170_v29 = vadd.f32 -1.0, %v1845_v32  ;;  %800 = vst [vmem:[%s1609_s15 + $0xc8] sm:$0xff] %v768_v53  ;;  %vm610_vm15 = vcmp.gt.f32.partialorder %v1806_v50, 0.0  ;;  %v1185_v37 = vadd.f32 -1.0, %v1303_v44  ;;  %v1305_v42 = vpop.eup %1304 }
 0x161   : > { %v895_v62 = vadd.f32 %v894_v12, %v863_v19  ;;  %v867_v23 = vmul.f32 %v1734_v58, %v1734_v58  ;;  %v899_v43 = vadd.f32 %v898_v3, %v866_v27  ;;  %v1977_v45 = vsel %vm611_vm10, %v1810_v15, %v1183_v7 }
 0x162   : > { %v818_v36 = vadd.f32 %v817_v28, %v1705_v41  ;;  %v758_v54 = vsel %vm598_vm9, %v1670_v2, %v1170_v29  ;;  %v822_v32 = vadd.f32 %v1788_v4, %v1746_v48  ;;  %v881_v11 = vmul.f32 %v768_v53, %v768_v53  ;;  %803 = vst [vmem:[%s1609_s15 + $0xe0] sm:$0xff] %v1977_v45 }
 0x163   : > { %v1990_v33 = vsel %vm613_vm11, %v1840_v10, %v1185_v37  ;;  %815 = vadd.xlane.f32.xlu1 %v814_v16  ;;  %896 = vadd.xlane.f32.xlu0 %v895_v62  ;;  %v900_v15 = vadd.f32 %v899_v43, %v867_v23  ;;  %790 = vst [vmem:[%s1609_s15 + $0x78] sm:$0xff] %v758_v54  ;;  %v1174_v41 = vadd.f32 -1.0, %v1904_v22  ;;  %v1307_v13 = vpop.eup %1306  ;;  %vm614_vm0 = vcmp.gt.f32.partialorder %v1900_v9, 0.0 }
 0x164   : > { %v884_v2 = vmul.f32 %v1977_v45, %v1977_v45  ;;  %805 = vst [vmem:[%s1609_s15 + $0xf0] sm:$0xff] %v1990_v33  ;;  %v819_v48 = vadd.f32 %v818_v36, %v1734_v58  ;;  %v823_v4 = vadd.f32 %v822_v32, %v1757_v5  ;;  %v827_v10 = vadd.f32 %v1858_v39, %v1819_v17 }
 0x165   : > { %v1184_v47 = vadd.f32 -1.0, %v1307_v13  ;;  %v762_v22 = vsel %vm602_vm12, %v1722_v57, %v1174_v41  ;;  %v870_v20 = vmul.f32 %v1757_v5, %v1757_v5  ;;  %v903_v34 = vadd.f32 %v1850_v60, %v1825_v24 }
 0x166   : > { %v824_v46 = vadd.f32 %v823_v4, %v758_v54  ;;  %794 = vst [vmem:[%s1609_s15 + $0x98] sm:$0xff] %v762_v22  ;;  %v828_v58 = vadd.f32 %v827_v10, %v1834_v8  ;;  %v871_v49 = vmul.f32 %v758_v54, %v758_v54  ;;  %v874_v17 = vmul.f32 %v1834_v8, %v1834_v8 }
 0x167   : > { %v772_v39 = vsel %vm612_vm13, %v1864_v14, %v1184_v47  ;;  %901 = vadd.xlane.f32.xlu1 %v900_v15  ;;  %820 = vadd.xlane.f32.xlu0 %v819_v48  ;;  %v904_v57 = vadd.f32 %v903_v34, %v870_v20  ;;  %v908_v5 = vadd.f32 %v1886_v51, %v1875_v38  ;;  %v1178_v24 = vadd.f32 -1.0, %v1299_v18  ;;  %v1309_v60 = vpop.eup %1308  ;;  %v964_v47 = vld [vmem:[%s1609_s15] sm:$0xff] (%p2184_p11)  ;;  %v968_v20 = vld [vmem:[%s1609_s15 + $0x10] sm:$0xff] (%p2184_p11)  ;;  %v970_v34 = vld [vmem:[%s1609_s15 + $0x18] sm:$0xff] (%p2184_p11) }
 0x168   : > { %804 = vst [vmem:[%s1609_s15 + $0xe8] sm:$0xff] %v772_v39  ;;  %v829_v31 = vadd.f32 %v828_v58, %v762_v22  ;;  %v875_v63 = vmul.f32 %v762_v22, %v762_v22  ;;  %v832_v8 = vadd.f32 %v1910_v59, %v1880_v30  ;;  %v1182_v52 = vadd.f32 -1.0, %v1305_v42  ;;  %v966_v22 = vld [vmem:[%s1609_s15 + $0x8] sm:$0xff] (%p2184_p11)  ;;  %965 = vst [vmem:[%s2096_s10] sm:$0xff] (%p2184_p11), %v964_v47 }
 0x169   : > { %v905_v21 = vadd.f32 %v904_v57, %v871_v49  ;;  %v909_v56 = vadd.f32 %v908_v5, %v874_v17  ;;  %v766_v14 = vsel %vm606_vm14, %v1771_v25, %v1178_v24  ;;  %v837_v0 = vadd.f32 %v768_v53, %v1927_v35  ;;  %v974_v58 = vld [vmem:[%s1609_s15 + $0x28] sm:$0xff] (%p2184_p11)  ;;  %967 = vst [vmem:[%s2096_s10 + $0x8] sm:$0xff] (%p2184_p11), %v966_v22  ;;  %v976_v49 = vld [vmem:[%s1609_s15 + $0x30] sm:$0xff] (%p2184_p11)  ;;  %v978_v17 = vld [vmem:[%s1609_s15 + $0x38] sm:$0xff] (%p2184_p11) }
 0x16a   : > { %v885_v19 = vmul.f32 %v772_v39, %v772_v39  ;;  %798 = vst [vmem:[%s1609_s15 + $0xb8] sm:$0xff] %v766_v14  ;;  %v833_v38 = vadd.f32 %v832_v8, %v1893_v6  ;;  %v770_v51 = vsel %vm610_vm15, %v1806_v50, %v1182_v52  ;;  %v878_v30 = vmul.f32 %v1893_v6, %v1893_v6  ;;  %v982_v57 = vld [vmem:[%s1609_s15 + $0x48] sm:$0xff] (%p2184_p11)  ;;  %v984_v5 = vld [vmem:[%s1609_s15 + $0x50] sm:$0xff] (%p2184_p11)  ;;  %v986_v24 = vld [vmem:[%s1609_s15 + $0x58] sm:$0xff] (%p2184_p11) }
 0x16b   : > { %825 = vadd.xlane.f32.xlu0 %v824_v46  ;;  %830 = vadd.xlane.f32.xlu1 %v829_v31  ;;  %v910_v59 = vadd.f32 %v909_v56, %v875_v63  ;;  %802 = vst [vmem:[%s1609_s15 + $0xd8] sm:$0xff] %v770_v51  ;;  %v838_v25 = vadd.f32 %v837_v0, %v1954_v55  ;;  %v1186_v18 = vadd.f32 -1.0, %v1309_v60  ;;  %vm847_vm1 = vcmask 7168   ;;  %v972_v46 = vld [vmem:[%s1609_s15 + $0x20] sm:$0xff] (%p2184_p11)  ;;  %969 = vst [vmem:[%s2096_s10 + $0x10] sm:$0xff] (%p2184_p11), %v968_v20  ;;  %v990_v31 = vld [vmem:[%s1609_s15 + $0x68] sm:$0xff] (%p2184_p11) }
 0x16c   : > { %v913_v35 = vadd.f32 %v1937_v40, %v1918_v61  ;;  %v834_v1 = vadd.f32 %v833_v38, %v766_v14  ;;  %v879_v16 = vmul.f32 %v766_v14, %v766_v14  ;;  %v882_v12 = vmul.f32 %v1954_v55, %v1954_v55  ;;  %971 = vst [vmem:[%s2096_s10 + $0x18] sm:$0xff] (%p2184_p11), %v970_v34  ;;  %v988_v60 = vld [vmem:[%s1609_s15 + $0x60] sm:$0xff] (%p2184_p11)  ;;  %v992_v63 = vld [vmem:[%s1609_s15 + $0x70] sm:$0xff] (%p2184_p11)  ;;  %v994_v8 = vld [vmem:[%s1609_s15 + $0x78] sm:$0xff] (%p2184_p11) }
 0x16d   : > { %v918_v50 = vadd.f32 %v881_v11, %v1943_v26  ;;  %v839_v27 = vadd.f32 %v838_v25, %v770_v51  ;;  %v774_v3 = vsel %vm614_vm0, %v1900_v9, %v1186_v18  ;;  %v842_v44 = vadd.f32 %v772_v39, %v1977_v45  ;;  %973 = vst [vmem:[%s2096_s10 + $0x80] sm:$0xff] (%p2184_p11), %v972_v46  ;;  %v980_v39 = vld [vmem:[%s1609_s15 + $0x40] sm:$0xff] (%p2184_p11)  ;;  %v1000_v56 = vld [vmem:[%s1609_s15 + $0x90] sm:$0xff] (%p2184_p11)  ;;  %v1002_v14 = vld [vmem:[%s1609_s15 + $0x98] sm:$0xff] (%p2184_p11) }
 0x16e   : > { %v914_v6 = vadd.f32 %v913_v35, %v878_v30  ;;  %v883_v53 = vmul.f32 %v770_v51, %v770_v51  ;;  %806 = vst [vmem:[%s1609_s15 + $0xf8] sm:$0xff] %v774_v3  ;;  %v886_v61 = vmul.f32 %v1990_v33, %v1990_v33  ;;  %v923_v40 = vadd.f32 %v885_v19, %v884_v2  ;;  %v996_v52 = vld [vmem:[%s1609_s15 + $0x80] sm:$0xff] (%p2184_p11)  ;;  %v1006_v19 = vld [vmem:[%s1609_s15 + $0xa8] sm:$0xff] (%p2184_p11)  ;;  %v1008_v38 = vld [vmem:[%s1609_s15 + $0xb0] sm:$0xff] (%p2184_p11) }
 0x16f   : > { %v919_v7 = vadd.f32 %v918_v50, %v882_v12  ;;  %906 = vadd.xlane.f32.xlu0 %v905_v21  ;;  %911 = vadd.xlane.f32.xlu1 %v910_v59  ;;  %v843_v55 = vadd.f32 %v842_v44, %v1990_v33  ;;  %v887_v29 = vmul.f32 %v774_v3, %v774_v3  ;;  %vm928_vm2 = vcmask 15368   ;;  %v998_v21 = vld [vmem:[%s1609_s15 + $0x88] sm:$0xff] (%p2184_p11)  ;;  %v1004_v0 = vld [vmem:[%s1609_s15 + $0xa0] sm:$0xff] (%p2184_p11)  ;;  %v1016_v25 = vld [vmem:[%s1609_s15 + $0xd0] sm:$0xff] (%p2184_p11) }
 0x170   : > { %v915_v26 = vadd.f32 %v914_v6, %v879_v16  ;;  %v924_v37 = vadd.f32 %v923_v40, %v886_v61  ;;  %975 = vst [vmem:[%s2096_s10 + $0x88] sm:$0xff] (%p2184_p11), %v974_v58  ;;  %977 = vst [vmem:[%s2096_s10 + $0x90] sm:$0xff] (%p2184_p11), %v976_v49  ;;  %v1012_v30 = vld [vmem:[%s1609_s15 + $0xc0] sm:$0xff] (%p2184_p11)  ;;  %v1014_v59 = vld [vmem:[%s1609_s15 + $0xc8] sm:$0xff] (%p2184_p11) }
 0x171   : > { %v920_v28 = vadd.f32 %v919_v7, %v883_v53  ;;  %v844_v9 = vadd.f32 %v843_v55, %v774_v3  ;;  %979 = vst [vmem:[%s2096_s10 + $0x98] sm:$0xff] (%p2184_p11), %v978_v17  ;;  %981 = vst [vmem:[%s2096_s10 + $0x100] sm:$0xff] (%p2184_p11), %v980_v39  ;;  %v1010_v51 = vld [vmem:[%s1609_s15 + $0xb8] sm:$0xff] (%p2184_p11)  ;;  %v1020_v18 = vld [vmem:[%s1609_s15 + $0xe0] sm:$0xff] (%p2184_p11) }
 0x172   : > { %v925_v62 = vadd.f32 %v924_v37, %v887_v29  ;;  %983 = vst [vmem:[%s2096_s10 + $0x108] sm:$0xff] (%p2184_p11), %v982_v57  ;;  %985 = vst [vmem:[%s2096_s10 + $0x110] sm:$0xff] (%p2184_p11), %v984_v5  ;;  %v1018_v35 = vld [vmem:[%s1609_s15 + $0xd8] sm:$0xff] (%p2184_p11)  ;;  %v1024_v16 = vld [vmem:[%s1609_s15 + $0xf0] sm:$0xff] (%p2184_p11) }
 0x173   : > { %835 = vadd.xlane.f32.xlu0 %v834_v1  ;;  %840 = vadd.xlane.f32.xlu1 %v839_v27  ;;  %987 = vst [vmem:[%s2096_s10 + $0x118] sm:$0xff] (%p2184_p11), %v986_v24  ;;  %989 = vst [vmem:[%s2096_s10 + $0x180] sm:$0xff] (%p2184_p11), %v988_v60  ;;  %v1022_v1 = vld [vmem:[%s1609_s15 + $0xe8] sm:$0xff] (%p2184_p11) }
 0x174   : > { %991 = vst [vmem:[%s2096_s10 + $0x188] sm:$0xff] (%p2184_p11), %v990_v31  ;;  %993 = vst [vmem:[%s2096_s10 + $0x190] sm:$0xff] (%p2184_p11), %v992_v63 }
 0x175   : > { %995 = vst [vmem:[%s2096_s10 + $0x198] sm:$0xff] (%p2184_p11), %v994_v8  ;;  %997 = vst [vmem:[%s2096_s10 + $0x200] sm:$0xff] (%p2184_p11), %v996_v52  ;;  %v1026_v12 = vld [vmem:[%s1609_s15 + $0xf8] sm:$0xff] (%p2184_p11) }
 0x176   : > { %999 = vst [vmem:[%s2096_s10 + $0x208] sm:$0xff] (%p2184_p11), %v998_v21  ;;  %1001 = vst [vmem:[%s2096_s10 + $0x210] sm:$0xff] (%p2184_p11), %v1000_v56 }
 0x177   : > { %916 = vadd.xlane.f32.xlu0 %v915_v26  ;;  %921 = vadd.xlane.f32.xlu1 %v920_v28  ;;  %1003 = vst [vmem:[%s2096_s10 + $0x218] sm:$0xff] (%p2184_p11), %v1002_v14  ;;  %1005 = vst [vmem:[%s2096_s10 + $0x280] sm:$0xff] (%p2184_p11), %v1004_v0 }
 0x178   : > { %1007 = vst [vmem:[%s2096_s10 + $0x288] sm:$0xff] (%p2184_p11), %v1006_v19  ;;  %1009 = vst [vmem:[%s2096_s10 + $0x290] sm:$0xff] (%p2184_p11), %v1008_v38 }
 0x179   : > { %1011 = vst [vmem:[%s2096_s10 + $0x298] sm:$0xff] (%p2184_p11), %v1010_v51  ;;  %1013 = vst [vmem:[%s2096_s10 + $0x300] sm:$0xff] (%p2184_p11), %v1012_v30 }
 0x17a   : > { %1015 = vst [vmem:[%s2096_s10 + $0x308] sm:$0xff] (%p2184_p11), %v1014_v59  ;;  %1017 = vst [vmem:[%s2096_s10 + $0x310] sm:$0xff] (%p2184_p11), %v1016_v25 }
 0x17b   : > { %845 = vadd.xlane.f32.xlu0 %v844_v9  ;;  %1019 = vst [vmem:[%s2096_s10 + $0x318] sm:$0xff] (%p2184_p11), %v1018_v35  ;;  %1021 = vst [vmem:[%s2096_s10 + $0x380] sm:$0xff] (%p2184_p11), %v1020_v18 }
 0x17c   : > { %1023 = vst [vmem:[%s2096_s10 + $0x388] sm:$0xff] (%p2184_p11), %v1022_v1  ;;  %1025 = vst [vmem:[%s2096_s10 + $0x390] sm:$0xff] (%p2184_p11), %v1024_v16 }
 0x17d   : > { %1027 = vst [vmem:[%s2096_s10 + $0x398] sm:$0xff] (%p2184_p11), %v1026_v12 }
 0x17f   : > { %926 = vadd.xlane.f32.xlu0 %v925_v62 }
 0x1e4   : > { %v811_v23 = vpop.xlane.xlu0 %810 }
 0x1e5   : > { %848 = vst.msk [vmem:[%s2053_s6] sm:$0xff] %vm847_vm1, %v811_v23 }
 0x1eb   : > { %v892_v43 = vpop.xlane.xlu1 %891 }
 0x1ec   : > { %929 = vst.msk [vmem:[%s2053_s6] sm:$0xff] %vm928_vm2, %v892_v43 }
 0x1f0   : > { %v816_v42 = vpop.xlane.xlu1 %815  ;;  %v897_v45 = vpop.xlane.xlu0 %896 }
 0x1f1   : > { %849 = vst.msk [vmem:[%s2053_s6 + $0x8] sm:$0xff] %vm847_vm1, %v816_v42 }
 0x1f2   : > { %930 = vst.msk [vmem:[%s2053_s6 + $0x8] sm:$0xff] %vm928_vm2, %v897_v45 }
 0x1f4   : > { %v902_v36 = vpop.xlane.xlu1 %901  ;;  %v821_v54 = vpop.xlane.xlu0 %820 }
 0x1f5   : > { %850 = vst.msk [vmem:[%s2053_s6 + $0x10] sm:$0xff] %vm847_vm1, %v821_v54 }
 0x1f6   : > { %931 = vst.msk [vmem:[%s2053_s6 + $0x10] sm:$0xff] %vm928_vm2, %v902_v36 }
 0x1f8   : > { %v826_v32 = vpop.xlane.xlu0 %825  ;;  %v831_v11 = vpop.xlane.xlu1 %830 }
 0x1f9   : > { %851 = vst.msk [vmem:[%s2053_s6 + $0x18] sm:$0xff] %vm847_vm1, %v826_v32  ;;  %852 = vst.msk [vmem:[%s2053_s6 + $0x20] sm:$0xff] %vm847_vm1, %v831_v11 }
 0x1fc   : > { %v907_v33 = vpop.xlane.xlu0 %906  ;;  %v912_v15 = vpop.xlane.xlu1 %911 }
 0x1fd   : > { %932 = vst.msk [vmem:[%s2053_s6 + $0x18] sm:$0xff] %vm928_vm2, %v907_v33  ;;  %933 = vst.msk [vmem:[%s2053_s6 + $0x20] sm:$0xff] %vm928_vm2, %v912_v15 }
 0x200   : > { %v836_v41 = vpop.xlane.xlu0 %835  ;;  %v841_v13 = vpop.xlane.xlu1 %840 }
 0x201   : > { %853 = vst.msk [vmem:[%s2053_s6 + $0x28] sm:$0xff] %vm847_vm1, %v836_v41  ;;  %854 = vst.msk [vmem:[%s2053_s6 + $0x30] sm:$0xff] %vm847_vm1, %v841_v13 }
 0x204   : > { %v917_v2 = vpop.xlane.xlu0 %916  ;;  %v922_v48 = vpop.xlane.xlu1 %921 }
 0x205   : > { %934 = vst.msk [vmem:[%s2053_s6 + $0x28] sm:$0xff] %vm928_vm2, %v917_v2  ;;  %935 = vst.msk [vmem:[%s2053_s6 + $0x30] sm:$0xff] %vm928_vm2, %v922_v48 }
 0x207   : > { %948 = sbr.rel (!%p2184_p11) target bundleno = 526 (0x20e), region = 63 }
 0x208   : > { %v846_v4 = vpop.xlane.xlu0 %845 }
 0x209   : > { %855 = vst.msk [vmem:[%s2053_s6 + $0x38] sm:$0xff] %vm847_vm1, %v846_v4 }
 0x20c   : > { %v927_v10 = vpop.xlane.xlu0 %926 }
 0x20d   : > { %936 = vst.msk [vmem:[%s2053_s6 + $0x38] sm:$0xff] %vm928_vm2, %v927_v10 }
 0x20e PF: > { %p13_p13 = scmp.ge.s32.totalorder %s1415_s19, 6   ;;  %s2185_s15 = smov %s1360_s16 }
 0x20f   : > { %s2186_s16 = smov %s1425_s22  ;;  %s2187_s17 = smov %s1415_s19 }
 0x210   :  { %15 = sbr.rel (!%p13_p13) target bundleno = 2 (0x2), region = 130 }
 0x217   :  { %1054 = vsyncpa [#allocation4], 1 }
 0x218   :  { %1056 = vsyncpa [#allocation4 + $0x1], 1 }

// kernel: xconv_forward.4
= control target key start
LH: loop header
LB: loop body
LE: loop exit
PB: predicated region body
PF: predicated region fallthrough
CT: control target
= control target key end

     0   :  { %12 = vsyncpa [#allocation4], 0  ;;  %s1704_s21 = smov 0   ;;  %s1706_s22 = smov 0   ;;  %s2606_s0 = inlined_call_operand.vmem [shape: f32[64,2048], index: 0, kind: input, shape index: {}]   ;;  %s2607_s1 = inlined_call_operand.vmem [shape: f32[64,1], index: 1, kind: input, shape index: {}]   ;;  %s2608_s2 = inlined_call_operand.vmem [shape: f32[64,1], index: 2, kind: input, shape index: {}]   ;;  %s2609_s3 = inlined_call_operand.hbm [shape: f32[64,64], index: 3, kind: input, shape index: {}]   ;;  %s2610_s4 = inlined_call_operand.vmem [shape: f32[64,1], index: 4, kind: input, shape index: {}]   ;;  %s2611_s5 = inlined_call_operand.vmem [shape: f32[64,2048], index: 5, kind: output, shape index: {0}]   ;;  %s2612_s6 = inlined_call_operand.vmem [shape: f32[4,64,2], index: 6, kind: output, shape index: {1}]  }
   0x1   :  { %s1708_s23 = smov 0  }
   0x2 LB: > { %s1720_s24 = sadd.s32 4294967295, %s1662_s23   ;;  %s1723_s25 = sadd.s32 1, %s1662_s23   ;;  %s1662_s23 = sphi %s1708_s23, %s2626_s23   ;;  %s1658_s22 = sphi %s1706_s22, %s2625_s22   ;;  %s1654_s21 = sphi %s1704_s21, %s2624_s21  }
   0x3   : > { %s22_s26 = ssub.s32 %s1662_s23, %s1723_s25  ;;  %s25_s27 = sadd.s32 1, %s1658_s22 }
   0x4   : > { %p23_p0 = scmp.eq.s32.totalorder %s22_s26, 0  ;;  %p32_p1 = scmp.ne.s32.totalorder %s1658_s22, %s1654_s21 }
   0x5   : > { %p33_p2 = scmp.eq.s32.totalorder %s1662_s23, 0  ;;  %p146_p3 = scmp.eq.s32.totalorder %s1720_s24, 3 }
   0x6   : > { %s1733_s28 = scalar_select %p23_p0, %s1658_s22, %s25_s27  }
   0x7   : > { %p1735_p4 = por %p33_p2, %p32_p1  ;;  %p1739_p5 = por %p146_p3, %p32_p1 }
   0x8   : > { %p1403_p6 = scmp.ge.s32.totalorder %s1662_s23, 1  ;;  %p185_p7 = scmp.lt.s32.totalorder %s1662_s23, 5 }
   0x9   : > { %s2615_s29 = scalar_select %p1735_p4, 1, 0 }
   0xa   : > { %s2616_s30 = scalar_select %p1739_p5, 1, 0 }
   0xb   : > { %p2613_p8 = scmp.eq.s32.totalorder %s1720_s24, 0  ;;  %p1746_p9 = pnand %p1403_p6, %p185_p7 }
   0xc   : > { %s1664_s8 = smov [#allocation3]   ;;  %s1608_s13 = scalar_lea.hbm %s2609_s3, 1024 }
   0xd   : > { %s2617_s7 = scalar_select %p1746_p9, 1, 0 }
   0xe   : > { %s203_s9 = sshll.u32 %s1664_s8, 4  ;;  %p1507_p10 = pneg %p1746_p9  ;;  %s204_s9 = int_to_ptr.vmem [resolvable:$true] %s203_s9 }
   0xf   : > { %p1609_p12 = scmp.ne.s32.totalorder %s2609_s3, %s1608_s13  ;;  %p1615_p2 = scmp.lt.u32.totalorder %s1608_s13, %s2609_s3 }
  0x10   : > { %p1754_p11 = pnand %p2613_p8, %p1507_p10 }
  0x12   : > { %p1610_p13 = pneg %p1754_p11 }
  0x14   : > { %p1611_p0 = pnand %p1610_p13, %p1609_p12 }
  0x16   : > { %p1612_p1 = pneg %p1611_p0 }
  0x18   : > { %p1617_p3 = pnand %p1615_p2, %p1612_p1 }
  0x1a   : > { %1620 = shalt.err (!%p1617_p3)
}
  0x1b   : > { %s1621_s18 = scalar_lea.vmem %s204_s9, 1024  ;;  %p1629_p8 = scmp.lt.s32.totalorder %s204_s9, %s204_s9 }
  0x1c   : > { %p1622_p6 = scmp.ne.s32.totalorder %s204_s9, %s1621_s18  ;;  %p1630_p5 = scmp.lt.s32.totalorder %s1621_s18, %s1621_s18 }
  0x1e   : > { %p1624_p7 = pnand %p1622_p6, %p1610_p13  ;;  %p1631_p9 = por %p1630_p5, %p1629_p8 }
  0x20   : > { %p1625_p10 = pneg %p1624_p7 }
  0x22   : > { %p1632_p4 = pnand %p1631_p9, %p1625_p10 }
  0x24   : > { %1635 = shalt.err (!%p1632_p4)
}
  0x25   : > { %s1665_s19 = smov 128   ;;  %s1666_s20 = smov 8  }
  0x26   : > { %1510 = dma.hbm_to_vmem [thread:$0]  (!%p1754_p11), %s2609_s3, 1024, %s204_s9, [#allocation4], %s1665_s19, %s1665_s19, %s1666_s20  }
  0x27   : > { %p1405_p12 = scmp.ge.s32.totalorder %s1662_s23, 4 }
  0x28   : > { %p2619_p0 = scmp.ne.s32.totalorder (!%p1405_p12), %s2615_s29, 0 }
  0x29   : > { %216 = sbr.rel (%p1405_p12) target bundleno = 68 (0x44), region = 32 }
  0x30   : > { %219 = sbr.rel (!%p2619_p0) target bundleno = 68 (0x44), region = 36  ;;  %s221_s8 = sand.u32 (%p2619_p0), 1, %s1658_s22  }
  0x31   : > { %s1468_s11 = sshll.u32 (%p2619_p0), %s1662_s23, 5  ;;  %s1406_s12 = sshll.u32 (%p2619_p0), %s221_s8, 8 }
  0x32   : > { %s1782_s15 = scalar_lea.vmem (%p2619_p0), %s2606_s0, %s1468_s11  ;;  %s1787_s29 = scalar_lea.vmem (%p2619_p0), [#allocation2], %s1406_s12 }
  0x33   : > { %v239_v0 = vld [vmem:[%s1782_s15] sm:$0xff] (%p2619_p0)  ;;  %v241_v1 = vld [vmem:[%s1782_s15 + $0x8] sm:$0xff] (%p2619_p0)  ;;  %v243_v2 = vld [vmem:[%s1782_s15 + $0x10] sm:$0xff] (%p2619_p0) }
  0x34   : > { %240 = vst [vmem:[%s1787_s29] sm:$0xff] (%p2619_p0), %v239_v0  ;;  %242 = vst [vmem:[%s1787_s29 + $0x8] sm:$0xff] (%p2619_p0), %v241_v1  ;;  %v245_v3 = vld [vmem:[%s1782_s15 + $0x18] sm:$0xff] (%p2619_p0)  ;;  %v247_v4 = vld [vmem:[%s1782_s15 + $0x80] sm:$0xff] (%p2619_p0) }
  0x35   : > { %244 = vst [vmem:[%s1787_s29 + $0x10] sm:$0xff] (%p2619_p0), %v243_v2  ;;  %v249_v5 = vld [vmem:[%s1782_s15 + $0x88] sm:$0xff] (%p2619_p0)  ;;  %246 = vst [vmem:[%s1787_s29 + $0x18] sm:$0xff] (%p2619_p0), %v245_v3  ;;  %v251_v6 = vld [vmem:[%s1782_s15 + $0x90] sm:$0xff] (%p2619_p0) }
  0x36   : > { %248 = vst [vmem:[%s1787_s29 + $0x20] sm:$0xff] (%p2619_p0), %v247_v4  ;;  %250 = vst [vmem:[%s1787_s29 + $0x28] sm:$0xff] (%p2619_p0), %v249_v5  ;;  %v253_v7 = vld [vmem:[%s1782_s15 + $0x98] sm:$0xff] (%p2619_p0)  ;;  %v255_v8 = vld [vmem:[%s1782_s15 + $0x100] sm:$0xff] (%p2619_p0) }
  0x37   : > { %252 = vst [vmem:[%s1787_s29 + $0x30] sm:$0xff] %v251_v6  ;;  %254 = vst [vmem:[%s1787_s29 + $0x38] sm:$0xff] %v253_v7  ;;  %v257_v9 = vld [vmem:[%s1782_s15 + $0x108] sm:$0xff]  ;;  %v259_v10 = vld [vmem:[%s1782_s15 + $0x110] sm:$0xff] }
  0x38   : > { %256 = vst [vmem:[%s1787_s29 + $0x40] sm:$0xff] %v255_v8  ;;  %v261_v11 = vld [vmem:[%s1782_s15 + $0x118] sm:$0xff]  ;;  %258 = vst [vmem:[%s1787_s29 + $0x48] sm:$0xff] %v257_v9  ;;  %v263_v12 = vld [vmem:[%s1782_s15 + $0x180] sm:$0xff] }
  0x39   : > { %260 = vst [vmem:[%s1787_s29 + $0x50] sm:$0xff] %v259_v10  ;;  %262 = vst [vmem:[%s1787_s29 + $0x58] sm:$0xff] %v261_v11  ;;  %v265_v13 = vld [vmem:[%s1782_s15 + $0x188] sm:$0xff]  ;;  %v267_v14 = vld [vmem:[%s1782_s15 + $0x190] sm:$0xff] }
  0x3a   : > { %264 = vst [vmem:[%s1787_s29 + $0x60] sm:$0xff] %v263_v12  ;;  %266 = vst [vmem:[%s1787_s29 + $0x68] sm:$0xff] %v265_v13  ;;  %v269_v15 = vld [vmem:[%s1782_s15 + $0x198] sm:$0xff]  ;;  %v271_v16 = vld [vmem:[%s1782_s15 + $0x200] sm:$0xff] }
  0x3b   : > { %268 = vst [vmem:[%s1787_s29 + $0x70] sm:$0xff] %v267_v14  ;;  %v273_v17 = vld [vmem:[%s1782_s15 + $0x208] sm:$0xff]  ;;  %270 = vst [vmem:[%s1787_s29 + $0x78] sm:$0xff] %v269_v15  ;;  %v275_v18 = vld [vmem:[%s1782_s15 + $0x210] sm:$0xff] }
  0x3c   : > { %272 = vst [vmem:[%s1787_s29 + $0x80] sm:$0xff] %v271_v16  ;;  %274 = vst [vmem:[%s1787_s29 + $0x88] sm:$0xff] %v273_v17  ;;  %v277_v19 = vld [vmem:[%s1782_s15 + $0x218] sm:$0xff]  ;;  %v279_v20 = vld [vmem:[%s1782_s15 + $0x280] sm:$0xff] }
  0x3d   : > { %276 = vst [vmem:[%s1787_s29 + $0x90] sm:$0xff] %v275_v18  ;;  %278 = vst [vmem:[%s1787_s29 + $0x98] sm:$0xff] %v277_v19  ;;  %v281_v21 = vld [vmem:[%s1782_s15 + $0x288] sm:$0xff]  ;;  %v283_v22 = vld [vmem:[%s1782_s15 + $0x290] sm:$0xff] }
  0x3e   : > { %280 = vst [vmem:[%s1787_s29 + $0xa0] sm:$0xff] %v279_v20  ;;  %v285_v23 = vld [vmem:[%s1782_s15 + $0x298] sm:$0xff]  ;;  %282 = vst [vmem:[%s1787_s29 + $0xa8] sm:$0xff] %v281_v21  ;;  %v287_v24 = vld [vmem:[%s1782_s15 + $0x300] sm:$0xff] }
  0x3f   : > { %284 = vst [vmem:[%s1787_s29 + $0xb0] sm:$0xff] %v283_v22  ;;  %286 = vst [vmem:[%s1787_s29 + $0xb8] sm:$0xff] %v285_v23  ;;  %v289_v25 = vld [vmem:[%s1782_s15 + $0x308] sm:$0xff]  ;;  %v291_v26 = vld [vmem:[%s1782_s15 + $0x310] sm:$0xff] }
  0x40   : > { %288 = vst [vmem:[%s1787_s29 + $0xc0] sm:$0xff] %v287_v24  ;;  %290 = vst [vmem:[%s1787_s29 + $0xc8] sm:$0xff] %v289_v25  ;;  %v293_v27 = vld [vmem:[%s1782_s15 + $0x318] sm:$0xff]  ;;  %v295_v28 = vld [vmem:[%s1782_s15 + $0x380] sm:$0xff] }
  0x41   : > { %292 = vst [vmem:[%s1787_s29 + $0xd0] sm:$0xff] %v291_v26  ;;  %v297_v29 = vld [vmem:[%s1782_s15 + $0x388] sm:$0xff]  ;;  %294 = vst [vmem:[%s1787_s29 + $0xd8] sm:$0xff] %v293_v27  ;;  %v299_v30 = vld [vmem:[%s1782_s15 + $0x390] sm:$0xff] }
  0x42   : > { %296 = vst [vmem:[%s1787_s29 + $0xe0] sm:$0xff] %v295_v28  ;;  %298 = vst [vmem:[%s1787_s29 + $0xe8] sm:$0xff] %v297_v29  ;;  %v301_v31 = vld [vmem:[%s1782_s15 + $0x398] sm:$0xff] }
  0x43   : > { %300 = vst [vmem:[%s1787_s29 + $0xf0] sm:$0xff] %v299_v30  ;;  %302 = vst [vmem:[%s1787_s29 + $0xf8] sm:$0xff] %v301_v31 }
  0x44 PF: > { %p2620_p4 = scmp.ne.s32.totalorder %s2617_s7, 0 }
  0x45   : > { %s314_s23 = sand.u32 (!%p2620_p4), 1, %s1654_s21   ;;  %p2621_p5 = scmp.eq.s32.totalorder (!%p2620_p4), %s1720_s24, 0 }
  0x46   : > { %311 = sbr.rel (%p2620_p4) target bundleno = 691 (0x2b3), region = 59  ;;  %s1853_s9 = sshll.u32 (!%p2620_p4), %s314_s23, 8 }
  0x47   : > { %s1856_s10 = scalar_lea.vmem (!%p2620_p4), [#allocation2], %s1853_s9 }
  0x4d   : > { %1649 = dma.done.wait (%p2621_p5), [#allocation4], 1024   ;;  %p2622_p8 = pmov %p2621_p5 }
  0x4e   : > { %v1667_v32 = vmov 0   ;;  %v470_v33 = vld [vmem:[%s2608_s2] sm:$0xff]  ;;  %v471_v35 = vld [vmem:[%s2608_s2 + $0x8] sm:$0xff]  ;;  %v393_v37 = vld [vmem:[%s2607_s1 + $0x18] sm:$0xff]  ;;  %v1668_v53 = vmov 0.0   ;;  %vm606_vm0 = vcmask 523264  }
  0x4f   : > { %1651 = vsyncadd (%p2622_p8), [#allocation4], 4294966272  ;;  %1543 = vset.pattern.permute.xlu1 %v1667_v32  ;;  %1542 = vset.pattern.permute.xlu0 %v1667_v32  ;;  %v390_v34 = vld [vmem:[%s2607_s1] sm:$0xff]  ;;  %v391_v36 = vld [vmem:[%s2607_s1 + $0x8] sm:$0xff]  ;;  %p353_p9 = scmp.lt.s32.totalorder %s1720_s24, 3  ;;  %p2623_p11 = scmp.ne.s32.totalorder %s2616_s30, 0 }
  0x50   : > { %480 = vperm.xlu1 %1543, %v470_v33   ;;  %400 = vperm.xlu0 %1542, %v390_v34   ;;  %v392_v38 = vld [vmem:[%s2607_s1 + $0x10] sm:$0xff]  ;;  %v473_v39 = vld [vmem:[%s2608_s2 + $0x18] sm:$0xff]  ;;  %v395_v41 = vld [vmem:[%s2607_s1 + $0x28] sm:$0xff]  ;;  %s1470_s17 = sshll.u32 (%p2623_p11), %s1720_s24, 5 }
  0x51   : > { %v472_v40 = vld [vmem:[%s2608_s2 + $0x10] sm:$0xff]  ;;  %v394_v42 = vld [vmem:[%s2607_s1 + $0x20] sm:$0xff]  ;;  %v475_v43 = vld [vmem:[%s2608_s2 + $0x28] sm:$0xff]  ;;  %695 = vmatprep.mubr.f32.mxu0 %v1668_v53  ;;  %808 = vmatprep.mubr.f32.mxu1 %v1668_v53  ;;  %s2533_s21 = scalar_lea.vmem (%p2623_p11), %s2611_s5, %s1470_s17 }
  0x52   : > { %v474_v44 = vld [vmem:[%s2608_s2 + $0x20] sm:$0xff]  ;;  %v397_v45 = vld [vmem:[%s2607_s1 + $0x38] sm:$0xff]  ;;  %v396_v46 = vld [vmem:[%s2607_s1 + $0x30] sm:$0xff] }
  0x53   : > { %v477_v47 = vld [vmem:[%s2608_s2 + $0x38] sm:$0xff]  ;;  %v476_v48 = vld [vmem:[%s2608_s2 + $0x30] sm:$0xff]  ;;  %v559_v49 = vld [vmem:[%s2610_s4 + $0x8] sm:$0xff] }
  0x54   : > { %485 = vperm.xlu1 %1543, %v471_v35   ;;  %405 = vperm.xlu0 %1542, %v391_v36   ;;  %v558_v50 = vld [vmem:[%s2610_s4] sm:$0xff]  ;;  %v561_v51 = vld [vmem:[%s2610_s4 + $0x18] sm:$0xff]  ;;  %v560_v52 = vld [vmem:[%s2610_s4 + $0x10] sm:$0xff] }
  0x55   : > { %v563_v54 = vld [vmem:[%s2610_s4 + $0x28] sm:$0xff]  ;;  %v562_v55 = vld [vmem:[%s2610_s4 + $0x20] sm:$0xff]  ;;  %v565_v56 = vld [vmem:[%s2610_s4 + $0x38] sm:$0xff] }
  0x56   : > { %v564_v57 = vld [vmem:[%s2610_s4 + $0x30] sm:$0xff]  ;;  %v359_v60 = vld [vmem:[%s1856_s10 + $0x8] sm:$0xff]  ;;  %v361_v62 = vld [vmem:[%s1856_s10 + $0x18] sm:$0xff] }
  0x57   : > { %v363_v61 = vld [vmem:[%s1856_s10 + $0x28] sm:$0xff]  ;;  %v358_v63 = vld [vmem:[%s1856_s10] sm:$0xff]  ;;  %v360_v0 = vld [vmem:[%s1856_s10 + $0x10] sm:$0xff] }
  0x58   : > { %415 = vperm.xlu1 %1543, %v393_v37   ;;  %410 = vperm.xlu0 %1542, %v392_v38   ;;  %v365_v1 = vld [vmem:[%s1856_s10 + $0x38] sm:$0xff]  ;;  %v362_v2 = vld [vmem:[%s1856_s10 + $0x20] sm:$0xff]  ;;  %v364_v3 = vld [vmem:[%s1856_s10 + $0x30] sm:$0xff] }
  0x59   : > { %v370_v14 = vld [vmem:[%s1856_s10 + $0x60] sm:$0xff]  ;;  %v371_v15 = vld [vmem:[%s1856_s10 + $0x68] sm:$0xff]  ;;  %v372_v16 = vld [vmem:[%s1856_s10 + $0x70] sm:$0xff] }
  0x5a   : > { %v373_v22 = vld [vmem:[%s1856_s10 + $0x78] sm:$0xff]  ;;  %v366_v24 = vld [vmem:[%s1856_s10 + $0x40] sm:$0xff]  ;;  %v367_v25 = vld [vmem:[%s1856_s10 + $0x48] sm:$0xff] }
  0x5b   : > { %v368_v26 = vld [vmem:[%s1856_s10 + $0x50] sm:$0xff]  ;;  %v369_v34 = vld [vmem:[%s1856_s10 + $0x58] sm:$0xff] }
  0x5c   : > { %495 = vperm.xlu1 %1543, %v473_v39   ;;  %490 = vperm.xlu0 %1542, %v472_v40  }
  0x60   : > { %425 = vperm.xlu1 %1543, %v395_v41   ;;  %420 = vperm.xlu0 %1542, %v394_v42  }
  0x64   : > { %505 = vperm.xlu1 %1543, %v475_v43   ;;  %500 = vperm.xlu0 %1542, %v474_v44  }
  0x68   : > { %435 = vperm.xlu1 %1543, %v397_v45   ;;  %430 = vperm.xlu0 %1542, %v396_v46  }
  0x6c   : > { %515 = vperm.xlu1 %1543, %v477_v47   ;;  %510 = vperm.xlu0 %1542, %v476_v48  }
  0x70   : > { %573 = vperm.xlu1 %1543, %v559_v49   ;;  %568 = vperm.xlu0 %1542, %v558_v50  }
  0x74   : > { %583 = vperm.xlu1 %1543, %v561_v51   ;;  %578 = vperm.xlu0 %1542, %v560_v52  }
  0x78   : > { %593 = vperm.xlu1 %1543, %v563_v54   ;;  %588 = vperm.xlu0 %1542, %v562_v55   ;;  %v378_v55 = vld [vmem:[%s1856_s10 + $0xa0] sm:$0xff] }
  0x7c   : > { %603 = vperm.xlu1 %1543, %v565_v56   ;;  %598 = vperm.xlu0 %1542, %v564_v57   ;;  %v379_v56 = vld [vmem:[%s1856_s10 + $0xa8] sm:$0xff] }
  0xcf   : > { %v481_v58 = vpop.permute.xlu1 %480  ;;  %v401_v59 = vpop.permute.xlu0 %400 }
  0xd0   : > { %v439_v6 = vsub.f32 %v359_v60, %v401_v59  ;;  %v441_v7 = vsub.f32 %v361_v62, %v401_v59  ;;  %v438_v8 = vsub.f32 %v358_v63, %v401_v59  ;;  %v440_v9 = vsub.f32 %v360_v0, %v401_v59  ;;  %v381_v59 = vld [vmem:[%s1856_s10 + $0xb8] sm:$0xff]  ;;  %v375_v0 = vld [vmem:[%s1856_s10 + $0x88] sm:$0xff] }
  0xd2   : > { %v519_v27 = vmul.f32 %v481_v58, %v439_v6  ;;  %v521_v28 = vmul.f32 %v481_v58, %v441_v7  ;;  %v518_v29 = vmul.f32 %v481_v58, %v438_v8  ;;  %v520_v30 = vmul.f32 %v481_v58, %v440_v9  ;;  %v380_v58 = vld [vmem:[%s1856_s10 + $0xb0] sm:$0xff] }
  0xd3   : > { %v486_v4 = vpop.permute.xlu1 %485  ;;  %v406_v5 = vpop.permute.xlu0 %405 }
  0xd4   : > { %v443_v10 = vsub.f32 %v363_v61, %v406_v5  ;;  %v445_v11 = vsub.f32 %v365_v1, %v406_v5  ;;  %v442_v12 = vsub.f32 %v362_v2, %v406_v5  ;;  %v444_v13 = vsub.f32 %v364_v3, %v406_v5  ;;  %v374_v61 = vld [vmem:[%s1856_s10 + $0x80] sm:$0xff]  ;;  %v376_v1 = vld [vmem:[%s1856_s10 + $0x90] sm:$0xff]  ;;  %v377_v2 = vld [vmem:[%s1856_s10 + $0x98] sm:$0xff] }
  0xd6   : > { %v523_v17 = vmul.f32 %v486_v4, %v443_v10  ;;  %v525_v18 = vmul.f32 %v486_v4, %v445_v11  ;;  %v522_v19 = vmul.f32 %v486_v4, %v442_v12  ;;  %v524_v20 = vmul.f32 %v486_v4, %v444_v13 }
  0xd7   : > { %v416_v21 = vpop.permute.xlu1 %415  ;;  %v411_v23 = vpop.permute.xlu0 %410 }
  0xd8   : > { %v450_v31 = vsub.f32 %v370_v14, %v416_v21  ;;  %v451_v32 = vsub.f32 %v371_v15, %v416_v21  ;;  %v452_v33 = vsub.f32 %v372_v16, %v416_v21  ;;  %v1471_v35 = vpack.c.bf16 %v523_v17, %v519_v27  ;;  %v389_v27 = vld [vmem:[%s1856_s10 + $0xf8] sm:$0xff] }
  0xd9   : > { %v1487_v36 = vpack.c.bf16 %v525_v18, %v521_v28  ;;  %v1473_v37 = vpack.c.bf16 %v522_v19, %v518_v29  ;;  %v1489_v38 = vpack.c.bf16 %v524_v20, %v520_v30  ;;  %v453_v39 = vsub.f32 %v373_v22, %v416_v21  ;;  %v382_v29 = vld [vmem:[%s1856_s10 + $0xc0] sm:$0xff] }
  0xda   : > { %v446_v40 = vsub.f32 %v366_v24, %v411_v23  ;;  %v447_v41 = vsub.f32 %v367_v25, %v411_v23  ;;  %v448_v42 = vsub.f32 %v368_v26, %v411_v23  ;;  %v449_v45 = vsub.f32 %v369_v34, %v411_v23  ;;  %1472 = vmatprep.subr.bf16.mxu0 %v1471_v35  ;;  %v386_v23 = vld [vmem:[%s1856_s10 + $0xe0] sm:$0xff]  ;;  %v387_v24 = vld [vmem:[%s1856_s10 + $0xe8] sm:$0xff]  ;;  %v388_v26 = vld [vmem:[%s1856_s10 + $0xf0] sm:$0xff] }
  0xdb   : > { %v496_v43 = vpop.permute.xlu1 %495  ;;  %v491_v44 = vpop.permute.xlu0 %490  ;;  %1488 = vmatprep.subr.bf16.mxu1 %v1487_v36  ;;  %1474 = vmatpush1.bf16.msra.mxu0 %v1473_v37  ;;  %v383_v34 = vld [vmem:[%s1856_s10 + $0xc8] sm:$0xff]  ;;  %v384_v35 = vld [vmem:[%s1856_s10 + $0xd0] sm:$0xff]  ;;  %v385_v36 = vld [vmem:[%s1856_s10 + $0xd8] sm:$0xff]  ;;  %s2061_s10 = scalar_lea.vmem [#allocation5], %s1853_s9 }
  0xdc   : > { %v530_v46 = vmul.f32 %v496_v43, %v450_v31  ;;  %v531_v47 = vmul.f32 %v496_v43, %v451_v32  ;;  %v532_v48 = vmul.f32 %v496_v43, %v452_v33  ;;  %v526_v49 = vmul.f32 %v491_v44, %v446_v40  ;;  %1490 = vmatpush1.bf16.msra.mxu1 %v1489_v38  ;;  %s354_s9 = scalar_select %p353_p9, %s1720_s24, 3 }
  0xdd   : > { %v527_v50 = vmul.f32 %v491_v44, %v447_v41  ;;  %v528_v51 = vmul.f32 %v491_v44, %v448_v42  ;;  %v533_v52 = vmul.f32 %v496_v43, %v453_v39  ;;  %v529_v54 = vmul.f32 %v491_v44, %v449_v45 }
  0xde   : > { %v1477_v63 = vpack.c.bf16 %v530_v46, %v526_v49  ;;  %s1469_s15 = sshll.u32 %s354_s9, 6 }
  0xdf   : > { %v426_v57 = vpop.permute.xlu1 %425  ;;  %v421_v60 = vpop.permute.xlu0 %420  ;;  %v1475_v62 = vpack.c.bf16 %v531_v47, %v527_v50  ;;  %v1493_v4 = vpack.c.bf16 %v532_v48, %v528_v51  ;;  %v1491_v8 = vpack.c.bf16 %v533_v52, %v529_v54  ;;  %s2490_s16 = scalar_lea.vmem %s2612_s6, %s1469_s15 }
  0xe0   : > { %v458_v3 = vsub.f32 %v378_v55, %v426_v57  ;;  %v459_v5 = vsub.f32 %v379_v56, %v426_v57  ;;  %v460_v6 = vsub.f32 %v380_v58, %v426_v57  ;;  %v461_v7 = vsub.f32 %v381_v59, %v426_v57 }
  0xe1   : > { %1476 = vmatprep.subr.bf16.mxu0 %v1475_v62  ;;  %v454_v9 = vsub.f32 %v374_v61, %v421_v60  ;;  %v455_v10 = vsub.f32 %v375_v0, %v421_v60  ;;  %v456_v11 = vsub.f32 %v376_v1, %v421_v60  ;;  %v457_v12 = vsub.f32 %v377_v2, %v421_v60  ;;  %v550_v60 = vld [vmem:[#allocation3] sm:$0xff]  ;;  %v551_v61 = vld [vmem:[#allocation3 + $0x8] sm:$0xff]  ;;  %v552_v62 = vld [vmem:[#allocation3 + $0x10] sm:$0xff] }
  0xe2   : > { %1478 = vmatpush1.bf16.msra.mxu0 %v1477_v63  ;;  %1492 = vmatprep.subr.bf16.mxu1 %v1491_v8  ;;  %v553_v63 = vld [vmem:[#allocation3 + $0x18] sm:$0xff]  ;;  %v554_v0 = vld [vmem:[#allocation3 + $0x20] sm:$0xff]  ;;  %v555_v1 = vld [vmem:[#allocation3 + $0x28] sm:$0xff] }
  0xe3   : > { %v506_v13 = vpop.permute.xlu1 %505  ;;  %v501_v14 = vpop.permute.xlu0 %500  ;;  %1494 = vmatpush1.bf16.msra.mxu1 %v1493_v4  ;;  %v556_v2 = vld [vmem:[#allocation3 + $0x30] sm:$0xff] }
  0xe4   : > { %v538_v15 = vmul.f32 %v506_v13, %v458_v3  ;;  %v539_v16 = vmul.f32 %v506_v13, %v459_v5  ;;  %v540_v17 = vmul.f32 %v506_v13, %v460_v6  ;;  %v541_v18 = vmul.f32 %v506_v13, %v461_v7  ;;  %v557_v3 = vld [vmem:[#allocation3 + $0x38] sm:$0xff] }
  0xe5   : > { %v534_v19 = vmul.f32 %v501_v14, %v454_v9  ;;  %v535_v20 = vmul.f32 %v501_v14, %v455_v10  ;;  %v536_v21 = vmul.f32 %v501_v14, %v456_v11  ;;  %v537_v22 = vmul.f32 %v501_v14, %v457_v12 }
  0xe7   : > { %v436_v25 = vpop.permute.xlu1 %435  ;;  %v431_v28 = vpop.permute.xlu0 %430  ;;  %v1479_v30 = vpack.c.bf16 %v539_v16, %v535_v20  ;;  %v1495_v31 = vpack.c.bf16 %v541_v18, %v537_v22  ;;  %v1481_v32 = vpack.c.bf16 %v538_v15, %v534_v19  ;;  %v1497_v33 = vpack.c.bf16 %v540_v17, %v536_v21 }
  0xe8   : > { %v466_v37 = vsub.f32 %v386_v23, %v436_v25  ;;  %v467_v38 = vsub.f32 %v387_v24, %v436_v25  ;;  %v468_v39 = vsub.f32 %v388_v26, %v436_v25  ;;  %v469_v40 = vsub.f32 %v389_v27, %v436_v25 }
  0xe9   : > { %1480 = vmatprep.subr.bf16.mxu0 %v1479_v30  ;;  %1496 = vmatprep.subr.bf16.mxu1 %v1495_v31  ;;  %v462_v41 = vsub.f32 %v382_v29, %v431_v28  ;;  %v463_v42 = vsub.f32 %v383_v34, %v431_v28  ;;  %v464_v43 = vsub.f32 %v384_v35, %v431_v28 }
  0xea   : > { %1482 = vmatpush1.bf16.msra.mxu0 %v1481_v32  ;;  %v465_v44 = vsub.f32 %v385_v36, %v431_v28  ;;  %1498 = vmatpush1.bf16.msra.mxu1 %v1497_v33 }
  0xeb   : > { %v516_v45 = vpop.permute.xlu1 %515  ;;  %v511_v46 = vpop.permute.xlu0 %510 }
  0xec   : > { %v546_v47 = vmul.f32 %v516_v45, %v466_v37  ;;  %v547_v48 = vmul.f32 %v516_v45, %v467_v38  ;;  %v548_v49 = vmul.f32 %v516_v45, %v468_v39  ;;  %v549_v50 = vmul.f32 %v516_v45, %v469_v40 }
  0xed   : > { %v542_v51 = vmul.f32 %v511_v46, %v462_v41  ;;  %v543_v52 = vmul.f32 %v511_v46, %v463_v42  ;;  %v544_v54 = vmul.f32 %v511_v46, %v464_v43  ;;  %v545_v55 = vmul.f32 %v511_v46, %v465_v44 }
  0xef   : > { %v1483_v56 = vpack.c.bf16 %v547_v48, %v543_v52  ;;  %v1499_v57 = vpack.c.bf16 %v549_v50, %v545_v55  ;;  %v1485_v58 = vpack.c.bf16 %v546_v47, %v542_v51  ;;  %v1501_v59 = vpack.c.bf16 %v548_v49, %v544_v54  ;;  %v569_v4 = vpop.permute.xlu0 %568  ;;  %v574_v13 = vpop.permute.xlu1 %573 }
  0xf1   : > { %1484 = vmatprep.subr.bf16.mxu0 %v1483_v56  ;;  %1500 = vmatprep.subr.bf16.mxu1 %v1499_v57 }
  0xf2   : > { %1486 = vmatpush1.bf16.msra.mxu0 %v1485_v58  ;;  %1502 = vmatpush1.bf16.msra.mxu1 %v1501_v59 }
  0xf3   : > { %v579_v27 = vpop.permute.xlu0 %578  ;;  %v584_v49 = vpop.permute.xlu1 %583 }
  0xf5   : > { %1415 = vmatmul.mubr.msk.f32.vlgmr.msra.gmra.mrb[0].mxu0 %vm606_vm0, %v550_v60  ;;  %1423 = vmatmul.mubr.msk.f32.vlgmr.msra.gmra.mrb[0].mxu1 %vm606_vm0, %v550_v60 }
  0xf6   : > { %701 = vmatprep.mubr.f32.mxu0 %v1668_v53  ;;  %814 = vmatprep.mubr.f32.mxu1 %v1668_v53 }
  0xf9   : > { %1416 = vmatmul.mubr.msk.f32.gmra.mrb[2].mxu0 %vm606_vm0, %v551_v61  ;;  %1424 = vmatmul.mubr.msk.f32.gmra.mrb[2].mxu1 %vm606_vm0, %v551_v61 }
  0xfa   : > { %707 = vmatprep.mubr.f32.mxu0 %v1668_v53  ;;  %820 = vmatprep.mubr.f32.mxu1 %v1668_v53 }
  0xfd   : > { %1417 = vmatmul.mubr.msk.f32.gmra.mrb[4].mxu0 %vm606_vm0, %v552_v62  ;;  %1425 = vmatmul.mubr.msk.f32.gmra.mrb[4].mxu1 %vm606_vm0, %v552_v62 }
  0xfe   : > { %713 = vmatprep.mubr.f32.mxu0 %v1668_v53  ;;  %826 = vmatprep.mubr.f32.mxu1 %v1668_v53 }
 0x101   : > { %1418 = vmatmul.mubr.msk.f32.gmra.mrb[6].mxu0 %vm606_vm0, %v553_v63  ;;  %1426 = vmatmul.mubr.msk.f32.gmra.mrb[6].mxu1 %vm606_vm0, %v553_v63 }
 0x102   : > { %719 = vmatprep.mubr.f32.mxu0 %v1668_v53  ;;  %832 = vmatprep.mubr.f32.mxu1 %v1668_v53 }
 0x105   : > { %1419 = vmatmul.mubr.msk.f32.gmra.mrb[8].mxu0 %vm606_vm0, %v554_v0  ;;  %1427 = vmatmul.mubr.msk.f32.gmra.mrb[8].mxu1 %vm606_vm0, %v554_v0 }
 0x106   : > { %725 = vmatprep.mubr.f32.mxu0 %v1668_v53  ;;  %838 = vmatprep.mubr.f32.mxu1 %v1668_v53 }
 0x109   : > { %1420 = vmatmul.mubr.msk.f32.gmra.mrb[10].mxu0 %vm606_vm0, %v555_v1  ;;  %1428 = vmatmul.mubr.msk.f32.gmra.mrb[10].mxu1 %vm606_vm0, %v555_v1 }
 0x10a   : > { %731 = vmatprep.mubr.f32.mxu0 %v1668_v53  ;;  %844 = vmatprep.mubr.f32.mxu1 %v1668_v53 }
 0x10d   : > { %1421 = vmatmul.mubr.msk.f32.gmra.mrb[12].mxu0 %vm606_vm0, %v556_v2  ;;  %1429 = vmatmul.mubr.msk.f32.gmra.mrb[12].mxu1 %vm606_vm0, %v556_v2 }
 0x10e   : > { %737 = vmatprep.mubr.f32.mxu0 %v1668_v53  ;;  %850 = vmatprep.mubr.f32.mxu1 %v1668_v53 }
 0x111   : > { %1422 = vmatmul.mubr.msk.f32.gmra.mrb[14].mxu0 %vm606_vm0, %v557_v3  ;;  %1430 = vmatmul.mubr.msk.f32.gmra.mrb[14].mxu1 %vm606_vm0, %v557_v3 }
 0x1c8   : > { %v697_v5 = vpop.f32.mrb[0].mxu0  ;;  %v810_v6 = vpop.f32.mrb[0].mxu1 }
 0x1c9   : > { %v1998_v7 = vadd.f32 %v697_v5, %v569_v4  ;;  %v2000_v8 = vadd.f32 %v810_v6, %v569_v4  ;;  %v699_v9 = vpop.f32.mrb[1].mxu0  ;;  %v812_v10 = vpop.f32.mrb[1].mxu1 }
 0x1ca   : > { %v2002_v11 = vadd.f32 %v699_v9, %v569_v4  ;;  %v2004_v12 = vadd.f32 %v812_v10, %v569_v4 }
 0x1cb   : > { %v889_v53 = vmin.f32 %v1998_v7, 0.0  ;;  %v891_v14 = vmin.f32 %v2000_v8, 0.0  ;;  %vm857_vm1 = vcmp.gt.f32.partialorder %v1998_v7, 0.0  ;;  %vm859_vm2 = vcmp.gt.f32.partialorder %v2000_v8, 0.0 }
 0x1cc   : > { %v890_v15 = vmin.f32 %v2002_v11, 0.0  ;;  %v703_v16 = vpop.f32.mrb[2].mxu0  ;;  %v816_v17 = vpop.f32.mrb[2].mxu1  ;;  %v892_v25 = vmin.f32 %v2004_v12, 0.0  ;;  %vm858_vm3 = vcmp.gt.f32.partialorder %v2002_v11, 0.0 }
 0x1cd   : > { %v921_v18 = vmul.f32 1.442695, %v889_v53  ;;  %v925_v19 = vmul.f32 1.442695, %v891_v14  ;;  %v2009_v20 = vadd.f32 %v703_v16, %v574_v13  ;;  %v2011_v21 = vadd.f32 %v816_v17, %v574_v13  ;;  %v705_v22 = vpop.f32.mrb[3].mxu0  ;;  %v818_v23 = vpop.f32.mrb[3].mxu1 }
 0x1ce   : > { %v923_v24 = vmul.f32 1.442695, %v890_v15  ;;  %v2014_v26 = vadd.f32 %v705_v22, %v574_v13  ;;  %v927_v36 = vmul.f32 1.442695, %v892_v25  ;;  %v2030_v50 = vadd.f32 %v818_v23, %v574_v13  ;;  %v2076_v25 = vpop.permute.xlu0 %588 }
 0x1cf   : > { %1544 = vpow2.f32 %v921_v18  ;;  %v893_v28 = vmin.f32 %v2009_v20, 0.0  ;;  %v895_v29 = vmin.f32 %v2011_v21, 0.0  ;;  %vm861_vm4 = vcmp.gt.f32.partialorder %v2009_v20, 0.0 }
 0x1d0   : > { %1546 = vpow2.f32 %v925_v19  ;;  %v894_v30 = vmin.f32 %v2014_v26, 0.0  ;;  %v709_v31 = vpop.f32.mrb[4].mxu0  ;;  %v822_v32 = vpop.f32.mrb[4].mxu1  ;;  %v896_v10 = vmin.f32 %v2030_v50, 0.0  ;;  %vm863_vm5 = vcmp.gt.f32.partialorder %v2011_v21, 0.0 }
 0x1d1   : > { %1548 = vpow2.f32 %v923_v24  ;;  %v929_v33 = vmul.f32 1.442695, %v893_v28  ;;  %v711_v34 = vpop.f32.mrb[5].mxu0  ;;  %v824_v35 = vpop.f32.mrb[5].mxu1  ;;  %v933_v37 = vmul.f32 1.442695, %v895_v29  ;;  %v2019_v39 = vadd.f32 %v709_v31, %v579_v27 }
 0x1d2   : > { %v931_v38 = vmul.f32 1.442695, %v894_v30  ;;  %v2021_v40 = vadd.f32 %v822_v32, %v579_v27  ;;  %v2023_v41 = vadd.f32 %v711_v34, %v579_v27  ;;  %v2026_v43 = vadd.f32 %v824_v35, %v579_v27 }
 0x1d3   : > { %1550 = vpow2.f32 %v929_v33  ;;  %v897_v42 = vmin.f32 %v2019_v39, 0.0  ;;  %vm862_vm6 = vcmp.gt.f32.partialorder %v2014_v26, 0.0  ;;  %v935_v31 = vmul.f32 1.442695, %v896_v10 }
 0x1d4   : > { %1552 = vpow2.f32 %v933_v37  ;;  %v715_v44 = vpop.f32.mrb[6].mxu0  ;;  %v828_v45 = vpop.f32.mrb[6].mxu1  ;;  %v899_v46 = vmin.f32 %v2021_v40, 0.0  ;;  %v898_v52 = vmin.f32 %v2023_v41, 0.0  ;;  %v900_v55 = vmin.f32 %v2026_v43, 0.0 }
 0x1d5   : > { %1554 = vpow2.f32 %v931_v38  ;;  %v717_v47 = vpop.f32.mrb[7].mxu0  ;;  %v830_v48 = vpop.f32.mrb[7].mxu1  ;;  %v937_v51 = vmul.f32 1.442695, %v897_v42  ;;  %v2034_v56 = vadd.f32 %v715_v44, %v584_v49  ;;  %v2036_v57 = vadd.f32 %v828_v45, %v584_v49 }
 0x1d6   : > { %1556 = vpow2.f32 %v927_v36  ;;  %v941_v54 = vmul.f32 1.442695, %v899_v46  ;;  %v939_v58 = vmul.f32 1.442695, %v898_v52  ;;  %v2039_v59 = vadd.f32 %v717_v47, %v584_v49 }
 0x1d7   : > { %1558 = vpow2.f32 %v937_v51  ;;  %v943_v63 = vmul.f32 1.442695, %v900_v55  ;;  %v901_v0 = vmin.f32 %v2034_v56, 0.0  ;;  %v903_v5 = vmin.f32 %v2036_v57, 0.0 }
 0x1d8   : > { %v721_v60 = vpop.f32.mrb[8].mxu0  ;;  %v834_v61 = vpop.f32.mrb[8].mxu1  ;;  %1560 = vpow2.f32 %v941_v54  ;;  %v902_v16 = vmin.f32 %v2039_v59, 0.0  ;;  %v2087_v32 = vadd.f32 %v830_v48, %v584_v49  ;;  %vm865_vm7 = vcmp.gt.f32.partialorder %v2019_v39, 0.0 }
 0x1d9   : > { %v1545_v62 = vpop.eup %1544  ;;  %v2043_v1 = vpop.f32.mrb[9].mxu0  ;;  %1562 = vpow2.f32 %v939_v58  ;;  %v945_v13 = vmul.f32 1.442695, %v901_v0  ;;  %v949_v15 = vmul.f32 1.442695, %v903_v5  ;;  %v2090_v33 = vadd.f32 %v721_v60, %v2076_v25 }
 0x1da   : > { %v2045_v2 = vpop.f32.mrb[9].mxu1  ;;  %v1547_v3 = vpop.eup %1546  ;;  %v1431_v4 = vadd.f32 -1.0, %v1545_v62  ;;  %1564 = vpow2.f32 %v943_v63  ;;  %v947_v28 = vmul.f32 1.442695, %v902_v16  ;;  %v2100_v36 = vadd.f32 %v834_v61, %v2076_v25 }
 0x1db   : > { %v1549_v6 = vpop.eup %1548  ;;  %v1433_v9 = vadd.f32 -1.0, %v1547_v3  ;;  %1566 = vpow2.f32 %v945_v13  ;;  %vm867_vm8 = vcmp.gt.f32.partialorder %v2021_v40, 0.0  ;;  %vm866_vm9 = vcmp.gt.f32.partialorder %v2023_v41, 0.0 }
 0x1dc   : > { %v2053_v53 = vsel %vm857_vm1, %v1998_v7, %v1431_v4  ;;  %v1432_v14 = vadd.f32 -1.0, %v1549_v6  ;;  %v2056_v17 = vpop.f32.mrb[10].mxu0  ;;  %v2058_v18 = vpop.f32.mrb[10].mxu1  ;;  %1568 = vpow2.f32 %v949_v15  ;;  %vm868_vm10 = vcmp.gt.f32.partialorder %v2026_v43, 0.0 }
 0x1dd   : > { %v1551_v19 = vpop.eup %1550  ;;  %1049 = vst [vmem:[%s2061_s10] sm:$0xff] %v2053_v53  ;;  %v2068_v7 = vsel %vm859_vm2, %v2000_v8, %v1433_v9  ;;  %v2072_v22 = vpop.f32.mrb[11].mxu0  ;;  %1570 = vpow2.f32 %v947_v28  ;;  %v907_v47 = vmin.f32 %v2100_v36, 0.0  ;;  %vm869_vm11 = vcmp.gt.f32.partialorder %v2034_v56, 0.0 }
 0x1de   : > { %v2074_v23 = vpop.f32.mrb[11].mxu1  ;;  %v1553_v24 = vpop.eup %1552  ;;  %1051 = vst [vmem:[%s2061_s10 + $0x10] sm:$0xff] %v2068_v7  ;;  %v2083_v27 = vsel %vm858_vm3, %v2002_v11, %v1432_v14  ;;  %v1435_v8 = vadd.f32 -1.0, %v1551_v19  ;;  %v904_v51 = vmin.f32 %v2087_v32, 0.0  ;;  %v2136_v52 = vadd.f32 %v2043_v1, %v2076_v25 }
 0x1df   : > { %v1555_v29 = vpop.eup %1554  ;;  %1050 = vst [vmem:[%s2061_s10 + $0x8] sm:$0xff] %v2083_v27  ;;  %v1437_v30 = vadd.f32 -1.0, %v1553_v24  ;;  %1572 = vpow2.f32 %v935_v31  ;;  %v957_v58 = vmul.f32 1.442695, %v907_v47  ;;  %vm871_vm12 = vcmp.gt.f32.partialorder %v2036_v57, 0.0  ;;  %v594_v14 = vpop.permute.xlu1 %593 }
 0x1e0   : > { %v2092_v34 = vpop.eup %1556  ;;  %v2097_v11 = vsel %vm861_vm4, %v2009_v20, %v1435_v8  ;;  %v1436_v35 = vadd.f32 -1.0, %v1555_v29  ;;  %v2102_v37 = vpop.f32.mrb[12].mxu0  ;;  %v906_v0 = vmin.f32 %v2136_v52, 0.0  ;;  %vm870_vm13 = vcmp.gt.f32.partialorder %v2039_v59, 0.0 }
 0x1e1   : > { %v2104_v38 = vpop.f32.mrb[12].mxu1  ;;  %1053 = vst [vmem:[%s2061_s10 + $0x20] sm:$0xff] %v2097_v11  ;;  %v2111_v42 = vsel %vm863_vm5, %v2011_v21, %v1437_v30  ;;  %v2116_v20 = vpop.f32.mrb[13].mxu0  ;;  %v905_v21 = vmin.f32 %v2090_v33, 0.0  ;;  %v2163_v9 = vmul.f32 %v2053_v53, %v2053_v53  ;;  %v951_v19 = vmul.f32 1.442695, %v904_v51 }
 0x1e2   : > { %v2118_v44 = vpop.f32.mrb[13].mxu1  ;;  %v1559_v45 = vpop.eup %1558  ;;  %1055 = vst [vmem:[%s2061_s10 + $0x30] sm:$0xff] %v2111_v42  ;;  %v2125_v46 = vsel %vm862_vm6, %v2014_v26, %v1436_v35  ;;  %v2181_v24 = vadd.f32 %v2045_v2, %v2076_v25  ;;  %v2186_v8 = vadd.f32 %v2056_v17, %v594_v14  ;;  %v2189_v28 = vadd.f32 %v2058_v18, %v594_v14 }
 0x1e3   : > { %v1561_v48 = vpop.eup %1560  ;;  %1054 = vst [vmem:[%s2061_s10 + $0x28] sm:$0xff] %v2125_v46  ;;  %v1439_v49 = vadd.f32 -1.0, %v1559_v45  ;;  %v953_v55 = vmul.f32 1.442695, %v905_v21  ;;  %v2197_v2 = vmul.f32 %v2097_v11, %v2097_v11  ;;  %v2205_v17 = vadd.f32 %v2072_v22, %v594_v14  ;;  %v599_v47 = vpop.permute.xlu0 %598 }
 0x1e4   : > { %v1563_v26 = vpop.eup %1562  ;;  %v1441_v54 = vadd.f32 -1.0, %v1561_v48  ;;  %v2138_v60 = vpop.f32.mrb[14].mxu0  ;;  %vm873_vm14 = vcmp.gt.f32.partialorder %v2090_v33, 0.0  ;;  %v2216_v31 = vadd.f32 %v2074_v23, %v594_v14  ;;  %vm875_vm15 = vcmp.gt.f32.partialorder %v2100_v36, 0.0 }
 0x1e5   : > { %v1565_v61 = vpop.eup %1564  ;;  %v2143_v62 = vsel %vm865_vm7, %v2019_v39, %v1439_v49  ;;  %v1440_v63 = vadd.f32 -1.0, %v1563_v26  ;;  %v2147_v1 = vpop.f32.mrb[14].mxu1  ;;  %1574 = vpow2.f32 %v953_v55  ;;  %v909_v22 = vmin.f32 %v2186_v8, 0.0 }
 0x1e6   : > { %v2149_v3 = vpop.f32.mrb[15].mxu0  ;;  %1057 = vst [vmem:[%s2061_s10 + $0x40] sm:$0xff] %v2143_v62  ;;  %v2156_v4 = vsel %vm867_vm8, %v2021_v40, %v1441_v54  ;;  %v1442_v5 = vadd.f32 -1.0, %v1565_v61  ;;  %v2159_v39 = vpop.f32.mrb[15].mxu1  ;;  %1576 = vpow2.f32 %v957_v58  ;;  %v955_v40 = vmul.f32 1.442695, %v906_v0 }
 0x1e7   : > { %v1567_v6 = vpop.eup %1566  ;;  %1059 = vst [vmem:[%s2061_s10 + $0x50] sm:$0xff] %v2156_v4  ;;  %v2170_v10 = vsel %vm866_vm9, %v2023_v41, %v1440_v63  ;;  %v911_v35 = vmin.f32 %v2189_v28, 0.0  ;;  %v910_v23 = vmin.f32 %v2205_v17, 0.0  ;;  %v2238_v48 = vmul.f32 %v2143_v62, %v2143_v62 }
 0x1e8   : > { %v1569_v13 = vpop.eup %1568  ;;  %1058 = vst [vmem:[%s2061_s10 + $0x48] sm:$0xff] %v2170_v10  ;;  %v2177_v15 = vsel %vm868_vm10, %v2026_v43, %v1442_v5  ;;  %v1443_v16 = vadd.f32 -1.0, %v1567_v6  ;;  %1578 = vpow2.f32 %v955_v40  ;;  %v2193_v43 = vmul.f32 %v2083_v27, %v2083_v27  ;;  %v604_v6 = vpop.permute.xlu1 %603 }
 0x1e9   : > { %1060 = vst [vmem:[%s2061_s10 + $0x58] sm:$0xff] %v2177_v15  ;;  %v1445_v41 = vadd.f32 -1.0, %v1569_v13  ;;  %v1571_v29 = vpop.eup %1570  ;;  %1580 = vpow2.f32 %v951_v19  ;;  %vm874_vm0 = vcmp.gt.f32.partialorder %v2136_v52, 0.0  ;;  %v961_v49 = vmul.f32 1.442695, %v909_v22 }
 0x1ea   : > { %v2202_v25 = vsel %vm869_vm11, %v2034_v56, %v1443_v16  ;;  %v1444_v30 = vadd.f32 -1.0, %v1571_v29  ;;  %v908_v56 = vmin.f32 %v2181_v24, 0.0  ;;  %v2234_v21 = vpop.eup %1572  ;;  %v965_v51 = vmul.f32 1.442695, %v911_v35 }
 0x1eb   : > { %1061 = vst [vmem:[%s2061_s10 + $0x60] sm:$0xff] %v2202_v25  ;;  %v2212_v18 = vsel %vm871_vm12, %v2036_v57, %v1445_v41  ;;  %v2226_v57 = vmul.f32 %v2125_v46, %v2125_v46  ;;  %v963_v26 = vmul.f32 1.442695, %v910_v23  ;;  %v2245_v54 = vadd.f32 %v2102_v37, %v599_v47 }
 0x1ec   : > { %1063 = vst [vmem:[%s2061_s10 + $0x70] sm:$0xff] %v2212_v18  ;;  %v2231_v45 = vsel %vm870_vm13, %v2039_v59, %v1444_v30  ;;  %v912_v59 = vmin.f32 %v2216_v31, 0.0  ;;  %v2248_v55 = vadd.f32 %v2104_v38, %v599_v47  ;;  %v2252_v61 = vmul.f32 %v2170_v10, %v2170_v10 }
 0x1ed   : > { %1062 = vst [vmem:[%s2061_s10 + $0x68] sm:$0xff] %v2231_v45  ;;  %v959_v63 = vmul.f32 1.442695, %v908_v56  ;;  %1582 = vpow2.f32 %v961_v49  ;;  %v2255_v0 = vadd.f32 %v2116_v20, %v599_v47  ;;  %vm860_vm1 = vcmp.gt.f32.partialorder %v2004_v12, 0.0 }
 0x1ee   : > { %1584 = vpow2.f32 %v965_v51  ;;  %v913_v38 = vmin.f32 %v2245_v54, 0.0  ;;  %v2260_v40 = vadd.f32 %v2118_v44, %v599_v47  ;;  %v915_v14 = vmin.f32 %v2248_v55, 0.0 }
 0x1ef   : > { %v1575_v58 = vpop.eup %1574  ;;  %1586 = vpow2.f32 %v963_v26  ;;  %v2264_v20 = vadd.f32 %v2138_v60, %v604_v6  ;;  %v2268_v19 = vmul.f32 %v2202_v25, %v2202_v25  ;;  %v967_v44 = vmul.f32 1.442695, %v912_v59 }
 0x1f0   : > { %v1577_v5 = vpop.eup %1576  ;;  %v1447_v37 = vadd.f32 -1.0, %v1575_v58  ;;  %v969_v29 = vmul.f32 1.442695, %v913_v38  ;;  %1588 = vpow2.f32 %v959_v63  ;;  %vm877_vm2 = vcmp.gt.f32.partialorder %v2186_v8, 0.0 }
 0x1f1   : > { %v1449_v13 = vadd.f32 -1.0, %v1577_v5  ;;  %v973_v56 = vmul.f32 1.442695, %v915_v14  ;;  %vm879_vm3 = vcmp.gt.f32.partialorder %v2189_v28, 0.0  ;;  %v916_v22 = vmin.f32 %v2260_v40, 0.0 }
 0x1f2   : > { %v1579_v16 = vpop.eup %1578  ;;  %v2273_v41 = vsel %vm873_vm14, %v2090_v33, %v1447_v37  ;;  %1590 = vpow2.f32 %v969_v29  ;;  %v914_v33 = vmin.f32 %v2255_v0, 0.0  ;;  %v2290_v35 = vmul.f32 %v2231_v45, %v2231_v45 }
 0x1f3   : > { %1065 = vst [vmem:[%s2061_s10 + $0x80] sm:$0xff] %v2273_v41  ;;  %v2280_v30 = vsel %vm875_vm15, %v2100_v36, %v1449_v13  ;;  %v1448_v60 = vadd.f32 -1.0, %v1579_v16  ;;  %vm878_vm4 = vcmp.gt.f32.partialorder %v2205_v17, 0.0  ;;  %1592 = vpow2.f32 %v973_v56  ;;  %v2299_v47 = vpop.eup %1580 }
 0x1f4   : > { %1067 = vst [vmem:[%s2061_s10 + $0x90] sm:$0xff] %v2280_v30  ;;  %v917_v23 = vmin.f32 %v2264_v20, 0.0  ;;  %1594 = vpow2.f32 %v967_v44  ;;  %v971_v49 = vmul.f32 1.442695, %v914_v33  ;;  %v975_v51 = vmul.f32 1.442695, %v916_v22 }
 0x1f5   : > { %v2295_v36 = vsel %vm874_vm0, %v2136_v52, %v1448_v60  ;;  %v2304_v26 = vadd.f32 %v2147_v1, %v604_v6  ;;  %v1434_v58 = vadd.f32 -1.0, %v2092_v34  ;;  %v1081_v52 = vadd.f32 %v2083_v27, %v2053_v53 }
 0x1f6   : > { %1066 = vst [vmem:[%s2061_s10 + $0x88] sm:$0xff] %v2295_v36  ;;  %v977_v59 = vmul.f32 1.442695, %v917_v23  ;;  %v2310_v63 = vadd.f32 %v2149_v3, %v604_v6  ;;  %vm864_vm5 = vcmp.gt.f32.partialorder %v2030_v50, 0.0  ;;  %vm881_vm6 = vcmp.gt.f32.partialorder %v2245_v54, 0.0 }
 0x1f7   : > { %1596 = vpow2.f32 %v971_v49  ;;  %v919_v5 = vmin.f32 %v2304_v26, 0.0  ;;  %v2316_v1 = vadd.f32 %v2159_v39, %v604_v6  ;;  %v1583_v37 = vpop.eup %1582  ;;  %v2320_v34 = vmul.f32 %v2273_v41, %v2273_v41 }
 0x1f8   : > { %v2324_v53 = vmul.f32 %v2295_v36, %v2295_v36  ;;  %vm883_vm7 = vcmp.gt.f32.partialorder %v2248_v55, 0.0  ;;  %v1020_v27 = vsel %vm860_vm1, %v2004_v12, %v1434_v58  ;;  %v1082_v3 = vadd.f32 %v1081_v52, %v2068_v7  ;;  %v1585_v38 = vpop.eup %1584 }
 0x1f9   : > { %v1451_v39 = vadd.f32 -1.0, %v1583_v37  ;;  %1598 = vpow2.f32 %v977_v59  ;;  %v981_v6 = vmul.f32 1.442695, %v919_v5  ;;  %1052 = vst [vmem:[%s2061_s10 + $0x18] sm:$0xff] %v1020_v27  ;;  %v918_v13 = vmin.f32 %v2310_v63, 0.0  ;;  %v1587_v14 = vpop.eup %1586 }
 0x1fa   : > { %v1453_v16 = vadd.f32 -1.0, %v1585_v38  ;;  %1600 = vpow2.f32 %v975_v51  ;;  %v1083_v44 = vadd.f32 %v1082_v3, %v1020_v27  ;;  %v920_v29 = vmin.f32 %v2316_v1, 0.0  ;;  %v2340_v33 = vpop.eup %1588 }
 0x1fb   : > { %v2337_v12 = vsel %vm877_vm2, %v2186_v8, %v1451_v39  ;;  %v1452_v60 = vadd.f32 -1.0, %v1587_v14  ;;  %vm882_vm8 = vcmp.gt.f32.partialorder %v2255_v0, 0.0  ;;  %1602 = vpow2.f32 %v981_v6 }
 0x1fc   : > { %v979_v56 = vmul.f32 1.442695, %v918_v13  ;;  %vm872_vm9 = vcmp.gt.f32.partialorder %v2087_v32, 0.0  ;;  %1069 = vst [vmem:[%s2061_s10 + $0xa0] sm:$0xff] %v2337_v12  ;;  %v2347_v22 = vmul.f32 %v2337_v12, %v2337_v12  ;;  %v2352_v8 = vsel %vm879_vm3, %v2189_v28, %v1453_v16  ;;  %1084 = vadd.xlane.f32.xlu0 %v1083_v44  ;;  %v1591_v51 = vpop.eup %1590 }
 0x1fd   : > { %v983_v23 = vmul.f32 1.442695, %v920_v29  ;;  %v1132_v49 = vmul.f32 %v2068_v7, %v2068_v7  ;;  %1071 = vst [vmem:[%s2061_s10 + $0xb0] sm:$0xff] %v2352_v8  ;;  %v2361_v59 = vsel %vm878_vm4, %v2205_v17, %v1452_v60  ;;  %vm885_vm10 = vcmp.gt.f32.partialorder %v2264_v20, 0.0  ;;  %v1593_v52 = vpop.eup %1592 }
 0x1fe   : > { %1604 = vpow2.f32 %v979_v56  ;;  %v1133_v58 = vmul.f32 %v1020_v27, %v1020_v27  ;;  %v1162_v28 = vadd.f32 %v2193_v43, %v2163_v9  ;;  %1070 = vst [vmem:[%s2061_s10 + $0xa8] sm:$0xff] %v2361_v59  ;;  %v2370_v7 = vmul.f32 %v2361_v59, %v2361_v59  ;;  %v2373_v37 = vpop.eup %1594 }
 0x1ff   : > { %v1455_v5 = vadd.f32 -1.0, %v1591_v51  ;;  %1606 = vpow2.f32 %v983_v23  ;;  %v1438_v17 = vadd.f32 -1.0, %v2234_v21  ;;  %vm876_vm11 = vcmp.gt.f32.partialorder %v2181_v24, 0.0 }
 0x200   : > { %v1457_v27 = vadd.f32 -1.0, %v1593_v52  ;;  %vm887_vm12 = vcmp.gt.f32.partialorder %v2304_v26, 0.0  ;;  %v1163_v9 = vadd.f32 %v1162_v28, %v1132_v49  ;;  %v1086_v43 = vadd.f32 %v2125_v46, %v2097_v11 }
 0x201   : > { %v1136_v3 = vmul.f32 %v2111_v42, %v2111_v42  ;;  %v2384_v21 = vsel %vm881_vm6, %v2245_v54, %v1455_v5  ;;  %v1024_v38 = vsel %vm864_vm5, %v2030_v50, %v1438_v17  ;;  %v1167_v39 = vadd.f32 %v2226_v57, %v2197_v2  ;;  %v1597_v13 = vpop.eup %1596 }
 0x202   : > { %v1140_v6 = vmul.f32 %v2156_v4, %v2156_v4  ;;  %1073 = vst [vmem:[%s2061_s10 + $0xc0] sm:$0xff] %v2384_v21  ;;  %v2397_v11 = vmul.f32 %v2384_v21, %v2384_v21  ;;  %v2402_v46 = vsel %vm883_vm7, %v2248_v55, %v1457_v27  ;;  %vm886_vm13 = vcmp.gt.f32.partialorder %v2310_v63, 0.0  ;;  %1056 = vst [vmem:[%s2061_s10 + $0x38] sm:$0xff] %v1024_v38 }
 0x203   : > { %v1164_v50 = vadd.f32 %v1163_v9, %v1133_v58  ;;  %v1087_v2 = vadd.f32 %v1086_v43, %v2111_v42  ;;  %1075 = vst [vmem:[%s2061_s10 + $0xd0] sm:$0xff] %v2402_v46  ;;  %v1456_v57 = vadd.f32 -1.0, %v1597_v13  ;;  %v1137_v54 = vmul.f32 %v1024_v38, %v1024_v38  ;;  %v1599_v44 = vpop.eup %1598 }
 0x204   : > { %v1168_v14 = vadd.f32 %v1167_v39, %v1136_v3  ;;  %v1141_v16 = vmul.f32 %v2177_v15, %v2177_v15  ;;  %v1172_v55 = vadd.f32 %v2252_v61, %v2238_v48  ;;  %v1091_v60 = vadd.f32 %v2170_v10, %v2143_v62  ;;  %v1601_v56 = vpop.eup %1600 }
 0x205   : > { %1165 = vadd.xlane.f32.xlu1 %v1164_v50  ;;  %v1088_v29 = vadd.f32 %v1087_v2, %v1024_v38  ;;  %v1446_v42 = vadd.f32 -1.0, %v2299_v47  ;;  %vm880_vm14 = vcmp.gt.f32.partialorder %v2216_v31, 0.0  ;;  %v1042_v23 = vsel %vm882_vm8, %v2255_v0, %v1456_v57  ;;  %v1603_v48 = vpop.eup %1602 }
 0x206   : > { %v1459_v49 = vadd.f32 -1.0, %v1599_v44  ;;  %v1169_v51 = vadd.f32 %v1168_v14, %v1137_v54  ;;  %v1096_v58 = vadd.f32 %v2231_v45, %v2202_v25  ;;  %1074 = vst [vmem:[%s2061_s10 + $0xc8] sm:$0xff] %v1042_v23  ;;  %v1155_v61 = vmul.f32 %v1042_v23, %v1042_v23 }
 0x207   : > { %vm884_vm15 = vcmp.gt.f32.partialorder %v2260_v40, 0.0  ;;  %v1173_v62 = vadd.f32 %v1172_v55, %v1140_v6  ;;  %v1092_v10 = vadd.f32 %v1091_v60, %v2156_v4  ;;  %v1032_v47 = vsel %vm872_vm9, %v2087_v32, %v1446_v42 }
 0x208   : > { %v1045_v0 = vsel %vm885_vm10, %v2264_v20, %v1459_v49  ;;  %v1461_v28 = vadd.f32 -1.0, %v1603_v48  ;;  %1170 = vadd.xlane.f32.xlu0 %v1169_v51  ;;  %1064 = vst [vmem:[%s2061_s10 + $0x78] sm:$0xff] %v1032_v47  ;;  %v1097_v25 = vadd.f32 %v1096_v58, %v2212_v18  ;;  %v1450_v45 = vadd.f32 -1.0, %v2340_v33  ;;  %v1605_v52 = vpop.eup %1604 }
 0x209   : > { %1077 = vst [vmem:[%s2061_s10 + $0xe0] sm:$0xff] %v1045_v0  ;;  %v1158_v4 = vmul.f32 %v1045_v0, %v1045_v0  ;;  %1089 = vadd.xlane.f32.xlu1 %v1088_v29  ;;  %v1174_v5 = vadd.f32 %v1173_v62, %v1141_v16  ;;  %v1093_v32 = vadd.f32 %v1092_v10, %v2177_v15  ;;  %v1607_v20 = vpop.eup %1606  ;;  %v1460_v9 = vadd.f32 -1.0, %v1605_v52 }
 0x20a   : > { %v1101_v17 = vadd.f32 %v2295_v36, %v2273_v41  ;;  %v1047_v27 = vsel %vm887_vm12, %v2304_v26, %v1461_v28  ;;  %v1098_v43 = vadd.f32 %v1097_v25, %v1032_v47  ;;  %v1036_v33 = vsel %vm876_vm11, %v2181_v24, %v1450_v45 }
 0x20b   : > { %1079 = vst [vmem:[%s2061_s10 + $0xf0] sm:$0xff] %v1047_v27  ;;  %1068 = vst [vmem:[%s2061_s10 + $0x98] sm:$0xff] %v1036_v33  ;;  %v1144_v15 = vmul.f32 %v2212_v18, %v2212_v18  ;;  %v1145_v41 = vmul.f32 %v1032_v47, %v1032_v47  ;;  %v1177_v36 = vadd.f32 %v2290_v35, %v2268_v19  ;;  %v1454_v19 = vadd.f32 -1.0, %v2373_v37 }
 0x20c   : > { %v1102_v3 = vadd.f32 %v1101_v17, %v2280_v30  ;;  %v1046_v26 = vsel %vm886_vm13, %v2310_v63, %v1460_v9  ;;  %1094 = vadd.xlane.f32.xlu0 %v1093_v32  ;;  %v1148_v38 = vmul.f32 %v2280_v30, %v2280_v30  ;;  %v1149_v24 = vmul.f32 %v1036_v33, %v1036_v33  ;;  %v1240_v9 = vld [vmem:[%s2061_s10 + $0x8] sm:$0xff] (%p2623_p11) }
 0x20d   : > { %v1182_v39 = vadd.f32 %v2324_v53, %v2320_v34  ;;  %1078 = vst [vmem:[%s2061_s10 + $0xe8] sm:$0xff] %v1046_v26  ;;  %v1159_v6 = vmul.f32 %v1046_v26, %v1046_v26  ;;  %1175 = vadd.xlane.f32.xlu1 %v1174_v5  ;;  %v1178_v13 = vadd.f32 %v1177_v36, %v1144_v15  ;;  %v1458_v50 = vadd.f32 -1.0, %v1601_v56  ;;  %v1248_v15 = vld [vmem:[%s2061_s10 + $0x28] sm:$0xff] (%p2623_p11)  ;;  %v1252_v36 = vld [vmem:[%s2061_s10 + $0x38] sm:$0xff] (%p2623_p11) }
 0x20e   : > { %v1103_v18 = vadd.f32 %v1102_v3, %v1036_v33  ;;  %v1106_v63 = vadd.f32 %v2361_v59, %v2337_v12  ;;  %v1111_v30 = vadd.f32 %v1042_v23, %v2384_v21  ;;  %v1040_v34 = vsel %vm880_vm14, %v2216_v31, %v1454_v19  ;;  %v1244_v33 = vld [vmem:[%s2061_s10 + $0x18] sm:$0xff] (%p2623_p11)  ;;  %v1246_v3 = vld [vmem:[%s2061_s10 + $0x20] sm:$0xff] (%p2623_p11)  ;;  %1241 = vst [vmem:[%s2533_s21 + $0x8] sm:$0xff] (%p2623_p11), %v1240_v9 }
 0x20f   : > { %v1183_v35 = vadd.f32 %v1182_v39, %v1148_v38  ;;  %v1179_v2 = vadd.f32 %v1178_v13, %v1145_v41  ;;  %v1152_v53 = vmul.f32 %v2352_v8, %v2352_v8  ;;  %v1187_v57 = vadd.f32 %v2370_v7, %v2347_v22  ;;  %1072 = vst [vmem:[%s2061_s10 + $0xb8] sm:$0xff] %v1040_v34  ;;  %v1250_v41 = vld [vmem:[%s2061_s10 + $0x30] sm:$0xff] (%p2623_p11)  ;;  %v1256_v38 = vld [vmem:[%s2061_s10 + $0x48] sm:$0xff] (%p2623_p11)  ;;  %v1260_v39 = vld [vmem:[%s2061_s10 + $0x58] sm:$0xff] (%p2623_p11) }
 0x210   : > { %1099 = vadd.xlane.f32.xlu0 %v1098_v43  ;;  %v1107_v54 = vadd.f32 %v1106_v63, %v2352_v8  ;;  %v1044_v12 = vsel %vm884_vm15, %v2260_v40, %v1458_v50  ;;  %v1112_v59 = vadd.f32 %v1111_v30, %v2402_v46  ;;  %vm888_vm0 = vcmp.gt.f32.partialorder %v2316_v1, 0.0  ;;  %v1242_v43 = vld [vmem:[%s2061_s10 + $0x10] sm:$0xff] (%p2623_p11)  ;;  %1245 = vst [vmem:[%s2533_s21 + $0x18] sm:$0xff] (%p2623_p11), %v1244_v33  ;;  %v1268_v19 = vld [vmem:[%s2061_s10 + $0x78] sm:$0xff] (%p2623_p11)  ;;  %v1272_v63 = vld [vmem:[%s2061_s10 + $0x88] sm:$0xff] (%p2623_p11) }
 0x211   : > { %v1184_v37 = vadd.f32 %v1183_v35, %v1149_v24  ;;  %1104 = vadd.xlane.f32.xlu1 %v1103_v18  ;;  %1076 = vst [vmem:[%s2061_s10 + $0xd8] sm:$0xff] %v1044_v12  ;;  %v1153_v31 = vmul.f32 %v1040_v34, %v1040_v34  ;;  %v1188_v21 = vadd.f32 %v1187_v57, %v1152_v53  ;;  %v1462_v16 = vadd.f32 -1.0, %v1607_v20  ;;  %v1258_v24 = vld [vmem:[%s2061_s10 + $0x50] sm:$0xff] (%p2623_p11)  ;;  %v1264_v18 = vld [vmem:[%s2061_s10 + $0x68] sm:$0xff] (%p2623_p11)  ;;  %v1270_v35 = vld [vmem:[%s2061_s10 + $0x80] sm:$0xff] (%p2623_p11) }
 0x212   : > { %v1156_v22 = vmul.f32 %v2402_v46, %v2402_v46  ;;  %v1108_v7 = vadd.f32 %v1107_v54, %v1040_v34  ;;  %v1113_v14 = vadd.f32 %v1112_v59, %v1044_v12  ;;  %v1192_v8 = vadd.f32 %v1155_v61, %v2397_v11  ;;  %1243 = vst [vmem:[%s2533_s21 + $0x10] sm:$0xff] (%p2623_p11), %v1242_v43  ;;  %v1266_v13 = vld [vmem:[%s2061_s10 + $0x70] sm:$0xff] (%p2623_p11)  ;;  %v1276_v30 = vld [vmem:[%s2061_s10 + $0x98] sm:$0xff] (%p2623_p11)  ;;  %v1280_v34 = vld [vmem:[%s2061_s10 + $0xa8] sm:$0xff] (%p2623_p11) }
 0x213   : > { %v1189_v44 = vadd.f32 %v1188_v21, %v1153_v31  ;;  %v1116_v29 = vadd.f32 %v1046_v26, %v1045_v0  ;;  %v1160_v40 = vmul.f32 %v1047_v27, %v1047_v27  ;;  %v1197_v55 = vadd.f32 %v1159_v6, %v1158_v4  ;;  %1247 = vst [vmem:[%s2533_s21 + $0x80] sm:$0xff] (%p2623_p11), %v1246_v3  ;;  %v1254_v26 = vld [vmem:[%s2061_s10 + $0x40] sm:$0xff] (%p2623_p11)  ;;  %v1274_v50 = vld [vmem:[%s2061_s10 + $0x90] sm:$0xff] (%p2623_p11)  ;;  %v1288_v54 = vld [vmem:[%s2061_s10 + $0xc8] sm:$0xff] (%p2623_p11) }
 0x214   : > { %1180 = vadd.xlane.f32.xlu0 %v1179_v2  ;;  %v1157_v60 = vmul.f32 %v1044_v12, %v1044_v12  ;;  %v1193_v42 = vadd.f32 %v1192_v8, %v1156_v22  ;;  %v1048_v56 = vsel %vm888_vm0, %v2316_v1, %v1462_v16  ;;  %vm1121_vm1 = vcmask 7168   ;;  %1249 = vst [vmem:[%s2533_s21 + $0x88] sm:$0xff] (%p2623_p11), %v1248_v15  ;;  %1251 = vst [vmem:[%s2533_s21 + $0x90] sm:$0xff] (%p2623_p11), %v1250_v41  ;;  %v1262_v6 = vld [vmem:[%s2061_s10 + $0x60] sm:$0xff] (%p2623_p11)  ;;  %v1282_v53 = vld [vmem:[%s2061_s10 + $0xb0] sm:$0xff] (%p2623_p11) }
 0x215   : > { %1185 = vadd.xlane.f32.xlu1 %v1184_v37  ;;  %1080 = vst [vmem:[%s2061_s10 + $0xf8] sm:$0xff] %v1048_v56  ;;  %v1117_v46 = vadd.f32 %v1116_v29, %v1047_v27  ;;  %v1161_v23 = vmul.f32 %v1048_v56, %v1048_v56  ;;  %v1198_v49 = vadd.f32 %v1197_v55, %v1160_v40  ;;  %vm1202_vm2 = vcmask 15368   ;;  %v1238_v27 = vld [vmem:[%s2061_s10] sm:$0xff] (%p2623_p11)  ;;  %1253 = vst [vmem:[%s2533_s21 + $0x98] sm:$0xff] (%p2623_p11), %v1252_v36  ;;  %v1290_v12 = vld [vmem:[%s2061_s10 + $0xd0] sm:$0xff] (%p2623_p11) }
 0x216   : > { %v1194_v11 = vadd.f32 %v1193_v42, %v1157_v60  ;;  %1239 = vst [vmem:[%s2533_s21] sm:$0xff] (%p2623_p11), %v1238_v27  ;;  %1255 = vst [vmem:[%s2533_s21 + $0x100] sm:$0xff] (%p2623_p11), %v1254_v26  ;;  %v1278_v2 = vld [vmem:[%s2061_s10 + $0xa0] sm:$0xff] (%p2623_p11)  ;;  %v1284_v57 = vld [vmem:[%s2061_s10 + $0xb8] sm:$0xff] (%p2623_p11) }
 0x217   : > { %v1118_v51 = vadd.f32 %v1117_v46, %v1048_v56  ;;  %v1199_v58 = vadd.f32 %v1198_v49, %v1161_v23  ;;  %1257 = vst [vmem:[%s2533_s21 + $0x108] sm:$0xff] (%p2623_p11), %v1256_v38  ;;  %1259 = vst [vmem:[%s2533_s21 + $0x110] sm:$0xff] (%p2623_p11), %v1258_v24  ;;  %v1286_v37 = vld [vmem:[%s2061_s10 + $0xc0] sm:$0xff] (%p2623_p11)  ;;  %v1296_v21 = vld [vmem:[%s2061_s10 + $0xe8] sm:$0xff] (%p2623_p11) }
 0x218   : > { %1109 = vadd.xlane.f32.xlu0 %v1108_v7  ;;  %1261 = vst [vmem:[%s2533_s21 + $0x118] sm:$0xff] (%p2623_p11), %v1260_v39  ;;  %1263 = vst [vmem:[%s2533_s21 + $0x180] sm:$0xff] (%p2623_p11), %v1262_v6  ;;  %v1292_v59 = vld [vmem:[%s2061_s10 + $0xd8] sm:$0xff] (%p2623_p11)  ;;  %v1294_v31 = vld [vmem:[%s2061_s10 + $0xe0] sm:$0xff] (%p2623_p11) }
 0x219   : > { %1114 = vadd.xlane.f32.xlu1 %v1113_v14  ;;  %1265 = vst [vmem:[%s2533_s21 + $0x188] sm:$0xff] (%p2623_p11), %v1264_v18  ;;  %1267 = vst [vmem:[%s2533_s21 + $0x190] sm:$0xff] (%p2623_p11), %v1266_v13  ;;  %v1298_v22 = vld [vmem:[%s2061_s10 + $0xf0] sm:$0xff] (%p2623_p11) }
 0x21a   : > { %1269 = vst [vmem:[%s2533_s21 + $0x198] sm:$0xff] (%p2623_p11), %v1268_v19  ;;  %1271 = vst [vmem:[%s2533_s21 + $0x200] sm:$0xff] (%p2623_p11), %v1270_v35 }
 0x21b   : > { %1273 = vst [vmem:[%s2533_s21 + $0x208] sm:$0xff] (%p2623_p11), %v1272_v63  ;;  %1275 = vst [vmem:[%s2533_s21 + $0x210] sm:$0xff] (%p2623_p11), %v1274_v50 }
 0x21c   : > { %1190 = vadd.xlane.f32.xlu0 %v1189_v44  ;;  %1277 = vst [vmem:[%s2533_s21 + $0x218] sm:$0xff] (%p2623_p11), %v1276_v30  ;;  %1279 = vst [vmem:[%s2533_s21 + $0x280] sm:$0xff] (%p2623_p11), %v1278_v2  ;;  %v1300_v7 = vld [vmem:[%s2061_s10 + $0xf8] sm:$0xff] (%p2623_p11) }
 0x21d   : > { %1195 = vadd.xlane.f32.xlu1 %v1194_v11  ;;  %1281 = vst [vmem:[%s2533_s21 + $0x288] sm:$0xff] (%p2623_p11), %v1280_v34  ;;  %1283 = vst [vmem:[%s2533_s21 + $0x290] sm:$0xff] (%p2623_p11), %v1282_v53 }
 0x21e   : > { %1285 = vst [vmem:[%s2533_s21 + $0x298] sm:$0xff] (%p2623_p11), %v1284_v57  ;;  %1287 = vst [vmem:[%s2533_s21 + $0x300] sm:$0xff] (%p2623_p11), %v1286_v37 }
 0x21f   : > { %1289 = vst [vmem:[%s2533_s21 + $0x308] sm:$0xff] (%p2623_p11), %v1288_v54  ;;  %1291 = vst [vmem:[%s2533_s21 + $0x310] sm:$0xff] (%p2623_p11), %v1290_v12 }
 0x220   : > { %1119 = vadd.xlane.f32.xlu0 %v1118_v51  ;;  %1293 = vst [vmem:[%s2533_s21 + $0x318] sm:$0xff] (%p2623_p11), %v1292_v59  ;;  %1295 = vst [vmem:[%s2533_s21 + $0x380] sm:$0xff] (%p2623_p11), %v1294_v31 }
 0x221   : > { %1297 = vst [vmem:[%s2533_s21 + $0x388] sm:$0xff] (%p2623_p11), %v1296_v21  ;;  %1299 = vst [vmem:[%s2533_s21 + $0x390] sm:$0xff] (%p2623_p11), %v1298_v22 }
 0x222   : > { %1301 = vst [vmem:[%s2533_s21 + $0x398] sm:$0xff] (%p2623_p11), %v1300_v7 }
 0x224   : > { %1200 = vadd.xlane.f32.xlu0 %v1199_v58 }
 0x289   : > { %v1085_v1 = vpop.xlane.xlu0 %1084 }
 0x28a   : > { %1122 = vst.msk [vmem:[%s2490_s16] sm:$0xff] %vm1121_vm1, %v1085_v1 }
 0x292   : > { %v1166_v48 = vpop.xlane.xlu1 %1165 }
 0x293   : > { %1203 = vst.msk [vmem:[%s2490_s16] sm:$0xff] %vm1202_vm2, %v1166_v48 }
 0x295   : > { %v1171_v61 = vpop.xlane.xlu0 %1170 }
 0x296   : > { %v1090_v62 = vpop.xlane.xlu1 %1089 }
 0x297   : > { %1123 = vst.msk [vmem:[%s2490_s16 + $0x8] sm:$0xff] %vm1121_vm1, %v1090_v62 }
 0x298   : > { %1204 = vst.msk [vmem:[%s2490_s16 + $0x8] sm:$0xff] %vm1202_vm2, %v1171_v61 }
 0x299   : > { %v1095_v10 = vpop.xlane.xlu0 %1094 }
 0x29a   : > { %v1176_v47 = vpop.xlane.xlu1 %1175  ;;  %1124 = vst.msk [vmem:[%s2490_s16 + $0x10] sm:$0xff] %vm1121_vm1, %v1095_v10 }
 0x29b   : > { %1205 = vst.msk [vmem:[%s2490_s16 + $0x10] sm:$0xff] %vm1202_vm2, %v1176_v47 }
 0x29d   : > { %v1100_v0 = vpop.xlane.xlu0 %1099 }
 0x29e   : > { %1125 = vst.msk [vmem:[%s2490_s16 + $0x18] sm:$0xff] %vm1121_vm1, %v1100_v0  ;;  %v1105_v28 = vpop.xlane.xlu1 %1104 }
 0x29f   : > { %1126 = vst.msk [vmem:[%s2490_s16 + $0x20] sm:$0xff] %vm1121_vm1, %v1105_v28 }
 0x2a1   : > { %v1181_v25 = vpop.xlane.xlu0 %1180 }
 0x2a2   : > { %1206 = vst.msk [vmem:[%s2490_s16 + $0x18] sm:$0xff] %vm1202_vm2, %v1181_v25  ;;  %v1186_v45 = vpop.xlane.xlu1 %1185 }
 0x2a3   : > { %1207 = vst.msk [vmem:[%s2490_s16 + $0x20] sm:$0xff] %vm1202_vm2, %v1186_v45 }
 0x2a5   : > { %v1110_v52 = vpop.xlane.xlu0 %1109 }
 0x2a6   : > { %1127 = vst.msk [vmem:[%s2490_s16 + $0x28] sm:$0xff] %vm1121_vm1, %v1110_v52  ;;  %v1115_v4 = vpop.xlane.xlu1 %1114 }
 0x2a7   : > { %1128 = vst.msk [vmem:[%s2490_s16 + $0x30] sm:$0xff] %vm1121_vm1, %v1115_v4 }
 0x2a9   : > { %v1191_v5 = vpop.xlane.xlu0 %1190 }
 0x2aa   : > { %1208 = vst.msk [vmem:[%s2490_s16 + $0x28] sm:$0xff] %vm1202_vm2, %v1191_v5  ;;  %v1196_v32 = vpop.xlane.xlu1 %1195 }
 0x2ab   : > { %1209 = vst.msk [vmem:[%s2490_s16 + $0x30] sm:$0xff] %vm1202_vm2, %v1196_v32 }
 0x2ac   : > { %1222 = sbr.rel (!%p2623_p11) target bundleno = 691 (0x2b3), region = 71 }
 0x2ad   : > { %v1120_v17 = vpop.xlane.xlu0 %1119 }
 0x2ae   : > { %1129 = vst.msk [vmem:[%s2490_s16 + $0x38] sm:$0xff] %vm1121_vm1, %v1120_v17 }
 0x2b1   : > { %v1201_v20 = vpop.xlane.xlu0 %1200 }
 0x2b2   : > { %1210 = vst.msk [vmem:[%s2490_s16 + $0x38] sm:$0xff] %vm1202_vm2, %v1201_v20 }
 0x2b3 PF: > { %p15_p13 = scmp.ge.s32.totalorder %s1723_s25, 6   ;;  %s2624_s21 = smov %s1658_s22 }
 0x2b4   : > { %s2625_s22 = smov %s1733_s28  ;;  %s2626_s23 = smov %s1723_s25 }
 0x2b5   :  { %17 = sbr.rel (!%p15_p13) target bundleno = 2 (0x2), region = 138 }
 0x2bc   :  { %1328 = vsyncpa [#allocation4], 1 }
 0x2bd   :  { %1330 = vsyncpa [#allocation4 + $0x1], 1 }

// kernel: xconv_forward.5
= control target key start
LH: loop header
LB: loop body
LE: loop exit
PB: predicated region body
PF: predicated region fallthrough
CT: control target
= control target key end

     0   :  { %s1728_s21 = smov 0   ;;  %s1730_s22 = smov 0   ;;  %s2273_s0 = inlined_call_operand.vmem [shape: f32[64,2048], index: 0, kind: input, shape index: {}]   ;;  %s2274_s1 = inlined_call_operand.vmem [shape: f32[128,2048], index: 1, kind: input, shape index: {}]   ;;  %s2275_s2 = inlined_call_operand.vmem [shape: f32[128,64], index: 2, kind: input, shape index: {}]   ;;  %s2276_s3 = inlined_call_operand.vmem [shape: f32[16,128], index: 3, kind: input, shape index: {}]   ;;  %s2277_s4 = inlined_call_operand.vmem [shape: f32[16,1], index: 4, kind: input, shape index: {}]   ;;  %s2278_s5 = inlined_call_operand.vmem [shape: f32[16,2048], index: 5, kind: output, shape index: {0}]   ;;  %s2279_s6 = inlined_call_operand.vmem [shape: f32[4,16,2], index: 6, kind: output, shape index: {1}]  }
   0x1   :  { %s1732_s23 = smov 0  }
   0x2 LB: > { %s1744_s24 = sadd.s32 4294967295, %s1689_s23   ;;  %s1747_s25 = sadd.s32 1, %s1689_s23   ;;  %s1689_s23 = sphi %s1732_s23, %s2284_s23   ;;  %s1685_s22 = sphi %s1730_s22, %s2283_s22   ;;  %s1681_s21 = sphi %s1728_s21, %s2282_s21  }
   0x3   : > { %s21_s26 = ssub.s32 %s1689_s23, %s1747_s25  ;;  %s24_s27 = sadd.s32 1, %s1685_s22 }
   0x4   : > { %p22_p0 = scmp.eq.s32.totalorder %s21_s26, 0  ;;  %p31_p1 = scmp.ne.s32.totalorder %s1685_s22, %s1681_s21 }
   0x5   : > { %p32_p2 = scmp.eq.s32.totalorder %s1689_s23, 0  ;;  %p150_p3 = scmp.eq.s32.totalorder %s1744_s24, 3 }
   0x6   : > { %s1757_s28 = scalar_select %p22_p0, %s1685_s22, %s24_s27  }
   0x7   : > { %p1759_p4 = por %p32_p2, %p31_p1  ;;  %p1763_p5 = por %p150_p3, %p31_p1 }
   0x8   : > { %p1466_p6 = scmp.ge.s32.totalorder %s1689_s23, 4 }
   0xa   : > { %207 = sbr.rel (%p1466_p6) target bundleno = 73 (0x49), region = 28 }
  0x11   : > { %210 = sbr.rel (!%p1759_p4) target bundleno = 37 (0x25), region = 32  ;;  %s212_s7 = sand.u32 (%p1759_p4), 1, %s1685_s22  }
  0x12   : > { %s1524_s8 = sshll.u32 (%p1759_p4), %s1689_s23, 5  ;;  %s1467_s9 = sshll.u32 (%p1759_p4), %s212_s7, 8 }
  0x13   : > { %s1775_s12 = scalar_lea.vmem (%p1759_p4), %s2273_s0, %s1524_s8  ;;  %s1780_s13 = scalar_lea.vmem (%p1759_p4), [#allocation2], %s1467_s9 }
  0x14   : > { %v230_v0 = vld [vmem:[%s1775_s12] sm:$0xff] (%p1759_p4)  ;;  %v232_v1 = vld [vmem:[%s1775_s12 + $0x8] sm:$0xff] (%p1759_p4)  ;;  %v234_v2 = vld [vmem:[%s1775_s12 + $0x10] sm:$0xff] (%p1759_p4) }
  0x15   : > { %231 = vst [vmem:[%s1780_s13] sm:$0xff] (%p1759_p4), %v230_v0  ;;  %233 = vst [vmem:[%s1780_s13 + $0x8] sm:$0xff] (%p1759_p4), %v232_v1  ;;  %v236_v3 = vld [vmem:[%s1775_s12 + $0x18] sm:$0xff] (%p1759_p4)  ;;  %v238_v4 = vld [vmem:[%s1775_s12 + $0x80] sm:$0xff] (%p1759_p4) }
  0x16   : > { %235 = vst [vmem:[%s1780_s13 + $0x10] sm:$0xff] (%p1759_p4), %v234_v2  ;;  %v240_v5 = vld [vmem:[%s1775_s12 + $0x88] sm:$0xff] (%p1759_p4)  ;;  %237 = vst [vmem:[%s1780_s13 + $0x18] sm:$0xff] (%p1759_p4), %v236_v3  ;;  %v242_v6 = vld [vmem:[%s1775_s12 + $0x90] sm:$0xff] (%p1759_p4) }
  0x17   : > { %239 = vst [vmem:[%s1780_s13 + $0x20] sm:$0xff] (%p1759_p4), %v238_v4  ;;  %241 = vst [vmem:[%s1780_s13 + $0x28] sm:$0xff] (%p1759_p4), %v240_v5  ;;  %v244_v7 = vld [vmem:[%s1775_s12 + $0x98] sm:$0xff] (%p1759_p4)  ;;  %v246_v8 = vld [vmem:[%s1775_s12 + $0x100] sm:$0xff] (%p1759_p4) }
  0x18   : > { %243 = vst [vmem:[%s1780_s13 + $0x30] sm:$0xff] %v242_v6  ;;  %245 = vst [vmem:[%s1780_s13 + $0x38] sm:$0xff] %v244_v7  ;;  %v248_v9 = vld [vmem:[%s1775_s12 + $0x108] sm:$0xff]  ;;  %v250_v10 = vld [vmem:[%s1775_s12 + $0x110] sm:$0xff] }
  0x19   : > { %247 = vst [vmem:[%s1780_s13 + $0x40] sm:$0xff] %v246_v8  ;;  %v252_v11 = vld [vmem:[%s1775_s12 + $0x118] sm:$0xff]  ;;  %249 = vst [vmem:[%s1780_s13 + $0x48] sm:$0xff] %v248_v9  ;;  %v254_v12 = vld [vmem:[%s1775_s12 + $0x180] sm:$0xff] }
  0x1a   : > { %251 = vst [vmem:[%s1780_s13 + $0x50] sm:$0xff] %v250_v10  ;;  %253 = vst [vmem:[%s1780_s13 + $0x58] sm:$0xff] %v252_v11  ;;  %v256_v13 = vld [vmem:[%s1775_s12 + $0x188] sm:$0xff]  ;;  %v258_v14 = vld [vmem:[%s1775_s12 + $0x190] sm:$0xff] }
  0x1b   : > { %255 = vst [vmem:[%s1780_s13 + $0x60] sm:$0xff] %v254_v12  ;;  %257 = vst [vmem:[%s1780_s13 + $0x68] sm:$0xff] %v256_v13  ;;  %v260_v15 = vld [vmem:[%s1775_s12 + $0x198] sm:$0xff]  ;;  %v262_v16 = vld [vmem:[%s1775_s12 + $0x200] sm:$0xff] }
  0x1c   : > { %259 = vst [vmem:[%s1780_s13 + $0x70] sm:$0xff] %v258_v14  ;;  %v264_v17 = vld [vmem:[%s1775_s12 + $0x208] sm:$0xff]  ;;  %261 = vst [vmem:[%s1780_s13 + $0x78] sm:$0xff] %v260_v15  ;;  %v266_v18 = vld [vmem:[%s1775_s12 + $0x210] sm:$0xff] }
  0x1d   : > { %263 = vst [vmem:[%s1780_s13 + $0x80] sm:$0xff] %v262_v16  ;;  %265 = vst [vmem:[%s1780_s13 + $0x88] sm:$0xff] %v264_v17  ;;  %v268_v19 = vld [vmem:[%s1775_s12 + $0x218] sm:$0xff]  ;;  %v270_v20 = vld [vmem:[%s1775_s12 + $0x280] sm:$0xff] }
  0x1e   : > { %267 = vst [vmem:[%s1780_s13 + $0x90] sm:$0xff] %v266_v18  ;;  %269 = vst [vmem:[%s1780_s13 + $0x98] sm:$0xff] %v268_v19  ;;  %v272_v21 = vld [vmem:[%s1775_s12 + $0x288] sm:$0xff]  ;;  %v274_v22 = vld [vmem:[%s1775_s12 + $0x290] sm:$0xff] }
  0x1f   : > { %271 = vst [vmem:[%s1780_s13 + $0xa0] sm:$0xff] %v270_v20  ;;  %v276_v23 = vld [vmem:[%s1775_s12 + $0x298] sm:$0xff]  ;;  %273 = vst [vmem:[%s1780_s13 + $0xa8] sm:$0xff] %v272_v21  ;;  %v278_v24 = vld [vmem:[%s1775_s12 + $0x300] sm:$0xff] }
  0x20   : > { %275 = vst [vmem:[%s1780_s13 + $0xb0] sm:$0xff] %v274_v22  ;;  %277 = vst [vmem:[%s1780_s13 + $0xb8] sm:$0xff] %v276_v23  ;;  %v280_v25 = vld [vmem:[%s1775_s12 + $0x308] sm:$0xff]  ;;  %v282_v26 = vld [vmem:[%s1775_s12 + $0x310] sm:$0xff] }
  0x21   : > { %279 = vst [vmem:[%s1780_s13 + $0xc0] sm:$0xff] %v278_v24  ;;  %281 = vst [vmem:[%s1780_s13 + $0xc8] sm:$0xff] %v280_v25  ;;  %v284_v27 = vld [vmem:[%s1775_s12 + $0x318] sm:$0xff]  ;;  %v286_v28 = vld [vmem:[%s1775_s12 + $0x380] sm:$0xff] }
  0x22   : > { %283 = vst [vmem:[%s1780_s13 + $0xd0] sm:$0xff] %v282_v26  ;;  %v288_v29 = vld [vmem:[%s1775_s12 + $0x388] sm:$0xff]  ;;  %285 = vst [vmem:[%s1780_s13 + $0xd8] sm:$0xff] %v284_v27  ;;  %v290_v30 = vld [vmem:[%s1775_s12 + $0x390] sm:$0xff] }
  0x23   : > { %287 = vst [vmem:[%s1780_s13 + $0xe0] sm:$0xff] %v286_v28  ;;  %289 = vst [vmem:[%s1780_s13 + $0xe8] sm:$0xff] %v288_v29  ;;  %v292_v31 = vld [vmem:[%s1775_s12 + $0x398] sm:$0xff] }
  0x24   : > { %291 = vst [vmem:[%s1780_s13 + $0xf0] sm:$0xff] %v290_v30  ;;  %293 = vst [vmem:[%s1780_s13 + $0xf8] sm:$0xff] %v292_v31 }
  0x25 PF: > { %299 = sbr.rel (!%p1759_p4) target bundleno = 73 (0x49), region = 55  ;;  %s301_s14 = sand.u32 (%p1759_p4), 1, %s1685_s22  }
  0x26   : > { %s1525_s15 = sshll.u32 (%p1759_p4), %s1689_s23, 5  ;;  %s1470_s16 = sshll.u32 (%p1759_p4), %s301_s14, 9 }
  0x27   : > { %s1850_s19 = scalar_lea.vmem (%p1759_p4), %s2274_s1, %s1525_s15  ;;  %s1855_s20 = scalar_lea.vmem (%p1759_p4), [#allocation3], %s1470_s16 }
  0x28   : > { %v319_v32 = vld [vmem:[%s1850_s19] sm:$0xff] (%p1759_p4)  ;;  %v321_v33 = vld [vmem:[%s1850_s19 + $0x8] sm:$0xff] (%p1759_p4)  ;;  %v323_v34 = vld [vmem:[%s1850_s19 + $0x10] sm:$0xff] (%p1759_p4) }
  0x29   : > { %320 = vst [vmem:[%s1855_s20] sm:$0xff] (%p1759_p4), %v319_v32  ;;  %322 = vst [vmem:[%s1855_s20 + $0x8] sm:$0xff] (%p1759_p4), %v321_v33  ;;  %v325_v35 = vld [vmem:[%s1850_s19 + $0x18] sm:$0xff] (%p1759_p4)  ;;  %v327_v36 = vld [vmem:[%s1850_s19 + $0x80] sm:$0xff] (%p1759_p4) }
  0x2a   : > { %324 = vst [vmem:[%s1855_s20 + $0x10] sm:$0xff] (%p1759_p4), %v323_v34  ;;  %v329_v37 = vld [vmem:[%s1850_s19 + $0x88] sm:$0xff] (%p1759_p4)  ;;  %326 = vst [vmem:[%s1855_s20 + $0x18] sm:$0xff] (%p1759_p4), %v325_v35  ;;  %v331_v38 = vld [vmem:[%s1850_s19 + $0x90] sm:$0xff] (%p1759_p4) }
  0x2b   : > { %328 = vst [vmem:[%s1855_s20 + $0x20] sm:$0xff] (%p1759_p4), %v327_v36  ;;  %330 = vst [vmem:[%s1855_s20 + $0x28] sm:$0xff] (%p1759_p4), %v329_v37  ;;  %v333_v39 = vld [vmem:[%s1850_s19 + $0x98] sm:$0xff] (%p1759_p4)  ;;  %v335_v40 = vld [vmem:[%s1850_s19 + $0x100] sm:$0xff] (%p1759_p4) }
  0x2c   : > { %332 = vst [vmem:[%s1855_s20 + $0x30] sm:$0xff] %v331_v38  ;;  %334 = vst [vmem:[%s1855_s20 + $0x38] sm:$0xff] %v333_v39  ;;  %v337_v41 = vld [vmem:[%s1850_s19 + $0x108] sm:$0xff]  ;;  %v339_v42 = vld [vmem:[%s1850_s19 + $0x110] sm:$0xff] }
  0x2d   : > { %336 = vst [vmem:[%s1855_s20 + $0x40] sm:$0xff] %v335_v40  ;;  %v341_v43 = vld [vmem:[%s1850_s19 + $0x118] sm:$0xff]  ;;  %338 = vst [vmem:[%s1855_s20 + $0x48] sm:$0xff] %v337_v41  ;;  %v343_v44 = vld [vmem:[%s1850_s19 + $0x180] sm:$0xff] }
  0x2e   : > { %340 = vst [vmem:[%s1855_s20 + $0x50] sm:$0xff] %v339_v42  ;;  %342 = vst [vmem:[%s1855_s20 + $0x58] sm:$0xff] %v341_v43  ;;  %v345_v45 = vld [vmem:[%s1850_s19 + $0x188] sm:$0xff]  ;;  %v347_v46 = vld [vmem:[%s1850_s19 + $0x190] sm:$0xff] }
  0x2f   : > { %344 = vst [vmem:[%s1855_s20 + $0x60] sm:$0xff] %v343_v44  ;;  %346 = vst [vmem:[%s1855_s20 + $0x68] sm:$0xff] %v345_v45  ;;  %v349_v47 = vld [vmem:[%s1850_s19 + $0x198] sm:$0xff]  ;;  %v351_v48 = vld [vmem:[%s1850_s19 + $0x200] sm:$0xff] }
  0x30   : > { %348 = vst [vmem:[%s1855_s20 + $0x70] sm:$0xff] %v347_v46  ;;  %v353_v49 = vld [vmem:[%s1850_s19 + $0x208] sm:$0xff]  ;;  %350 = vst [vmem:[%s1855_s20 + $0x78] sm:$0xff] %v349_v47  ;;  %v355_v50 = vld [vmem:[%s1850_s19 + $0x210] sm:$0xff] }
  0x31   : > { %352 = vst [vmem:[%s1855_s20 + $0x80] sm:$0xff] %v351_v48  ;;  %354 = vst [vmem:[%s1855_s20 + $0x88] sm:$0xff] %v353_v49  ;;  %v357_v51 = vld [vmem:[%s1850_s19 + $0x218] sm:$0xff]  ;;  %v359_v52 = vld [vmem:[%s1850_s19 + $0x280] sm:$0xff] }
  0x32   : > { %356 = vst [vmem:[%s1855_s20 + $0x90] sm:$0xff] %v355_v50  ;;  %358 = vst [vmem:[%s1855_s20 + $0x98] sm:$0xff] %v357_v51  ;;  %v361_v53 = vld [vmem:[%s1850_s19 + $0x288] sm:$0xff]  ;;  %v363_v54 = vld [vmem:[%s1850_s19 + $0x290] sm:$0xff] }
  0x33   : > { %360 = vst [vmem:[%s1855_s20 + $0xa0] sm:$0xff] %v359_v52  ;;  %v365_v55 = vld [vmem:[%s1850_s19 + $0x298] sm:$0xff]  ;;  %362 = vst [vmem:[%s1855_s20 + $0xa8] sm:$0xff] %v361_v53  ;;  %v367_v56 = vld [vmem:[%s1850_s19 + $0x300] sm:$0xff] }
  0x34   : > { %364 = vst [vmem:[%s1855_s20 + $0xb0] sm:$0xff] %v363_v54  ;;  %366 = vst [vmem:[%s1855_s20 + $0xb8] sm:$0xff] %v365_v55  ;;  %v369_v57 = vld [vmem:[%s1850_s19 + $0x308] sm:$0xff]  ;;  %v371_v58 = vld [vmem:[%s1850_s19 + $0x310] sm:$0xff] }
  0x35   : > { %368 = vst [vmem:[%s1855_s20 + $0xc0] sm:$0xff] %v367_v56  ;;  %370 = vst [vmem:[%s1855_s20 + $0xc8] sm:$0xff] %v369_v57  ;;  %v373_v59 = vld [vmem:[%s1850_s19 + $0x318] sm:$0xff]  ;;  %v375_v60 = vld [vmem:[%s1850_s19 + $0x380] sm:$0xff] }
  0x36   : > { %372 = vst [vmem:[%s1855_s20 + $0xd0] sm:$0xff] %v371_v58  ;;  %v377_v61 = vld [vmem:[%s1850_s19 + $0x388] sm:$0xff]  ;;  %374 = vst [vmem:[%s1855_s20 + $0xd8] sm:$0xff] %v373_v59  ;;  %v379_v62 = vld [vmem:[%s1850_s19 + $0x390] sm:$0xff] }
  0x37   : > { %376 = vst [vmem:[%s1855_s20 + $0xe0] sm:$0xff] %v375_v60  ;;  %378 = vst [vmem:[%s1855_s20 + $0xe8] sm:$0xff] %v377_v61  ;;  %v381_v63 = vld [vmem:[%s1850_s19 + $0x398] sm:$0xff]  ;;  %v383_v0 = vld [vmem:[%s1850_s19 + $0x400] sm:$0xff] }
  0x38   : > { %380 = vst [vmem:[%s1855_s20 + $0xf0] sm:$0xff] %v379_v62  ;;  %382 = vst [vmem:[%s1855_s20 + $0xf8] sm:$0xff] %v381_v63  ;;  %v385_v1 = vld [vmem:[%s1850_s19 + $0x408] sm:$0xff]  ;;  %v387_v2 = vld [vmem:[%s1850_s19 + $0x410] sm:$0xff] }
  0x39   : > { %384 = vst [vmem:[%s1855_s20 + $0x100] sm:$0xff] %v383_v0  ;;  %v389_v3 = vld [vmem:[%s1850_s19 + $0x418] sm:$0xff]  ;;  %386 = vst [vmem:[%s1855_s20 + $0x108] sm:$0xff] %v385_v1  ;;  %v391_v4 = vld [vmem:[%s1850_s19 + $0x480] sm:$0xff] }
  0x3a   : > { %388 = vst [vmem:[%s1855_s20 + $0x110] sm:$0xff] %v387_v2  ;;  %390 = vst [vmem:[%s1855_s20 + $0x118] sm:$0xff] %v389_v3  ;;  %v393_v5 = vld [vmem:[%s1850_s19 + $0x488] sm:$0xff]  ;;  %v395_v6 = vld [vmem:[%s1850_s19 + $0x490] sm:$0xff] }
  0x3b   : > { %392 = vst [vmem:[%s1855_s20 + $0x120] sm:$0xff] %v391_v4  ;;  %394 = vst [vmem:[%s1855_s20 + $0x128] sm:$0xff] %v393_v5  ;;  %v397_v7 = vld [vmem:[%s1850_s19 + $0x498] sm:$0xff]  ;;  %v399_v8 = vld [vmem:[%s1850_s19 + $0x500] sm:$0xff] }
  0x3c   : > { %396 = vst [vmem:[%s1855_s20 + $0x130] sm:$0xff] %v395_v6  ;;  %v401_v9 = vld [vmem:[%s1850_s19 + $0x508] sm:$0xff]  ;;  %398 = vst [vmem:[%s1855_s20 + $0x138] sm:$0xff] %v397_v7  ;;  %v403_v10 = vld [vmem:[%s1850_s19 + $0x510] sm:$0xff] }
  0x3d   : > { %400 = vst [vmem:[%s1855_s20 + $0x140] sm:$0xff] %v399_v8  ;;  %402 = vst [vmem:[%s1855_s20 + $0x148] sm:$0xff] %v401_v9  ;;  %v405_v11 = vld [vmem:[%s1850_s19 + $0x518] sm:$0xff]  ;;  %v407_v12 = vld [vmem:[%s1850_s19 + $0x580] sm:$0xff] }
  0x3e   : > { %404 = vst [vmem:[%s1855_s20 + $0x150] sm:$0xff] %v403_v10  ;;  %406 = vst [vmem:[%s1855_s20 + $0x158] sm:$0xff] %v405_v11  ;;  %v409_v13 = vld [vmem:[%s1850_s19 + $0x588] sm:$0xff]  ;;  %v411_v14 = vld [vmem:[%s1850_s19 + $0x590] sm:$0xff] }
  0x3f   : > { %408 = vst [vmem:[%s1855_s20 + $0x160] sm:$0xff] %v407_v12  ;;  %v413_v15 = vld [vmem:[%s1850_s19 + $0x598] sm:$0xff]  ;;  %410 = vst [vmem:[%s1855_s20 + $0x168] sm:$0xff] %v409_v13  ;;  %v415_v16 = vld [vmem:[%s1850_s19 + $0x600] sm:$0xff] }
  0x40   : > { %412 = vst [vmem:[%s1855_s20 + $0x170] sm:$0xff] %v411_v14  ;;  %414 = vst [vmem:[%s1855_s20 + $0x178] sm:$0xff] %v413_v15  ;;  %v417_v17 = vld [vmem:[%s1850_s19 + $0x608] sm:$0xff]  ;;  %v419_v18 = vld [vmem:[%s1850_s19 + $0x610] sm:$0xff] }
  0x41   : > { %416 = vst [vmem:[%s1855_s20 + $0x180] sm:$0xff] %v415_v16  ;;  %418 = vst [vmem:[%s1855_s20 + $0x188] sm:$0xff] %v417_v17  ;;  %v421_v19 = vld [vmem:[%s1850_s19 + $0x618] sm:$0xff]  ;;  %v423_v20 = vld [vmem:[%s1850_s19 + $0x680] sm:$0xff] }
  0x42   : > { %420 = vst [vmem:[%s1855_s20 + $0x190] sm:$0xff] %v419_v18  ;;  %v425_v21 = vld [vmem:[%s1850_s19 + $0x688] sm:$0xff]  ;;  %422 = vst [vmem:[%s1855_s20 + $0x198] sm:$0xff] %v421_v19  ;;  %v427_v22 = vld [vmem:[%s1850_s19 + $0x690] sm:$0xff] }
  0x43   : > { %424 = vst [vmem:[%s1855_s20 + $0x1a0] sm:$0xff] %v423_v20  ;;  %426 = vst [vmem:[%s1855_s20 + $0x1a8] sm:$0xff] %v425_v21  ;;  %v429_v23 = vld [vmem:[%s1850_s19 + $0x698] sm:$0xff]  ;;  %v431_v24 = vld [vmem:[%s1850_s19 + $0x700] sm:$0xff] }
  0x44   : > { %428 = vst [vmem:[%s1855_s20 + $0x1b0] sm:$0xff] %v427_v22  ;;  %430 = vst [vmem:[%s1855_s20 + $0x1b8] sm:$0xff] %v429_v23  ;;  %v433_v25 = vld [vmem:[%s1850_s19 + $0x708] sm:$0xff]  ;;  %v435_v26 = vld [vmem:[%s1850_s19 + $0x710] sm:$0xff] }
  0x45   : > { %432 = vst [vmem:[%s1855_s20 + $0x1c0] sm:$0xff] %v431_v24  ;;  %v437_v27 = vld [vmem:[%s1850_s19 + $0x718] sm:$0xff]  ;;  %434 = vst [vmem:[%s1855_s20 + $0x1c8] sm:$0xff] %v433_v25  ;;  %v439_v28 = vld [vmem:[%s1850_s19 + $0x780] sm:$0xff] }
  0x46   : > { %436 = vst [vmem:[%s1855_s20 + $0x1d0] sm:$0xff] %v435_v26  ;;  %438 = vst [vmem:[%s1855_s20 + $0x1d8] sm:$0xff] %v437_v27  ;;  %v441_v29 = vld [vmem:[%s1850_s19 + $0x788] sm:$0xff]  ;;  %v443_v30 = vld [vmem:[%s1850_s19 + $0x790] sm:$0xff] }
  0x47   : > { %440 = vst [vmem:[%s1855_s20 + $0x1e0] sm:$0xff] %v439_v28  ;;  %442 = vst [vmem:[%s1855_s20 + $0x1e8] sm:$0xff] %v441_v29  ;;  %v445_v31 = vld [vmem:[%s1850_s19 + $0x798] sm:$0xff] }
  0x48   : > { %444 = vst [vmem:[%s1855_s20 + $0x1f0] sm:$0xff] %v443_v30  ;;  %446 = vst [vmem:[%s1855_s20 + $0x1f8] sm:$0xff] %v445_v31 }
  0x49 PF: > { %p1473_p7 = scmp.ge.s32.totalorder %s1689_s23, 1  ;;  %p451_p8 = scmp.lt.s32.totalorder %s1689_s23, 5 }
  0x4b   : > { %p452_p9 = pnand %p1473_p7, %p451_p8 }
  0x4c   : > { %s1985_s26 = sand.u32 (!%p452_p9), 1, %s1681_s21   ;;  %v1691_v32 = vmov (!%p452_p9), 0.0   ;;  %v510_v17 = vld [vmem:[%s2275_s2] sm:$0xff] (!%p452_p9)  ;;  %vm558_vm0 = vcmask (!%p452_p9), 523264   ;;  %v511_v18 = vld [vmem:[%s2275_s2 + $0x8] sm:$0xff] (!%p452_p9)  ;;  %v512_v19 = vld [vmem:[%s2275_s2 + $0x10] sm:$0xff] (!%p452_p9) }
  0x4d   : > { %455 = sbr.rel (%p452_p9) target bundleno = 771 (0x303), region = 78  ;;  %s1474_s27 = sshll.u32 (!%p452_p9), %s1985_s26, 8  ;;  %671 = vmatprep.mubr.f32.mxu0 (!%p452_p9), %v1691_v32  ;;  %832 = vmatprep.mubr.f32.mxu1 (!%p452_p9), %v1691_v32  ;;  %v513_v20 = vld [vmem:[%s2275_s2 + $0x18] sm:$0xff] (!%p452_p9)  ;;  %v514_v21 = vld [vmem:[%s2275_s2 + $0x20] sm:$0xff] (!%p452_p9)  ;;  %v515_v22 = vld [vmem:[%s2275_s2 + $0x28] sm:$0xff] (!%p452_p9)  ;;  %vm1291_vm9 = vcmask (!%p452_p9), 7168  }
  0x4e   : > { %s1990_s29 = scalar_lea.vmem (!%p452_p9), [#allocation2], %s1474_s27  ;;  %v516_v23 = vld [vmem:[%s2275_s2 + $0x30] sm:$0xff] (!%p452_p9)  ;;  %v517_v24 = vld [vmem:[%s2275_s2 + $0x38] sm:$0xff] (!%p452_p9)  ;;  %v518_v25 = vld [vmem:[%s2275_s2 + $0x40] sm:$0xff] (!%p452_p9)  ;;  %s1475_s21 = sshll.u32 (!%p452_p9), %s1985_s26, 9  ;;  %vm1312_vm10 = vcmask (!%p452_p9), 15368  }
  0x4f   : > { %v527_v33 = vld [vmem:[%s1990_s29 + $0x8] sm:$0xff] (!%p452_p9)  ;;  %v529_v35 = vld [vmem:[%s1990_s29 + $0x18] sm:$0xff] (!%p452_p9)  ;;  %v526_v38 = vld [vmem:[%s1990_s29] sm:$0xff] (!%p452_p9)  ;;  %s2143_s23 = scalar_lea.vmem (!%p452_p9), [#allocation3], %s1475_s21  ;;  %s1476_s11 = sshll.u32 (!%p452_p9), %s1985_s26, 6 }
  0x50   : > { %v531_v34 = vld [vmem:[%s1990_s29 + $0x28] sm:$0xff] (!%p452_p9)  ;;  %v533_v37 = vld [vmem:[%s1990_s29 + $0x38] sm:$0xff] (!%p452_p9)  ;;  %v530_v39 = vld [vmem:[%s1990_s29 + $0x20] sm:$0xff] (!%p452_p9)  ;;  %s2227_s12 = scalar_lea.vmem (!%p452_p9), [#allocation4], %s1476_s11  ;;  %p505_p10 = scmp.lt.s32.totalorder (!%p452_p9), %s1744_s24, 3 }
  0x51   : > { %v1528_v36 = vpack.c.bf16 (!%p452_p9), %v531_v34, %v527_v33  ;;  %v1544_v40 = vpack.c.bf16 (!%p452_p9), %v533_v37, %v529_v35  ;;  %v1530_v41 = vpack.c.bf16 (!%p452_p9), %v530_v39, %v526_v38  ;;  %v528_v42 = vld [vmem:[%s1990_s29 + $0x10] sm:$0xff] (!%p452_p9)  ;;  %v535_v44 = vld [vmem:[%s1990_s29 + $0x48] sm:$0xff] (!%p452_p9)  ;;  %v537_v47 = vld [vmem:[%s1990_s29 + $0x58] sm:$0xff] (!%p452_p9)  ;;  %v1692_v35 = vmov (!%p452_p9), 0  }
  0x52   : > { %v532_v43 = vld [vmem:[%s1990_s29 + $0x30] sm:$0xff] (!%p452_p9)  ;;  %v539_v46 = vld [vmem:[%s1990_s29 + $0x68] sm:$0xff] (!%p452_p9)  ;;  %v541_v48 = vld [vmem:[%s1990_s29 + $0x78] sm:$0xff] (!%p452_p9)  ;;  %1650 = vset.pattern.permute.xlu0 (!%p452_p9), %v1692_v35 }
  0x53   : > { %1529 = vmatprep.subr.bf16.mxu0 (!%p452_p9), %v1528_v36  ;;  %v1546_v45 = vpack.c.bf16 (!%p452_p9), %v532_v43, %v528_v42  ;;  %1545 = vmatprep.subr.bf16.mxu1 (!%p452_p9), %v1544_v40  ;;  %v1532_v49 = vpack.c.bf16 (!%p452_p9), %v539_v46, %v535_v44  ;;  %v1548_v50 = vpack.c.bf16 (!%p452_p9), %v541_v48, %v537_v47  ;;  %v534_v51 = vld [vmem:[%s1990_s29 + $0x40] sm:$0xff] (!%p452_p9)  ;;  %v536_v53 = vld [vmem:[%s1990_s29 + $0x50] sm:$0xff] (!%p452_p9)  ;;  %v543_v56 = vld [vmem:[%s1990_s29 + $0x88] sm:$0xff] (!%p452_p9) }
  0x54   : > { %1531 = vmatpush1.bf16.msra.mxu0 %v1530_v41  ;;  %v538_v52 = vld [vmem:[%s1990_s29 + $0x60] sm:$0xff]  ;;  %v540_v55 = vld [vmem:[%s1990_s29 + $0x70] sm:$0xff]  ;;  %v547_v57 = vld [vmem:[%s1990_s29 + $0xa8] sm:$0xff]  ;;  %s506_s26 = scalar_select %p505_p10, %s1744_s24, 3 }
  0x55   : > { %1547 = vmatpush1.bf16.msra.mxu1 %v1546_v45  ;;  %v1534_v54 = vpack.c.bf16 %v538_v52, %v534_v51  ;;  %1533 = vmatprep.subr.bf16.mxu0 %v1532_v49  ;;  %v1550_v58 = vpack.c.bf16 %v540_v55, %v536_v53  ;;  %v1536_v59 = vpack.c.bf16 %v547_v57, %v543_v56  ;;  %v545_v60 = vld [vmem:[%s1990_s29 + $0x98] sm:$0xff]  ;;  %v542_v62 = vld [vmem:[%s1990_s29 + $0x80] sm:$0xff]  ;;  %v544_v1 = vld [vmem:[%s1990_s29 + $0x90] sm:$0xff]  ;;  %s1527_s17 = sshll.u32 (%p1763_p5), %s1744_s24, 5 }
  0x56   : > { %1549 = vmatprep.subr.bf16.mxu1 %v1548_v50  ;;  %v549_v61 = vld [vmem:[%s1990_s29 + $0xb8] sm:$0xff]  ;;  %v546_v0 = vld [vmem:[%s1990_s29 + $0xa0] sm:$0xff]  ;;  %v548_v2 = vld [vmem:[%s1990_s29 + $0xb0] sm:$0xff]  ;;  %s1526_s13 = sshll.u32 %s506_s26, 4  ;;  %s1329_s20 = scalar_lea.vmem (%p1763_p5), %s2278_s5, %s1527_s17 }
  0x57   : > { %v1552_v63 = vpack.c.bf16 %v549_v61, %v545_v60  ;;  %v1538_v3 = vpack.c.bf16 %v546_v0, %v542_v62  ;;  %v551_v4 = vld [vmem:[%s1990_s29 + $0xc8] sm:$0xff]  ;;  %v553_v6 = vld [vmem:[%s1990_s29 + $0xd8] sm:$0xff]  ;;  %v1554_v7 = vpack.c.bf16 %v548_v2, %v544_v1  ;;  %v550_v10 = vld [vmem:[%s1990_s29 + $0xc0] sm:$0xff]  ;;  %s509_s16 = scalar_lea.vmem %s2279_s6, %s1526_s13 }
  0x58   : > { %1535 = vmatpush1.bf16.msra.mxu0 %v1534_v54  ;;  %v555_v5 = vld [vmem:[%s1990_s29 + $0xe8] sm:$0xff]  ;;  %v557_v9 = vld [vmem:[%s1990_s29 + $0xf8] sm:$0xff]  ;;  %v554_v11 = vld [vmem:[%s1990_s29 + $0xe0] sm:$0xff] }
  0x59   : > { %1551 = vmatpush1.bf16.msra.mxu1 %v1550_v58  ;;  %1537 = vmatprep.subr.bf16.mxu0 %v1536_v59  ;;  %v1540_v8 = vpack.c.bf16 %v555_v5, %v551_v4  ;;  %v1556_v12 = vpack.c.bf16 %v557_v9, %v553_v6  ;;  %v552_v13 = vld [vmem:[%s1990_s29 + $0xd0] sm:$0xff]  ;;  %v1542_v15 = vpack.c.bf16 %v554_v11, %v550_v10  ;;  %v519_v26 = vld [vmem:[%s2275_s2 + $0x48] sm:$0xff]  ;;  %v521_v28 = vld [vmem:[%s2275_s2 + $0x58] sm:$0xff] }
  0x5a   : > { %1553 = vmatprep.subr.bf16.mxu1 %v1552_v63  ;;  %v556_v14 = vld [vmem:[%s1990_s29 + $0xf0] sm:$0xff]  ;;  %v522_v29 = vld [vmem:[%s2275_s2 + $0x60] sm:$0xff]  ;;  %v523_v30 = vld [vmem:[%s2275_s2 + $0x68] sm:$0xff] }
  0x5b   : > { %v1558_v16 = vpack.c.bf16 %v556_v14, %v552_v13  ;;  %v520_v27 = vld [vmem:[%s2275_s2 + $0x50] sm:$0xff]  ;;  %v525_v33 = vld [vmem:[%s2275_s2 + $0x78] sm:$0xff]  ;;  %v1059_v34 = vld [vmem:[%s2277_s4] sm:$0xff] }
  0x5c   : > { %1539 = vmatpush1.bf16.msra.mxu0 %v1538_v3  ;;  %v524_v31 = vld [vmem:[%s2275_s2 + $0x70] sm:$0xff]  ;;  %1063 = vperm.xlu0 %1650, %v1059_v34   ;;  %v1060_v36 = vld [vmem:[%s2277_s4 + $0x8] sm:$0xff]  ;;  %v929_v41 = vld [vmem:[%s2143_s23] sm:$0xff] }
  0x5d   : > { %1555 = vmatpush1.bf16.msra.mxu1 %v1554_v7  ;;  %1541 = vmatprep.subr.bf16.mxu0 %v1540_v8  ;;  %v931_v40 = vld [vmem:[%s2143_s23 + $0x10] sm:$0xff]  ;;  %v933_v43 = vld [vmem:[%s2143_s23 + $0x20] sm:$0xff]  ;;  %v930_v44 = vld [vmem:[%s2143_s23 + $0x8] sm:$0xff] }
  0x5e   : > { %1557 = vmatprep.subr.bf16.mxu1 %v1556_v12  ;;  %v935_v45 = vld [vmem:[%s2143_s23 + $0x30] sm:$0xff]  ;;  %v934_v46 = vld [vmem:[%s2143_s23 + $0x28] sm:$0xff]  ;;  %v932_v48 = vld [vmem:[%s2143_s23 + $0x18] sm:$0xff] }
  0x5f   : > { %v936_v50 = vld [vmem:[%s2143_s23 + $0x38] sm:$0xff]  ;;  %v939_v4 = vld [vmem:[%s2143_s23 + $0x50] sm:$0xff]  ;;  %v937_v5 = vld [vmem:[%s2143_s23 + $0x40] sm:$0xff] }
  0x60   : > { %1543 = vmatpush1.bf16.msra.mxu0 %v1542_v15  ;;  %1068 = vperm.xlu0 %1650, %v1060_v36   ;;  %v941_v7 = vld [vmem:[%s2143_s23 + $0x60] sm:$0xff]  ;;  %v938_v8 = vld [vmem:[%s2143_s23 + $0x48] sm:$0xff]  ;;  %v943_v9 = vld [vmem:[%s2143_s23 + $0x70] sm:$0xff] }
  0x61   : > { %1559 = vmatpush1.bf16.msra.mxu1 %v1558_v16  ;;  %v942_v10 = vld [vmem:[%s2143_s23 + $0x68] sm:$0xff]  ;;  %v940_v12 = vld [vmem:[%s2143_s23 + $0x58] sm:$0xff]  ;;  %v945_v34 = vld [vmem:[%s2143_s23 + $0x80] sm:$0xff] }
  0x62   : > { %v944_v14 = vld [vmem:[%s2143_s23 + $0x78] sm:$0xff]  ;;  %v949_v36 = vld [vmem:[%s2143_s23 + $0xa0] sm:$0xff] }
  0x63   : > { %1479 = vmatmul.mubr.msk.f32.vlgmr.msra.gmra.mrb[0].mxu0 %vm558_vm0, %v510_v17 }
  0x64   : > { %1495 = vmatmul.mubr.msk.f32.vlgmr.msra.gmra.mrb[0].mxu1 %vm558_vm0, %v510_v17  ;;  %677 = vmatprep.mubr.f32.mxu0 %v1691_v32 }
  0x65   : > { %838 = vmatprep.mubr.f32.mxu1 %v1691_v32 }
  0x67   : > { %1480 = vmatmul.mubr.msk.f32.gmra.mrb[2].mxu0 %vm558_vm0, %v511_v18 }
  0x68   : > { %1496 = vmatmul.mubr.msk.f32.gmra.mrb[2].mxu1 %vm558_vm0, %v511_v18  ;;  %683 = vmatprep.mubr.f32.mxu0 %v1691_v32 }
  0x69   : > { %844 = vmatprep.mubr.f32.mxu1 %v1691_v32 }
  0x6b   : > { %1481 = vmatmul.mubr.msk.f32.gmra.mrb[4].mxu0 %vm558_vm0, %v512_v19 }
  0x6c   : > { %1497 = vmatmul.mubr.msk.f32.gmra.mrb[4].mxu1 %vm558_vm0, %v512_v19  ;;  %689 = vmatprep.mubr.f32.mxu0 %v1691_v32 }
  0x6d   : > { %850 = vmatprep.mubr.f32.mxu1 %v1691_v32 }
  0x6f   : > { %1482 = vmatmul.mubr.msk.f32.gmra.mrb[6].mxu0 %vm558_vm0, %v513_v20 }
  0x70   : > { %1498 = vmatmul.mubr.msk.f32.gmra.mrb[6].mxu1 %vm558_vm0, %v513_v20  ;;  %695 = vmatprep.mubr.f32.mxu0 %v1691_v32 }
  0x71   : > { %856 = vmatprep.mubr.f32.mxu1 %v1691_v32 }
  0x73   : > { %1483 = vmatmul.mubr.msk.f32.gmra.mrb[8].mxu0 %vm558_vm0, %v514_v21 }
  0x74   : > { %1499 = vmatmul.mubr.msk.f32.gmra.mrb[8].mxu1 %vm558_vm0, %v514_v21  ;;  %701 = vmatprep.mubr.f32.mxu0 %v1691_v32 }
  0x75   : > { %862 = vmatprep.mubr.f32.mxu1 %v1691_v32 }
  0x77   : > { %1484 = vmatmul.mubr.msk.f32.gmra.mrb[10].mxu0 %vm558_vm0, %v515_v22 }
  0x78   : > { %1500 = vmatmul.mubr.msk.f32.gmra.mrb[10].mxu1 %vm558_vm0, %v515_v22  ;;  %707 = vmatprep.mubr.f32.mxu0 %v1691_v32 }
  0x79   : > { %868 = vmatprep.mubr.f32.mxu1 %v1691_v32 }
  0x7b   : > { %1485 = vmatmul.mubr.msk.f32.gmra.mrb[12].mxu0 %vm558_vm0, %v516_v23 }
  0x7c   : > { %1501 = vmatmul.mubr.msk.f32.gmra.mrb[12].mxu1 %vm558_vm0, %v516_v23  ;;  %713 = vmatprep.mubr.f32.mxu0 %v1691_v32 }
  0x7d   : > { %874 = vmatprep.mubr.f32.mxu1 %v1691_v32 }
  0x7f   : > { %1486 = vmatmul.mubr.msk.f32.gmra.mrb[14].mxu0 %vm558_vm0, %v517_v24 }
  0x80   : > { %1502 = vmatmul.mubr.msk.f32.gmra.mrb[14].mxu1 %vm558_vm0, %v517_v24  ;;  %719 = vmatprep.mubr.f32.mxu0 %v1691_v32 }
  0x81   : > { %880 = vmatprep.mubr.f32.mxu1 %v1691_v32 }
  0x83   : > { %1487 = vmatmul.mubr.msk.f32.gmra.mrb[16].mxu0 %vm558_vm0, %v518_v25 }
  0x84   : > { %1503 = vmatmul.mubr.msk.f32.gmra.mrb[16].mxu1 %vm558_vm0, %v518_v25  ;;  %725 = vmatprep.mubr.f32.mxu0 %v1691_v32 }
  0x85   : > { %886 = vmatprep.mubr.f32.mxu1 %v1691_v32 }
  0x87   : > { %1488 = vmatmul.mubr.msk.f32.gmra.mrb[18].mxu0 %vm558_vm0, %v519_v26 }
  0x88   : > { %1504 = vmatmul.mubr.msk.f32.gmra.mrb[18].mxu1 %vm558_vm0, %v519_v26  ;;  %731 = vmatprep.mubr.f32.mxu0 %v1691_v32 }
  0x89   : > { %892 = vmatprep.mubr.f32.mxu1 %v1691_v32 }
  0x8b   : > { %1489 = vmatmul.mubr.msk.f32.gmra.mrb[20].mxu0 %vm558_vm0, %v520_v27 }
  0x8c   : > { %1505 = vmatmul.mubr.msk.f32.gmra.mrb[20].mxu1 %vm558_vm0, %v520_v27  ;;  %737 = vmatprep.mubr.f32.mxu0 %v1691_v32 }
  0x8d   : > { %898 = vmatprep.mubr.f32.mxu1 %v1691_v32 }
  0x8f   : > { %1490 = vmatmul.mubr.msk.f32.gmra.mrb[22].mxu0 %vm558_vm0, %v521_v28 }
  0x90   : > { %1506 = vmatmul.mubr.msk.f32.gmra.mrb[22].mxu1 %vm558_vm0, %v521_v28  ;;  %743 = vmatprep.mubr.f32.mxu0 %v1691_v32 }
  0x91   : > { %904 = vmatprep.mubr.f32.mxu1 %v1691_v32 }
  0x93   : > { %1491 = vmatmul.mubr.msk.f32.gmra.mrb[24].mxu0 %vm558_vm0, %v522_v29 }
  0x94   : > { %1507 = vmatmul.mubr.msk.f32.gmra.mrb[24].mxu1 %vm558_vm0, %v522_v29  ;;  %749 = vmatprep.mubr.f32.mxu0 %v1691_v32 }
  0x95   : > { %910 = vmatprep.mubr.f32.mxu1 %v1691_v32 }
  0x97   : > { %1492 = vmatmul.mubr.msk.f32.gmra.mrb[26].mxu0 %vm558_vm0, %v523_v30 }
  0x98   : > { %1508 = vmatmul.mubr.msk.f32.gmra.mrb[26].mxu1 %vm558_vm0, %v523_v30  ;;  %755 = vmatprep.mubr.f32.mxu0 %v1691_v32 }
  0x99   : > { %916 = vmatprep.mubr.f32.mxu1 %v1691_v32 }
  0x9b   : > { %1493 = vmatmul.mubr.msk.f32.gmra.mrb[28].mxu0 %vm558_vm0, %v524_v31 }
  0x9c   : > { %1509 = vmatmul.mubr.msk.f32.gmra.mrb[28].mxu1 %vm558_vm0, %v524_v31  ;;  %761 = vmatprep.mubr.f32.mxu0 %v1691_v32 }
  0x9d   : > { %922 = vmatprep.mubr.f32.mxu1 %v1691_v32 }
  0x9f   : > { %1494 = vmatmul.mubr.msk.f32.gmra.mrb[30].mxu0 %vm558_vm0, %v525_v33 }
  0xa0   : > { %1510 = vmatmul.mubr.msk.f32.gmra.mrb[30].mxu1 %vm558_vm0, %v525_v33  ;;  %1135 = vmatprep.mubr.f32.mxu0 %v1691_v32  ;;  %v947_v33 = vld [vmem:[%s2143_s23 + $0x90] sm:$0xff] }
  0xa1   : > { %1212 = vmatprep.mubr.f32.mxu1 %v1691_v32 }
 0x136   : > { %v673_v37 = vpop.f32.mrb[0].mxu0 }
 0x137   : > { %v675_v38 = vpop.f32.mrb[1].mxu0  ;;  %v834_v39 = vpop.f32.mrb[0].mxu1  ;;  %v993_v51 = vmul.f32 %v929_v41, %v673_v37  ;;  %v946_v37 = vld [vmem:[%s2143_s23 + $0x88] sm:$0xff]  ;;  %v948_v41 = vld [vmem:[%s2143_s23 + $0x98] sm:$0xff] }
 0x138   : > { %v836_v42 = vpop.f32.mrb[1].mxu1  ;;  %v995_v47 = vmul.f32 %v931_v40, %v834_v39  ;;  %v994_v55 = vmul.f32 %v930_v44, %v675_v38  ;;  %v951_v38 = vld [vmem:[%s2143_s23 + $0xb0] sm:$0xff]  ;;  %v950_v39 = vld [vmem:[%s2143_s23 + $0xa8] sm:$0xff] }
 0x139   : > { %v996_v59 = vmul.f32 %v932_v48, %v836_v42 }
 0x13a   : > { %v679_v49 = vpop.f32.mrb[2].mxu0 }
 0x13b   : > { %v997_v52 = vmul.f32 %v933_v43, %v679_v49  ;;  %v840_v53 = vpop.f32.mrb[2].mxu1  ;;  %v681_v54 = vpop.f32.mrb[3].mxu0  ;;  %v952_v43 = vld [vmem:[%s2143_s23 + $0xb8] sm:$0xff] }
 0x13c   : > { %v999_v56 = vmul.f32 %v935_v45, %v840_v53  ;;  %v998_v57 = vmul.f32 %v934_v46, %v681_v54  ;;  %v842_v58 = vpop.f32.mrb[3].mxu1 }
 0x13d   : > { %v1562_v60 = vpack.c.bf16 %v997_v52, %v993_v51  ;;  %v1000_v61 = vmul.f32 %v936_v50, %v842_v58 }
 0x13e   : > { %v1594_v62 = vpack.c.bf16 %v999_v56, %v995_v47  ;;  %v1560_v63 = vpack.c.bf16 %v998_v57, %v994_v55  ;;  %v685_v0 = vpop.f32.mrb[4].mxu0 }
 0x13f   : > { %v1592_v1 = vpack.c.bf16 %v1000_v61, %v996_v59  ;;  %v687_v2 = vpop.f32.mrb[5].mxu0  ;;  %v846_v3 = vpop.f32.mrb[4].mxu1  ;;  %v1001_v15 = vmul.f32 %v937_v5, %v685_v0  ;;  %v955_v61 = vld [vmem:[%s2143_s23 + $0xd0] sm:$0xff]  ;;  %v957_v0 = vld [vmem:[%s2143_s23 + $0xe0] sm:$0xff]  ;;  %v956_v5 = vld [vmem:[%s2143_s23 + $0xd8] sm:$0xff] }
 0x140   : > { %1561 = vmatprep.subr.bf16.mxu0 %v1560_v63  ;;  %v848_v6 = vpop.f32.mrb[5].mxu1  ;;  %v1003_v11 = vmul.f32 %v939_v4, %v846_v3  ;;  %v1002_v19 = vmul.f32 %v938_v8, %v687_v2  ;;  %v959_v2 = vld [vmem:[%s2143_s23 + $0xf0] sm:$0xff]  ;;  %v958_v3 = vld [vmem:[%s2143_s23 + $0xe8] sm:$0xff] }
 0x141   : > { %1593 = vmatprep.subr.bf16.mxu1 %v1592_v1  ;;  %1563 = vmatpush1.bf16.msra.mxu0 %v1562_v60  ;;  %v1004_v23 = vmul.f32 %v940_v12, %v848_v6  ;;  %v954_v1 = vld [vmem:[%s2143_s23 + $0xc8] sm:$0xff] }
 0x142   : > { %1595 = vmatpush1.bf16.msra.mxu1 %v1594_v62  ;;  %v691_v13 = vpop.f32.mrb[6].mxu0  ;;  %v953_v62 = vld [vmem:[%s2143_s23 + $0xc0] sm:$0xff] }
 0x143   : > { %v1005_v16 = vmul.f32 %v941_v7, %v691_v13  ;;  %v852_v17 = vpop.f32.mrb[6].mxu1  ;;  %v693_v18 = vpop.f32.mrb[7].mxu0  ;;  %v960_v7 = vld [vmem:[%s2143_s23 + $0xf8] sm:$0xff] }
 0x144   : > { %v1007_v20 = vmul.f32 %v943_v9, %v852_v17  ;;  %v1006_v21 = vmul.f32 %v942_v10, %v693_v18  ;;  %v854_v22 = vpop.f32.mrb[7].mxu1 }
 0x145   : > { %v1566_v24 = vpack.c.bf16 %v1005_v16, %v1001_v15  ;;  %v1008_v25 = vmul.f32 %v944_v14, %v854_v22 }
 0x146   : > { %v1598_v26 = vpack.c.bf16 %v1007_v20, %v1003_v11  ;;  %v1564_v27 = vpack.c.bf16 %v1006_v21, %v1002_v19  ;;  %v697_v28 = vpop.f32.mrb[8].mxu0 }
 0x147   : > { %v1596_v29 = vpack.c.bf16 %v1008_v25, %v1004_v23  ;;  %v699_v30 = vpop.f32.mrb[9].mxu0  ;;  %v858_v31 = vpop.f32.mrb[8].mxu1  ;;  %v1009_v44 = vmul.f32 %v945_v34, %v697_v28  ;;  %v963_v25 = vld [vmem:[%s2143_s23 + $0x110] sm:$0xff]  ;;  %v965_v28 = vld [vmem:[%s2143_s23 + $0x120] sm:$0xff]  ;;  %v964_v34 = vld [vmem:[%s2143_s23 + $0x118] sm:$0xff] }
 0x148   : > { %1565 = vmatprep.subr.bf16.mxu0 %v1564_v27  ;;  %v860_v35 = vpop.f32.mrb[9].mxu1  ;;  %v1011_v40 = vmul.f32 %v947_v33, %v858_v31  ;;  %v1010_v48 = vmul.f32 %v946_v37, %v699_v30  ;;  %v967_v30 = vld [vmem:[%s2143_s23 + $0x130] sm:$0xff]  ;;  %v966_v31 = vld [vmem:[%s2143_s23 + $0x128] sm:$0xff] }
 0x149   : > { %1597 = vmatprep.subr.bf16.mxu1 %v1596_v29  ;;  %1567 = vmatpush1.bf16.msra.mxu0 %v1566_v24  ;;  %v1012_v52 = vmul.f32 %v948_v41, %v860_v35  ;;  %v962_v29 = vld [vmem:[%s2143_s23 + $0x108] sm:$0xff] }
 0x14a   : > { %1599 = vmatpush1.bf16.msra.mxu1 %v1598_v26  ;;  %v703_v42 = vpop.f32.mrb[10].mxu0  ;;  %v961_v26 = vld [vmem:[%s2143_s23 + $0x100] sm:$0xff] }
 0x14b   : > { %v1013_v45 = vmul.f32 %v949_v36, %v703_v42  ;;  %v864_v46 = vpop.f32.mrb[10].mxu1  ;;  %v705_v47 = vpop.f32.mrb[11].mxu0  ;;  %v968_v36 = vld [vmem:[%s2143_s23 + $0x138] sm:$0xff] }
 0x14c   : > { %v1015_v49 = vmul.f32 %v951_v38, %v864_v46  ;;  %v1014_v50 = vmul.f32 %v950_v39, %v705_v47  ;;  %v866_v51 = vpop.f32.mrb[11].mxu1 }
 0x14d   : > { %v1570_v53 = vpack.c.bf16 %v1013_v45, %v1009_v44  ;;  %v1016_v54 = vmul.f32 %v952_v43, %v866_v51 }
 0x14e   : > { %v1602_v55 = vpack.c.bf16 %v1015_v49, %v1011_v40  ;;  %v1568_v56 = vpack.c.bf16 %v1014_v50, %v1010_v48  ;;  %v709_v57 = vpop.f32.mrb[12].mxu0 }
 0x14f   : > { %v1600_v58 = vpack.c.bf16 %v1016_v54, %v1012_v52  ;;  %v711_v59 = vpop.f32.mrb[13].mxu0  ;;  %v870_v60 = vpop.f32.mrb[12].mxu1  ;;  %v1017_v8 = vmul.f32 %v953_v62, %v709_v57  ;;  %v971_v54 = vld [vmem:[%s2143_s23 + $0x150] sm:$0xff]  ;;  %v973_v57 = vld [vmem:[%s2143_s23 + $0x160] sm:$0xff]  ;;  %v972_v62 = vld [vmem:[%s2143_s23 + $0x158] sm:$0xff] }
 0x150   : > { %1569 = vmatprep.subr.bf16.mxu0 %v1568_v56  ;;  %v872_v63 = vpop.f32.mrb[13].mxu1  ;;  %v1019_v4 = vmul.f32 %v955_v61, %v870_v60  ;;  %v1018_v12 = vmul.f32 %v954_v1, %v711_v59  ;;  %v975_v59 = vld [vmem:[%s2143_s23 + $0x170] sm:$0xff]  ;;  %v974_v60 = vld [vmem:[%s2143_s23 + $0x168] sm:$0xff] }
 0x151   : > { %1601 = vmatprep.subr.bf16.mxu1 %v1600_v58  ;;  %1571 = vmatpush1.bf16.msra.mxu0 %v1570_v53  ;;  %v1020_v16 = vmul.f32 %v956_v5, %v872_v63  ;;  %v970_v58 = vld [vmem:[%s2143_s23 + $0x148] sm:$0xff] }
 0x152   : > { %1603 = vmatpush1.bf16.msra.mxu1 %v1602_v55  ;;  %v715_v6 = vpop.f32.mrb[14].mxu0  ;;  %v969_v55 = vld [vmem:[%s2143_s23 + $0x140] sm:$0xff] }
 0x153   : > { %v1021_v9 = vmul.f32 %v957_v0, %v715_v6  ;;  %v876_v10 = vpop.f32.mrb[14].mxu1  ;;  %v717_v11 = vpop.f32.mrb[15].mxu0  ;;  %v976_v0 = vld [vmem:[%s2143_s23 + $0x178] sm:$0xff] }
 0x154   : > { %v1023_v13 = vmul.f32 %v959_v2, %v876_v10  ;;  %v1022_v14 = vmul.f32 %v958_v3, %v717_v11  ;;  %v878_v15 = vpop.f32.mrb[15].mxu1 }
 0x155   : > { %v1574_v17 = vpack.c.bf16 %v1021_v9, %v1017_v8  ;;  %v1024_v18 = vmul.f32 %v960_v7, %v878_v15 }
 0x156   : > { %v1606_v19 = vpack.c.bf16 %v1023_v13, %v1019_v4  ;;  %v1572_v20 = vpack.c.bf16 %v1022_v14, %v1018_v12  ;;  %v721_v21 = vpop.f32.mrb[16].mxu0 }
 0x157   : > { %v1604_v22 = vpack.c.bf16 %v1024_v18, %v1020_v16  ;;  %v723_v23 = vpop.f32.mrb[17].mxu0  ;;  %v882_v24 = vpop.f32.mrb[16].mxu1  ;;  %v1025_v37 = vmul.f32 %v961_v26, %v721_v21  ;;  %v979_v18 = vld [vmem:[%s2143_s23 + $0x190] sm:$0xff]  ;;  %v981_v21 = vld [vmem:[%s2143_s23 + $0x1a0] sm:$0xff]  ;;  %v980_v26 = vld [vmem:[%s2143_s23 + $0x198] sm:$0xff] }
 0x158   : > { %1573 = vmatprep.subr.bf16.mxu0 %v1572_v20  ;;  %v884_v27 = vpop.f32.mrb[17].mxu1  ;;  %v1027_v33 = vmul.f32 %v963_v25, %v882_v24  ;;  %v1026_v41 = vmul.f32 %v962_v29, %v723_v23  ;;  %v983_v23 = vld [vmem:[%s2143_s23 + $0x1b0] sm:$0xff]  ;;  %v982_v24 = vld [vmem:[%s2143_s23 + $0x1a8] sm:$0xff] }
 0x159   : > { %1605 = vmatprep.subr.bf16.mxu1 %v1604_v22  ;;  %1575 = vmatpush1.bf16.msra.mxu0 %v1574_v17  ;;  %v1028_v45 = vmul.f32 %v964_v34, %v884_v27  ;;  %v978_v22 = vld [vmem:[%s2143_s23 + $0x188] sm:$0xff] }
 0x15a   : > { %1607 = vmatpush1.bf16.msra.mxu1 %v1606_v19  ;;  %v727_v35 = vpop.f32.mrb[18].mxu0  ;;  %v977_v19 = vld [vmem:[%s2143_s23 + $0x180] sm:$0xff] }
 0x15b   : > { %v1029_v38 = vmul.f32 %v965_v28, %v727_v35  ;;  %v888_v39 = vpop.f32.mrb[18].mxu1  ;;  %v729_v40 = vpop.f32.mrb[19].mxu0  ;;  %v984_v28 = vld [vmem:[%s2143_s23 + $0x1b8] sm:$0xff] }
 0x15c   : > { %v1031_v42 = vmul.f32 %v967_v30, %v888_v39  ;;  %v1030_v43 = vmul.f32 %v966_v31, %v729_v40  ;;  %v890_v44 = vpop.f32.mrb[19].mxu1 }
 0x15d   : > { %v1578_v46 = vpack.c.bf16 %v1029_v38, %v1025_v37  ;;  %v1032_v47 = vmul.f32 %v968_v36, %v890_v44 }
 0x15e   : > { %v1610_v48 = vpack.c.bf16 %v1031_v42, %v1027_v33  ;;  %v1576_v49 = vpack.c.bf16 %v1030_v43, %v1026_v41  ;;  %v733_v50 = vpop.f32.mrb[20].mxu0 }
 0x15f   : > { %v1608_v51 = vpack.c.bf16 %v1032_v47, %v1028_v45  ;;  %v735_v52 = vpop.f32.mrb[21].mxu0  ;;  %v894_v53 = vpop.f32.mrb[20].mxu1  ;;  %v1033_v1 = vmul.f32 %v969_v55, %v733_v50  ;;  %v987_v47 = vld [vmem:[%s2143_s23 + $0x1d0] sm:$0xff]  ;;  %v989_v50 = vld [vmem:[%s2143_s23 + $0x1e0] sm:$0xff]  ;;  %v988_v55 = vld [vmem:[%s2143_s23 + $0x1d8] sm:$0xff] }
 0x160   : > { %1577 = vmatprep.subr.bf16.mxu0 %v1576_v49  ;;  %v896_v56 = vpop.f32.mrb[21].mxu1  ;;  %v1035_v61 = vmul.f32 %v971_v54, %v894_v53  ;;  %v1034_v5 = vmul.f32 %v970_v58, %v735_v52  ;;  %v991_v52 = vld [vmem:[%s2143_s23 + $0x1f0] sm:$0xff]  ;;  %v990_v53 = vld [vmem:[%s2143_s23 + $0x1e8] sm:$0xff] }
 0x161   : > { %1609 = vmatprep.subr.bf16.mxu1 %v1608_v51  ;;  %1579 = vmatpush1.bf16.msra.mxu0 %v1578_v46  ;;  %v1036_v9 = vmul.f32 %v972_v62, %v896_v56  ;;  %v986_v51 = vld [vmem:[%s2143_s23 + $0x1c8] sm:$0xff] }
 0x162   : > { %1611 = vmatpush1.bf16.msra.mxu1 %v1610_v48  ;;  %v739_v63 = vpop.f32.mrb[22].mxu0  ;;  %v985_v48 = vld [vmem:[%s2143_s23 + $0x1c0] sm:$0xff] }
 0x163   : > { %v1037_v2 = vmul.f32 %v973_v57, %v739_v63  ;;  %v900_v3 = vpop.f32.mrb[22].mxu1  ;;  %v741_v4 = vpop.f32.mrb[23].mxu0  ;;  %v992_v57 = vld [vmem:[%s2143_s23 + $0x1f8] sm:$0xff] }
 0x164   : > { %v1039_v6 = vmul.f32 %v975_v59, %v900_v3  ;;  %v1038_v7 = vmul.f32 %v974_v60, %v741_v4  ;;  %v902_v8 = vpop.f32.mrb[23].mxu1 }
 0x165   : > { %v1582_v10 = vpack.c.bf16 %v1037_v2, %v1033_v1  ;;  %v1040_v11 = vmul.f32 %v976_v0, %v902_v8  ;;  %v1057_v8 = vld [vmem:[%s2276_s3] sm:$0xff] }
 0x166   : > { %v1614_v12 = vpack.c.bf16 %v1039_v6, %v1035_v61  ;;  %v1580_v13 = vpack.c.bf16 %v1038_v7, %v1034_v5  ;;  %v745_v14 = vpop.f32.mrb[24].mxu0 }
 0x167   : > { %v1612_v15 = vpack.c.bf16 %v1040_v11, %v1036_v9  ;;  %v747_v16 = vpop.f32.mrb[25].mxu0  ;;  %v906_v17 = vpop.f32.mrb[24].mxu1  ;;  %v1041_v29 = vmul.f32 %v977_v19, %v745_v14  ;;  %v1058_v9 = vld [vmem:[%s2276_s3 + $0x8] sm:$0xff] }
 0x168   : > { %1581 = vmatprep.subr.bf16.mxu0 %v1580_v13  ;;  %v908_v20 = vpop.f32.mrb[25].mxu1  ;;  %v1043_v25 = vmul.f32 %v979_v18, %v906_v17  ;;  %v1042_v34 = vmul.f32 %v978_v22, %v747_v16 }
 0x169   : > { %1613 = vmatprep.subr.bf16.mxu1 %v1612_v15  ;;  %1583 = vmatpush1.bf16.msra.mxu0 %v1582_v10  ;;  %v1044_v38 = vmul.f32 %v980_v26, %v908_v20  ;;  %v1064_v10 = vpop.permute.xlu0 %1063 }
 0x16a   : > { %1615 = vmatpush1.bf16.msra.mxu1 %v1614_v12  ;;  %v751_v27 = vpop.f32.mrb[26].mxu0 }
 0x16b   : > { %v1045_v30 = vmul.f32 %v981_v21, %v751_v27  ;;  %v912_v31 = vpop.f32.mrb[26].mxu1  ;;  %v753_v33 = vpop.f32.mrb[27].mxu0 }
 0x16c   : > { %v1047_v35 = vmul.f32 %v983_v23, %v912_v31  ;;  %v1046_v36 = vmul.f32 %v982_v24, %v753_v33  ;;  %v914_v37 = vpop.f32.mrb[27].mxu1 }
 0x16d   : > { %v1586_v39 = vpack.c.bf16 %v1045_v30, %v1041_v29  ;;  %v1048_v40 = vmul.f32 %v984_v28, %v914_v37  ;;  %v1069_v22 = vpop.permute.xlu0 %1068 }
 0x16e   : > { %v1618_v41 = vpack.c.bf16 %v1047_v35, %v1043_v25  ;;  %v1584_v42 = vpack.c.bf16 %v1046_v36, %v1042_v34  ;;  %v757_v43 = vpop.f32.mrb[28].mxu0 }
 0x16f   : > { %v1616_v44 = vpack.c.bf16 %v1048_v40, %v1044_v38  ;;  %v759_v45 = vpop.f32.mrb[29].mxu0  ;;  %v918_v46 = vpop.f32.mrb[28].mxu1  ;;  %v1049_v58 = vmul.f32 %v985_v48, %v757_v43 }
 0x170   : > { %1585 = vmatprep.subr.bf16.mxu0 %v1584_v42  ;;  %v920_v49 = vpop.f32.mrb[29].mxu1  ;;  %v1051_v54 = vmul.f32 %v987_v47, %v918_v46  ;;  %v1050_v62 = vmul.f32 %v986_v51, %v759_v45 }
 0x171   : > { %1617 = vmatprep.subr.bf16.mxu1 %v1616_v44  ;;  %1587 = vmatpush1.bf16.msra.mxu0 %v1586_v39  ;;  %v1052_v2 = vmul.f32 %v988_v55, %v920_v49 }
 0x172   : > { %1619 = vmatpush1.bf16.msra.mxu1 %v1618_v41  ;;  %v763_v56 = vpop.f32.mrb[30].mxu0 }
 0x173   : > { %v1053_v59 = vmul.f32 %v989_v50, %v763_v56  ;;  %v924_v60 = vpop.f32.mrb[30].mxu1  ;;  %v765_v61 = vpop.f32.mrb[31].mxu0 }
 0x174   : > { %v1055_v63 = vmul.f32 %v991_v52, %v924_v60  ;;  %v1054_v0 = vmul.f32 %v990_v53, %v765_v61  ;;  %v926_v1 = vpop.f32.mrb[31].mxu1 }
 0x175   : > { %v1590_v3 = vpack.c.bf16 %v1053_v59, %v1049_v58  ;;  %v1056_v4 = vmul.f32 %v992_v57, %v926_v1 }
 0x176   : > { %v1622_v5 = vpack.c.bf16 %v1055_v63, %v1051_v54  ;;  %v1588_v6 = vpack.c.bf16 %v1054_v0, %v1050_v62 }
 0x177   : > { %v1620_v7 = vpack.c.bf16 %v1056_v4, %v1052_v2 }
 0x178   : > { %1589 = vmatprep.subr.bf16.mxu0 %v1588_v6 }
 0x179   : > { %1621 = vmatprep.subr.bf16.mxu1 %v1620_v7  ;;  %1591 = vmatpush1.bf16.msra.mxu0 %v1590_v3 }
 0x17a   : > { %1623 = vmatpush1.bf16.msra.mxu1 %v1622_v5 }
 0x17c   : > { %1136 = vmatmul.mubr.f32.vlgmr.msra.gmra.mrb[32].mxu0 %v1057_v8 }
 0x17d   : > { %1213 = vmatmul.mubr.f32.vlgmr.msra.gmra.mrb[32].mxu1 %v1057_v8  ;;  %1141 = vmatprep.mubr.f32.mxu0 %v1691_v32 }
 0x17e   : > { %1218 = vmatprep.mubr.f32.mxu1 %v1691_v32 }
 0x180   : > { %1142 = vmatmul.mubr.f32.gmra.mrb[34].mxu0 %v1058_v9 }
 0x181   : > { %1219 = vmatmul.mubr.f32.gmra.mrb[34].mxu1 %v1058_v9 }
 0x24f   : > { %v1137_v11 = vpop.f32.mrb[32].mxu0 }
 0x250   : > { %v1138_v12 = vadd.f32 %v1137_v11, %v1064_v10  ;;  %v1214_v13 = vpop.f32.mrb[32].mxu1  ;;  %v1139_v14 = vpop.f32.mrb[33].mxu0 }
 0x251   : > { %v1215_v15 = vadd.f32 %v1214_v13, %v1064_v10  ;;  %v1140_v16 = vadd.f32 %v1139_v14, %v1064_v10  ;;  %v1216_v17 = vpop.f32.mrb[33].mxu1 }
 0x252   : > { %v1233_v18 = vmin.f32 %v1138_v12, 0.0  ;;  %v2217_v19 = vadd.f32 %v1216_v17, %v1064_v10  ;;  %vm1225_vm1 = vcmp.gt.f32.partialorder %v1138_v12, 0.0 }
 0x253   : > { %v1235_v20 = vmin.f32 %v1215_v15, 0.0  ;;  %v1234_v21 = vmin.f32 %v1140_v16, 0.0  ;;  %v1143_v23 = vpop.f32.mrb[34].mxu0  ;;  %vm1227_vm2 = vcmp.gt.f32.partialorder %v1215_v15, 0.0  ;;  %vm1226_vm3 = vcmp.gt.f32.partialorder %v1140_v16, 0.0 }
 0x254   : > { %v1241_v24 = vmul.f32 1.442695, %v1233_v18  ;;  %v1236_v32 = vmin.f32 %v2217_v19, 0.0  ;;  %v1144_v25 = vadd.f32 %v1143_v23, %v1069_v22  ;;  %v1220_v26 = vpop.f32.mrb[34].mxu1  ;;  %v1145_v27 = vpop.f32.mrb[35].mxu0  ;;  %vm1228_vm4 = vcmp.gt.f32.partialorder %v2217_v19, 0.0 }
 0x255   : > { %v1245_v28 = vmul.f32 1.442695, %v1235_v20  ;;  %v1243_v29 = vmul.f32 1.442695, %v1234_v21  ;;  %v1221_v30 = vadd.f32 %v1220_v26, %v1069_v22  ;;  %v2220_v31 = vadd.f32 %v1145_v27, %v1069_v22  ;;  %v1222_v33 = vpop.f32.mrb[35].mxu1 }
 0x256   : > { %1651 = vpow2.f32 %v1241_v24  ;;  %v1247_v34 = vmul.f32 1.442695, %v1236_v32  ;;  %v1237_v35 = vmin.f32 %v1144_v25, 0.0  ;;  %v2223_v39 = vadd.f32 %v1222_v33, %v1069_v22 }
 0x257   : > { %1653 = vpow2.f32 %v1245_v28  ;;  %v1239_v36 = vmin.f32 %v1221_v30, 0.0  ;;  %v1238_v38 = vmin.f32 %v2220_v31, 0.0  ;;  %vm1229_vm5 = vcmp.gt.f32.partialorder %v1144_v25, 0.0 }
 0x258   : > { %1655 = vpow2.f32 %v1243_v29  ;;  %v1249_v37 = vmul.f32 1.442695, %v1237_v35  ;;  %v1240_v42 = vmin.f32 %v2223_v39, 0.0  ;;  %vm1231_vm6 = vcmp.gt.f32.partialorder %v1221_v30, 0.0 }
 0x259   : > { %1657 = vpow2.f32 %v1247_v34  ;;  %v1253_v40 = vmul.f32 1.442695, %v1239_v36  ;;  %v1251_v41 = vmul.f32 1.442695, %v1238_v38  ;;  %vm1230_vm7 = vcmp.gt.f32.partialorder %v2220_v31, 0.0 }
 0x25a   : > { %1659 = vpow2.f32 %v1249_v37  ;;  %v1255_v43 = vmul.f32 1.442695, %v1240_v42  ;;  %vm1232_vm8 = vcmp.gt.f32.partialorder %v2223_v39, 0.0 }
 0x25b   : > { %1661 = vpow2.f32 %v1253_v40 }
 0x25c   : > { %1663 = vpow2.f32 %v1251_v41 }
 0x25d   : > { %1665 = vpow2.f32 %v1255_v43 }
 0x260   : > { %v1652_v44 = vpop.eup %1651 }
 0x261   : > { %v1654_v45 = vpop.eup %1653  ;;  %v1511_v46 = vadd.f32 -1.0, %v1652_v44 }
 0x262   : > { %v1656_v47 = vpop.eup %1655  ;;  %v1513_v48 = vadd.f32 -1.0, %v1654_v45 }
 0x263   : > { %v1658_v49 = vpop.eup %1657  ;;  %v1265_v50 = vsel %vm1225_vm1, %v1138_v12, %v1511_v46  ;;  %v1512_v51 = vadd.f32 -1.0, %v1656_v47 }
 0x264   : > { %v1660_v52 = vpop.eup %1659  ;;  %1273 = vst [vmem:[%s2227_s12] sm:$0xff] %v1265_v50  ;;  %v1294_v53 = vmul.f32 %v1265_v50, %v1265_v50  ;;  %v1514_v54 = vadd.f32 -1.0, %v1658_v49  ;;  %v1267_v55 = vsel %vm1227_vm2, %v1215_v15, %v1513_v48 }
 0x265   : > { %v1662_v56 = vpop.eup %1661  ;;  %v1266_v57 = vsel %vm1226_vm3, %v1140_v16, %v1512_v51  ;;  %v1515_v58 = vadd.f32 -1.0, %v1660_v52  ;;  %1275 = vst [vmem:[%s2227_s12 + $0x10] sm:$0xff] %v1267_v55  ;;  %v1296_v2 = vmul.f32 %v1267_v55, %v1267_v55 }
 0x266   : > { %v1664_v59 = vpop.eup %1663  ;;  %1274 = vst [vmem:[%s2227_s12 + $0x8] sm:$0xff] %v1266_v57  ;;  %v1295_v60 = vmul.f32 %v1266_v57, %v1266_v57  ;;  %v1517_v61 = vadd.f32 -1.0, %v1662_v56  ;;  %v1268_v62 = vsel %vm1228_vm4, %v2217_v19, %v1514_v54  ;;  %v1281_v63 = vadd.f32 %v1266_v57, %v1265_v50 }
 0x267   : > { %v1269_v0 = vsel %vm1229_vm5, %v1144_v25, %v1515_v58  ;;  %v1516_v1 = vadd.f32 -1.0, %v1664_v59  ;;  %1276 = vst [vmem:[%s2227_s12 + $0x18] sm:$0xff] %v1268_v62  ;;  %v1666_v3 = vpop.eup %1665  ;;  %v1297_v9 = vmul.f32 %v1268_v62, %v1268_v62 }
 0x268   : > { %1277 = vst [vmem:[%s2227_s12 + $0x20] sm:$0xff] %v1269_v0  ;;  %v1298_v4 = vmul.f32 %v1269_v0, %v1269_v0  ;;  %v1271_v5 = vsel %vm1231_vm6, %v1221_v30, %v1517_v61  ;;  %v1282_v6 = vadd.f32 %v1281_v63, %v1267_v55  ;;  %v1302_v7 = vadd.f32 %v1295_v60, %v1294_v53 }
 0x269   : > { %1279 = vst [vmem:[%s2227_s12 + $0x30] sm:$0xff] %v1271_v5  ;;  %v1270_v8 = vsel %vm1230_vm7, %v2220_v31, %v1516_v1  ;;  %v1518_v10 = vadd.f32 -1.0, %v1666_v3  ;;  %v1300_v18 = vmul.f32 %v1271_v5, %v1271_v5 }
 0x26a   : > { %1278 = vst [vmem:[%s2227_s12 + $0x28] sm:$0xff] %v1270_v8  ;;  %v1299_v11 = vmul.f32 %v1270_v8, %v1270_v8  ;;  %v1283_v12 = vadd.f32 %v1282_v6, %v1268_v62  ;;  %v1303_v13 = vadd.f32 %v1302_v7, %v1296_v2  ;;  %v1286_v14 = vadd.f32 %v1270_v8, %v1269_v0 }
 0x26b   : > { %v1272_v15 = vsel %vm1232_vm8, %v2223_v39, %v1518_v10  ;;  %v1342_v27 = vld [vmem:[%s2227_s12] sm:$0xff] (%p1763_p5) }
 0x26c   : > { %1284 = vadd.xlane.f32.xlu1 %v1283_v12  ;;  %v1304_v16 = vadd.f32 %v1303_v13, %v1297_v9  ;;  %1280 = vst [vmem:[%s2227_s12 + $0x38] sm:$0xff] %v1272_v15  ;;  %v1287_v17 = vadd.f32 %v1286_v14, %v1271_v5  ;;  %v1307_v19 = vadd.f32 %v1299_v11, %v1298_v4  ;;  %v1346_v29 = vld [vmem:[%s2227_s12 + $0x10] sm:$0xff] (%p1763_p5)  ;;  %1343 = vst [vmem:[%s1329_s20] sm:$0xff] (%p1763_p5), %v1342_v27 }
 0x26d   : > { %v1301_v21 = vmul.f32 %v1272_v15, %v1272_v15  ;;  %v1344_v28 = vld [vmem:[%s2227_s12 + $0x8] sm:$0xff] (%p1763_p5)  ;;  %1347 = vst [vmem:[%s1329_s20 + $0x10] sm:$0xff] (%p1763_p5), %v1346_v29 }
 0x26e   : > { %1305 = vadd.xlane.f32.xlu0 %v1304_v16  ;;  %v1288_v20 = vadd.f32 %v1287_v17, %v1272_v15  ;;  %v1308_v22 = vadd.f32 %v1307_v19, %v1300_v18  ;;  %v1348_v30 = vld [vmem:[%s2227_s12 + $0x18] sm:$0xff] (%p1763_p5)  ;;  %1345 = vst [vmem:[%s1329_s20 + $0x8] sm:$0xff] (%p1763_p5), %v1344_v28 }
 0x26f   : > { %v1350_v31 = vld [vmem:[%s2227_s12 + $0x20] sm:$0xff] (%p1763_p5)  ;;  %1349 = vst [vmem:[%s1329_s20 + $0x18] sm:$0xff] (%p1763_p5), %v1348_v30 }
 0x270   : > { %1289 = vadd.xlane.f32.xlu1 %v1288_v20  ;;  %v1309_v23 = vadd.f32 %v1308_v22, %v1301_v21  ;;  %1351 = vst [vmem:[%s1329_s20 + $0x80] sm:$0xff] (%p1763_p5), %v1350_v31  ;;  %v1354_v34 = vld [vmem:[%s2227_s12 + $0x30] sm:$0xff] (%p1763_p5) }
 0x271   : > { %v1352_v33 = vld [vmem:[%s2227_s12 + $0x28] sm:$0xff] (%p1763_p5)  ;;  %1355 = vst [vmem:[%s1329_s20 + $0x90] sm:$0xff] (%p1763_p5), %v1354_v34 }
 0x272   : > { %1353 = vst [vmem:[%s1329_s20 + $0x88] sm:$0xff] (%p1763_p5), %v1352_v33 }
 0x273   : > { %v1356_v35 = vld [vmem:[%s2227_s12 + $0x38] sm:$0xff] (%p1763_p5) }
 0x274   : > { %1310 = vadd.xlane.f32.xlu1 %v1309_v23  ;;  %1357 = vst [vmem:[%s1329_s20 + $0x98] sm:$0xff] (%p1763_p5), %v1356_v35 }
 0x2f9   : > { %v1285_v24 = vpop.xlane.xlu1 %1284 }
 0x2fa   : > { %1292 = vst.msk [vmem:[%s509_s16] sm:$0xff] %vm1291_vm9, %v1285_v24 }
 0x2fb   : > { %v1306_v32 = vpop.xlane.xlu0 %1305 }
 0x2fc   : > { %1313 = vst.msk [vmem:[%s509_s16] sm:$0xff] %vm1312_vm10, %v1306_v32  ;;  %1326 = sbr.rel (!%p1763_p5) target bundleno = 771 (0x303), region = 90 }
 0x2fd   : > { %v1290_v25 = vpop.xlane.xlu1 %1289 }
 0x2fe   : > { %1293 = vst.msk [vmem:[%s509_s16 + $0x8] sm:$0xff] %vm1291_vm9, %v1290_v25 }
 0x301   : > { %v1311_v26 = vpop.xlane.xlu1 %1310 }
 0x302   : > { %1314 = vst.msk [vmem:[%s509_s16 + $0x8] sm:$0xff] %vm1312_vm10, %v1311_v26 }
 0x303 PF: > { %p14_p11 = scmp.ge.s32.totalorder %s1747_s25, 6   ;;  %s2282_s21 = smov %s1685_s22 }
 0x304   : > { %s2283_s22 = smov %s1757_s28  ;;  %s2284_s23 = smov %s1747_s25 }
 0x305   :  { %16 = sbr.rel (!%p14_p11) target bundleno = 2 (0x2), region = 164 }

</bundles_post_ra>
